<compile_context>
chip_gen: v5e
topology: v5e:2x2
jax: 0.10.0
libtpu: 0.0.40
codegen_flags: <defaults>
</compile_context>

<pallas_src>
import functools
from dataclasses import dataclass

import jax
import jax.numpy as jnp
from jax import lax
from jax.experimental import pallas as pl
from jax.experimental.pallas import tpu as pltpu


# ----------------------------- fused Pallas kernel -----------------------------

def _layernorm(x, g, b, eps):
    mean = jnp.mean(x, axis=-1, keepdims=True)
    var = jnp.mean((x - mean) ** 2, axis=-1, keepdims=True)
    return (x - mean) * lax.rsqrt(var + eps) * g + b


def _encoder_kernel(
    x_emb_ref, eg_ref, eb_ref,
    wqkv_ref, bqkv_ref, wo_ref, bo_ref, ln1g_ref, ln1b_ref,
    wi_ref, bi_ref, wf_ref, bf_ref, ln2g_ref, ln2b_ref,
    clsw_ref, clsb_ref,
    lhs_ref, logits_ref,
    *, num_layers, num_heads, head_dim, eps,
):
    """One grid step == one full example (all layers + classifier)."""
    # Embedding LayerNorm (f32).
    x = _layernorm(x_emb_ref[0].astype(jnp.float32), eg_ref[...], eb_ref[...], eps)
    seq_len, hidden = x.shape
    scale = 1.0 / (head_dim ** 0.5)

    def layer_body(l, x):
        # ---- self-attention block (per-example (S,S) scores, no mask) ----
        xb = x.astype(jnp.bfloat16)
        qkv = jnp.dot(xb, wqkv_ref[l],
                      preferred_element_type=jnp.float32) + bqkv_ref[l]
        q = qkv[:, :hidden]
        k = qkv[:, hidden:2 * hidden]
        v = qkv[:, 2 * hidden:]

        wo = wo_ref[l]                                   # [H, H] bf16
        # ctx @ Wo == sum_h ctx_h @ Wo[h*dh:(h+1)*dh, :] -> no concat/transpose.
        attn_out = jnp.zeros((seq_len, hidden), jnp.float32)
        for h in range(num_heads):                       # nh=4, dh=32: small unroll
            sl = slice(h * head_dim, (h + 1) * head_dim)
            qh = q[:, sl].astype(jnp.bfloat16)
            kh = k[:, sl].astype(jnp.bfloat16)
            vh = v[:, sl].astype(jnp.bfloat16)
            # q @ k^T via dot_general contracting last dims (no XLU transpose).
            s = lax.dot_general(qh, kh, (((1,), (1,)), ((), ())),
                                preferred_element_type=jnp.float32) * scale
            m = jnp.max(s, axis=-1, keepdims=True)
            p = jnp.exp(s - m)
            p = p * pl.reciprocal(jnp.sum(p, axis=-1, keepdims=True), approx=True)
            ctx_h = jnp.dot(p.astype(jnp.bfloat16), vh,
                            preferred_element_type=jnp.float32)
            attn_out = attn_out + jnp.dot(ctx_h.astype(jnp.bfloat16), wo[sl, :],
                                          preferred_element_type=jnp.float32)
        attn_out = attn_out + bo_ref[l]
        x = _layernorm(x + attn_out, ln1g_ref[l], ln1b_ref[l], eps)   # post-LN

        # ---- feed-forward block ----
        xb = x.astype(jnp.bfloat16)
        hmid = jnp.dot(xb, wi_ref[l],
                       preferred_element_type=jnp.float32) + bi_ref[l]
        hmid = jax.nn.gelu(hmid)
        ffn = jnp.dot(hmid.astype(jnp.bfloat16), wf_ref[l],
                      preferred_element_type=jnp.float32) + bf_ref[l]
        x = _layernorm(x + ffn, ln2g_ref[l], ln2b_ref[l], eps)
        return x

    x = lax.fori_loop(0, num_layers, layer_body, x, unroll=True)

    # last_hidden_state (H=128 -> lane-dense store) + fused padded classifier.
    lhs_ref[0] = x.astype(lhs_ref.dtype)
    logits_ref[0] = (
        jnp.dot(x.astype(jnp.bfloat16), clsw_ref[...],
                preferred_element_type=jnp.float32) + clsb_ref[...]
    ).astype(logits_ref.dtype)


# ------------------------------ model (glue) -------------------------------

@dataclass
class Config:
    model: str = "synthetic-deberta-v2-tiny"
    freeze_encoder: bool = True       # irrelevant for forward / eval
    dropout: float = 0.1              # eval mode -> identity
    vocab_size: int = 128
    hidden_size: int = 128            # 128-lane dense (head_dim = 32)
    num_layers: int = 2
    num_heads: int = 4
    intermediate_size: int = 256


def init_params(cfg: Config, num_classes: int, key):
    H, I = cfg.hidden_size, cfg.intermediate_size
    V, L = cfg.vocab_size, cfg.num_layers
    ks = jax.random.split(key, 8)

    def rnd(k, shape):
        return jax.random.normal(k, shape, jnp.float32) * 0.02

    # Per-layer weights stacked with a leading layer axis (VMEM-resident in the
    # fused kernel; streamed per-layer only at real DeBERTa sizes).
    return {
        "word_emb": rnd(ks[0], (V, H)),
        "emb_ln_g": jnp.ones((H,), jnp.float32),
        "emb_ln_b": jnp.zeros((H,), jnp.float32),
        "wqkv": rnd(ks[1], (L, H, 3 * H)),
        "bqkv": jnp.zeros((L, 3 * H), jnp.float32),
        "wo": rnd(ks[2], (L, H, H)),
        "bo": jnp.zeros((L, H), jnp.float32),
        "ln1_g": jnp.ones((L, H), jnp.float32),
        "ln1_b": jnp.zeros((L, H), jnp.float32),
        "wi": rnd(ks[3], (L, H, I)),
        "bi": jnp.zeros((L, I), jnp.float32),
        "wf": rnd(ks[4], (L, I, H)),
        "bf": jnp.zeros((L, H), jnp.float32),
        "ln2_g": jnp.ones((L, H), jnp.float32),
        "ln2_b": jnp.zeros((L, H), jnp.float32),
        "cls_w": rnd(ks[5], (H, num_classes)),
        "cls_b": jnp.zeros((num_classes,), jnp.float32),
    }


def tagging_model_forward(params, cfg: Config, input_ids, num_classes,
                          return_cls=False, out_last_hidden_state=False):
    """Mirrors TaggingModel.forward (inference / eval mode)."""
    B, S = input_ids.shape
    H, I, L = cfg.hidden_size, cfg.intermediate_size, cfg.num_layers
    nh = cfg.num_heads
    dh = H // nh
    C_PAD = 128  # lane-dense classifier output width (real classes in [:num_classes])
    bf16 = jnp.bfloat16

    # ---- glue: embedding gather + parameter packing (no hot-path compute) ----
    x_emb = jnp.take(params["word_emb"], input_ids.reshape(-1), axis=0)
    x_emb = x_emb.reshape(B, S, H)

    eg = params["emb_ln_g"].reshape(1, H)
    eb = params["emb_ln_b"].reshape(1, H)
    # Weight matrices in bf16 (halved HBM->VMEM bytes, native MXU dtype);
    # biases / LayerNorm params stay f32.
    wqkv = params["wqkv"].astype(bf16)
    bqkv = params["bqkv"].reshape(L, 1, 3 * H)
    wo = params["wo"].astype(bf16)
    bo = params["bo"].reshape(L, 1, H)
    ln1g = params["ln1_g"].reshape(L, 1, H)
    ln1b = params["ln1_b"].reshape(L, 1, H)
    wi = params["wi"].astype(bf16)
    bi = params["bi"].reshape(L, 1, I)
    wf = params["wf"].astype(bf16)
    bf = params["bf"].reshape(L, 1, H)
    ln2g = params["ln2_g"].reshape(L, 1, H)
    ln2b = params["ln2_b"].reshape(L, 1, H)
    clsw = jnp.zeros((H, C_PAD), jnp.float32).at[:, :num_classes].set(
        params["cls_w"]).astype(bf16)
    clsb = jnp.zeros((1, C_PAD), jnp.float32).at[:, :num_classes].set(
        params["cls_b"].reshape(1, num_classes))

    def full(shape):
        nd = len(shape)
        return pl.BlockSpec(shape, lambda b, _nd=nd: (0,) * _nd)

    def per_batch(shape2d):
        return pl.BlockSpec((1,) + shape2d, lambda b: (b, 0, 0))

    grid_spec = pltpu.PrefetchScalarGridSpec(
        num_scalar_prefetch=0,
        grid=(B,),                        # parallel over examples (megacore on v7x)
        in_specs=[
            per_batch((S, H)),            # x_emb
            full((1, H)), full((1, H)),   # emb LN g/b
            full((L, H, 3 * H)),          # wqkv (bf16)
            full((L, 1, 3 * H)),          # bqkv
            full((L, H, H)),              # wo (bf16)
            full((L, 1, H)),              # bo
            full((L, 1, H)), full((L, 1, H)),   # ln1 g/b
            full((L, H, I)),              # wi (bf16)
            full((L, 1, I)),              # bi
            full((L, I, H)),              # wf (bf16)
            full((L, 1, H)),              # bf
            full((L, 1, H)), full((L, 1, H)),   # ln2 g/b
            full((H, C_PAD)),             # cls_w (padded, bf16)
            full((1, C_PAD)),             # cls_b (padded)
        ],
        out_specs=[
            per_batch((S, H)),            # last_hidden_state (lane-dense, H=128)
            per_batch((S, C_PAD)),        # padded logits (lane-dense)
        ],
    )

    # Advisory cost estimate so XLA schedules neighbors around the custom call.
    flops = int(B * (L * (2 * S * H * 3 * H          # fused QKV
                          + 2 * 2 * nh * S * S * dh  # scores + ctx
                          + 2 * S * H * H            # ctx @ Wo (folded per head)
                          + 2 * 2 * S * H * I)       # FFN in + out
                     + 2 * S * H * C_PAD))           # classifier
    transcendentals = int(B * L * (nh * S * S + S * I))
    ins = (x_emb, eg, eb, wqkv, bqkv, wo, bo, ln1g, ln1b,
           wi, bi, wf, bf, ln2g, ln2b, clsw, clsb)
    bytes_accessed = int(sum(a.size * a.dtype.itemsize for a in ins)
                         + B * S * H * 4 + B * S * C_PAD * 4)

    kernel = functools.partial(
        _encoder_kernel, num_layers=L, num_heads=nh, head_dim=dh, eps=1e-7)

    lhs, logits_pad = pl.pallas_call(
        kernel,
        out_shape=(jax.ShapeDtypeStruct((B, S, H), jnp.float32),
                   jax.ShapeDtypeStruct((B, S, C_PAD), jnp.float32)),
        grid_spec=grid_spec,
        compiler_params=pltpu.CompilerParams(
            dimension_semantics=("parallel",),          # examples are independent
            vmem_limit_bytes=32 * 1024 * 1024),         # explicit (v5e default is 16 MiB)
        cost_estimate=pl.CostEstimate(flops=flops,
                                      transcendentals=transcendentals,
                                      bytes_accessed=bytes_accessed),
    )(*ins)

    last_hidden_state = lhs                           # [B, S, H]
    sequence_output = last_hidden_state               # Dropout (eval) == identity
    logits = logits_pad[:, :, :num_classes]           # [B, S, C]

    result = [logits]
    if return_cls:
        result.append(sequence_output[:, 0, :])       # [B, H]
    if out_last_hidden_state:
        result.append(last_hidden_state)
    return result if (return_cls or out_last_hidden_state) else logits


# --------------------------- pure-JAX reference -----------------------------

def tagging_model_reference(params, cfg: Config, input_ids, num_classes):
    """f32 reference of the same synthetic encoder (for tolerance checking)."""
    B, S = input_ids.shape
    H, I, L = cfg.hidden_size, cfg.intermediate_size, cfg.num_layers
    nh = cfg.num_heads
    dh = H // nh
    eps = 1e-7

    def ln(x, g, b):
        mu = x.mean(-1, keepdims=True)
        var = ((x - mu) ** 2).mean(-1, keepdims=True)
        return (x - mu) * lax.rsqrt(var + eps) * g + b

    x = jnp.take(params["word_emb"], input_ids.reshape(-1), axis=0).reshape(B, S, H)
    x = ln(x, params["emb_ln_g"], params["emb_ln_b"])
    for l in range(L):
        qkv = x @ params["wqkv"][l] + params["bqkv"][l]
        q, k, v = qkv[..., :H], qkv[..., H:2 * H], qkv[..., 2 * H:]
        split = lambda t: t.reshape(B, S, nh, dh).transpose(0, 2, 1, 3)
        qh, kh, vh = split(q), split(k), split(v)
        s = jnp.einsum("bhqd,bhkd->bhqk", qh, kh) / (dh ** 0.5)
        p = jax.nn.softmax(s, axis=-1)
        ctx = jnp.einsum("bhqk,bhkd->bhqd", p, vh).transpose(0, 2, 1, 3).reshape(B, S, H)
        attn = ctx @ params["wo"][l] + params["bo"][l]
        x = ln(x + attn, params["ln1_g"][l], params["ln1_b"][l])
        hmid = jax.nn.gelu(x @ params["wi"][l] + params["bi"][l])
        ffn = hmid @ params["wf"][l] + params["bf"][l]
        x = ln(x + ffn, params["ln2_g"][l], params["ln2_b"][l])
    return x @ params["cls_w"] + params["cls_b"]


# --------------------------------- main ------------------------------------

if __name__ == "__main__":
    cfg = Config()
    num_classes = 4
    B, S = 2, 8

    key = jax.random.PRNGKey(0)
    k_param, k_ids = jax.random.split(key)
    params = init_params(cfg, num_classes, k_param)
    input_ids = jax.random.randint(k_ids, (B, S), 0, cfg.vocab_size, jnp.int32)

    # plain logits path
    logits = tagging_model_forward(params, cfg, input_ids, num_classes)
    logits = jax.block_until_ready(logits)
    assert logits.shape == (B, S, num_classes)
    assert bool(jnp.all(jnp.isfinite(logits)))

    # tolerance check vs f32 reference (bf16 MXU operands + approx reciprocal).
    ref = tagging_model_reference(params, cfg, input_ids, num_classes)
    assert bool(jnp.max(jnp.abs(logits - ref)) < 5e-2)

    # return_cls / out_last_hidden_state path
    logits2, cls_vec, lhs = tagging_model_forward(
        params, cfg, input_ids, num_classes,
        return_cls=True, out_last_hidden_state=True)
    jax.block_until_ready((logits2, cls_vec, lhs))
    assert cls_vec.shape == (B, cfg.hidden_size)
    assert lhs.shape == (B, S, cfg.hidden_size)
    assert bool(jnp.allclose(logits, logits2))

    print("KERNEL_OK")
</pallas_src>

<mosaic_0001>
module attributes {stable_mosaic.version = 11 : i64} {
  func.func @_encoder_kernel(%arg0: i32, %arg1: memref<1x8x128xf32, #tpu.memory_space<vmem>>, %arg2: memref<1x128xf32, #tpu.memory_space<vmem>>, %arg3: memref<1x128xf32, #tpu.memory_space<vmem>>, %arg4: memref<2x128x384xbf16, #tpu.memory_space<vmem>>, %arg5: memref<2x1x384xf32, #tpu.memory_space<vmem>>, %arg6: memref<2x128x128xbf16, #tpu.memory_space<vmem>>, %arg7: memref<2x1x128xf32, #tpu.memory_space<vmem>>, %arg8: memref<2x1x128xf32, #tpu.memory_space<vmem>>, %arg9: memref<2x1x128xf32, #tpu.memory_space<vmem>>, %arg10: memref<2x128x256xbf16, #tpu.memory_space<vmem>>, %arg11: memref<2x1x256xf32, #tpu.memory_space<vmem>>, %arg12: memref<2x256x128xbf16, #tpu.memory_space<vmem>>, %arg13: memref<2x1x128xf32, #tpu.memory_space<vmem>>, %arg14: memref<2x1x128xf32, #tpu.memory_space<vmem>>, %arg15: memref<2x1x128xf32, #tpu.memory_space<vmem>>, %arg16: memref<128x128xbf16, #tpu.memory_space<vmem>>, %arg17: memref<1x128xf32, #tpu.memory_space<vmem>>, %arg18: memref<1x8x128xf32, #tpu.memory_space<vmem>>, %arg19: memref<1x8x128xf32, #tpu.memory_space<vmem>>) attributes {dimension_semantics = [#tpu.dimension_semantics<parallel>], iteration_bounds = array<i64: 2>, scalar_prefetch = 0 : i64, scratch_operands = 0 : i64, tpu.core_type = #tpu.core_type<tc>, window_params = [{transform_indices = @transform_0, window_bounds = array<i64: 1, 8, 128>}, {pipeline_mode = #tpu.pipeline_mode<synchronous>, transform_indices = @transform_1, window_bounds = array<i64: 1, 128>}, {pipeline_mode = #tpu.pipeline_mode<synchronous>, transform_indices = @transform_2, window_bounds = array<i64: 1, 128>}, {pipeline_mode = #tpu.pipeline_mode<synchronous>, transform_indices = @transform_3, window_bounds = array<i64: 2, 128, 384>}, {pipeline_mode = #tpu.pipeline_mode<synchronous>, transform_indices = @transform_4, window_bounds = array<i64: 2, 1, 384>}, {pipeline_mode = #tpu.pipeline_mode<synchronous>, transform_indices = @transform_5, window_bounds = array<i64: 2, 128, 128>}, {pipeline_mode = #tpu.pipeline_mode<synchronous>, transform_indices = @transform_6, window_bounds = array<i64: 2, 1, 128>}, {pipeline_mode = #tpu.pipeline_mode<synchronous>, transform_indices = @transform_7, window_bounds = array<i64: 2, 1, 128>}, {pipeline_mode = #tpu.pipeline_mode<synchronous>, transform_indices = @transform_8, window_bounds = array<i64: 2, 1, 128>}, {pipeline_mode = #tpu.pipeline_mode<synchronous>, transform_indices = @transform_9, window_bounds = array<i64: 2, 128, 256>}, {pipeline_mode = #tpu.pipeline_mode<synchronous>, transform_indices = @transform_10, window_bounds = array<i64: 2, 1, 256>}, {pipeline_mode = #tpu.pipeline_mode<synchronous>, transform_indices = @transform_11, window_bounds = array<i64: 2, 256, 128>}, {pipeline_mode = #tpu.pipeline_mode<synchronous>, transform_indices = @transform_12, window_bounds = array<i64: 2, 1, 128>}, {pipeline_mode = #tpu.pipeline_mode<synchronous>, transform_indices = @transform_13, window_bounds = array<i64: 2, 1, 128>}, {pipeline_mode = #tpu.pipeline_mode<synchronous>, transform_indices = @transform_14, window_bounds = array<i64: 2, 1, 128>}, {pipeline_mode = #tpu.pipeline_mode<synchronous>, transform_indices = @transform_15, window_bounds = array<i64: 128, 128>}, {pipeline_mode = #tpu.pipeline_mode<synchronous>, transform_indices = @transform_16, window_bounds = array<i64: 1, 128>}, {transform_indices = @transform_17, window_bounds = array<i64: 1, 8, 128>}, {transform_indices = @transform_18, window_bounds = array<i64: 1, 8, 128>}]} {
    %c0 = arith.constant 0 : index
    %c0_0 = arith.constant 0 : index
    %c0_1 = arith.constant 0 : index
    %0 = vector.load %arg1[%c0, %c0_0, %c0_1] : memref<1x8x128xf32, #tpu.memory_space<vmem>>, vector<1x8x128xf32>
    %1 = vector.shape_cast %0 : vector<1x8x128xf32> to vector<8x128xf32>
    %c0_2 = arith.constant 0 : index
    %c0_3 = arith.constant 0 : index
    %2 = vector.load %arg2[%c0_2, %c0_3] : memref<1x128xf32, #tpu.memory_space<vmem>>, vector<1x128xf32>
    %c0_4 = arith.constant 0 : index
    %c0_5 = arith.constant 0 : index
    %3 = vector.load %arg3[%c0_4, %c0_5] : memref<1x128xf32, #tpu.memory_space<vmem>>, vector<1x128xf32>
    %cst = arith.constant dense<0.000000e+00> : vector<8xf32>
    %4 = vector.multi_reduction <add>, %1, %cst [1] : vector<8x128xf32> to vector<8xf32>
    %5 = vector.shape_cast %4 : vector<8xf32> to vector<8x1xf32>
    %cst_6 = arith.constant 1.280000e+02 : f32
    %6 = vector.broadcast %cst_6 : f32 to vector<8x1xf32>
    %7 = arith.divf %5, %6 : vector<8x1xf32>
    %8 = vector.broadcast %7 : vector<8x1xf32> to vector<8x128xf32>
    %9 = arith.subf %1, %8 : vector<8x128xf32>
    %10 = arith.mulf %9, %9 : vector<8x128xf32>
    %cst_7 = arith.constant dense<0.000000e+00> : vector<8xf32>
    %11 = vector.multi_reduction <add>, %10, %cst_7 [1] : vector<8x128xf32> to vector<8xf32>
    %12 = vector.shape_cast %11 : vector<8xf32> to vector<8x1xf32>
    %cst_8 = arith.constant 1.280000e+02 : f32
    %13 = vector.broadcast %cst_8 : f32 to vector<8x1xf32>
    %14 = arith.divf %12, %13 : vector<8x1xf32>
    %15 = vector.broadcast %7 : vector<8x1xf32> to vector<8x128xf32>
    %16 = arith.subf %1, %15 : vector<8x128xf32>
    %cst_9 = arith.constant 1.000000e-07 : f32
    %17 = vector.broadcast %cst_9 : f32 to vector<8x1xf32>
    %18 = arith.addf %14, %17 : vector<8x1xf32>
    %19 = math.rsqrt %18 : vector<8x1xf32>
    %20 = vector.broadcast %19 : vector<8x1xf32> to vector<8x128xf32>
    %21 = arith.mulf %16, %20 : vector<8x128xf32>
    %22 = vector.broadcast %2 : vector<1x128xf32> to vector<8x128xf32>
    %23 = arith.mulf %21, %22 : vector<8x128xf32>
    %24 = vector.broadcast %3 : vector<1x128xf32> to vector<8x128xf32>
    %25 = arith.addf %23, %24 : vector<8x128xf32>
    %c0_i32 = arith.constant 0 : i32
    %26 = arith.truncf %25 : vector<8x128xf32> to vector<8x128xbf16>
    %27 = arith.index_cast %c0_i32 : i32 to index
    %c0_10 = arith.constant 0 : index
    %c0_11 = arith.constant 0 : index
    %28 = vector.load %arg4[%27, %c0_10, %c0_11] : memref<2x128x384xbf16, #tpu.memory_space<vmem>>, vector<1x128x384xbf16>
    %29 = vector.shape_cast %28 : vector<1x128x384xbf16> to vector<128x384xbf16>
    %cst_12 = arith.constant dense<0.000000e+00> : vector<8x384xf32>
    %30 = tpu.matmul %26, %29, %cst_12 {dimension_numbers = #tpu.dot_dimension_numbers<[1], [0], [0], [1], [0, 0, 1, 1], [], []>} : vector<8x128xbf16>, vector<128x384xbf16>, vector<8x384xf32> -> vector<8x384xf32>
    %31 = arith.index_cast %c0_i32 : i32 to index
    %c0_13 = arith.constant 0 : index
    %c0_14 = arith.constant 0 : index
    %32 = vector.load %arg5[%31, %c0_13, %c0_14] : memref<2x1x384xf32, #tpu.memory_space<vmem>>, vector<1x1x384xf32>
    %33 = vector.shape_cast %32 : vector<1x1x384xf32> to vector<1x384xf32>
    %34 = vector.broadcast %33 : vector<1x384xf32> to vector<8x384xf32>
    %35 = arith.addf %30, %34 : vector<8x384xf32>
    %36 = vector.extract_strided_slice %35 {offsets = [0, 0], sizes = [8, 128], strides = [1, 1]} : vector<8x384xf32> to vector<8x128xf32>
    %37 = vector.extract_strided_slice %35 {offsets = [0, 128], sizes = [8, 128], strides = [1, 1]} : vector<8x384xf32> to vector<8x128xf32>
    %38 = vector.extract_strided_slice %35 {offsets = [0, 256], sizes = [8, 128], strides = [1, 1]} : vector<8x384xf32> to vector<8x128xf32>
    %39 = arith.index_cast %c0_i32 : i32 to index
    %c0_15 = arith.constant 0 : index
    %c0_16 = arith.constant 0 : index
    %40 = vector.load %arg6[%39, %c0_15, %c0_16] : memref<2x128x128xbf16, #tpu.memory_space<vmem>>, vector<1x128x128xbf16>
    %41 = vector.shape_cast %40 : vector<1x128x128xbf16> to vector<128x128xbf16>
    %cst_17 = arith.constant 0.000000e+00 : f32
    %42 = vector.broadcast %cst_17 : f32 to vector<8x128xf32>
    %43 = vector.extract_strided_slice %36 {offsets = [0, 0], sizes = [8, 32], strides = [1, 1]} : vector<8x128xf32> to vector<8x32xf32>
    %44 = arith.truncf %43 : vector<8x32xf32> to vector<8x32xbf16>
    %45 = vector.extract_strided_slice %37 {offsets = [0, 0], sizes = [8, 32], strides = [1, 1]} : vector<8x128xf32> to vector<8x32xf32>
    %46 = arith.truncf %45 : vector<8x32xf32> to vector<8x32xbf16>
    %47 = vector.extract_strided_slice %38 {offsets = [0, 0], sizes = [8, 32], strides = [1, 1]} : vector<8x128xf32> to vector<8x32xf32>
    %48 = arith.truncf %47 : vector<8x32xf32> to vector<8x32xbf16>
    %cst_18 = arith.constant dense<0.000000e+00> : vector<8x8xf32>
    %49 = tpu.matmul %44, %46, %cst_18 {dimension_numbers = #tpu.dot_dimension_numbers<[1], [1], [0], [0], [0, 0, 1, 0], [], []>} : vector<8x32xbf16>, vector<8x32xbf16>, vector<8x8xf32> -> vector<8x8xf32>
    %cst_19 = arith.constant 0.176776692 : f32
    %50 = vector.broadcast %cst_19 : f32 to vector<8x8xf32>
    %51 = arith.mulf %49, %50 : vector<8x8xf32>
    %cst_20 = arith.constant dense<0xFF800000> : vector<8xf32>
    %52 = vector.multi_reduction <maximumf>, %51, %cst_20 [1] : vector<8x8xf32> to vector<8xf32>
    %53 = vector.shape_cast %52 : vector<8xf32> to vector<8x1xf32>
    %54 = vector.broadcast %53 : vector<8x1xf32> to vector<8x8xf32>
    %55 = arith.subf %51, %54 : vector<8x8xf32>
    %56 = math.exp %55 : vector<8x8xf32>
    %cst_21 = arith.constant dense<0.000000e+00> : vector<8xf32>
    %57 = vector.multi_reduction <add>, %56, %cst_21 [1] : vector<8x8xf32> to vector<8xf32>
    %58 = vector.shape_cast %57 : vector<8xf32> to vector<8x1xf32>
    %59 = tpu.reciprocal %58 {approx = true} : vector<8x1xf32> -> vector<8x1xf32>
    %60 = vector.broadcast %59 : vector<8x1xf32> to vector<8x8xf32>
    %61 = arith.mulf %56, %60 : vector<8x8xf32>
    %62 = arith.truncf %61 : vector<8x8xf32> to vector<8x8xbf16>
    %cst_22 = arith.constant dense<0.000000e+00> : vector<8x32xf32>
    %63 = tpu.matmul %62, %48, %cst_22 {dimension_numbers = #tpu.dot_dimension_numbers<[1], [0], [0], [1], [0, 0, 1, 1], [], []>} : vector<8x8xbf16>, vector<8x32xbf16>, vector<8x32xf32> -> vector<8x32xf32>
    %64 = arith.truncf %63 : vector<8x32xf32> to vector<8x32xbf16>
    %65 = vector.extract_strided_slice %41 {offsets = [0, 0], sizes = [32, 128], strides = [1, 1]} : vector<128x128xbf16> to vector<32x128xbf16>
    %cst_23 = arith.constant dense<0.000000e+00> : vector<8x128xf32>
    %66 = tpu.matmul %64, %65, %cst_23 {dimension_numbers = #tpu.dot_dimension_numbers<[1], [0], [0], [1], [0, 0, 1, 1], [], []>} : vector<8x32xbf16>, vector<32x128xbf16>, vector<8x128xf32> -> vector<8x128xf32>
    %67 = arith.addf %42, %66 : vector<8x128xf32>
    %68 = vector.extract_strided_slice %36 {offsets = [0, 32], sizes = [8, 32], strides = [1, 1]} : vector<8x128xf32> to vector<8x32xf32>
    %69 = arith.truncf %68 : vector<8x32xf32> to vector<8x32xbf16>
    %70 = vector.extract_strided_slice %37 {offsets = [0, 32], sizes = [8, 32], strides = [1, 1]} : vector<8x128xf32> to vector<8x32xf32>
    %71 = arith.truncf %70 : vector<8x32xf32> to vector<8x32xbf16>
    %72 = vector.extract_strided_slice %38 {offsets = [0, 32], sizes = [8, 32], strides = [1, 1]} : vector<8x128xf32> to vector<8x32xf32>
    %73 = arith.truncf %72 : vector<8x32xf32> to vector<8x32xbf16>
    %cst_24 = arith.constant dense<0.000000e+00> : vector<8x8xf32>
    %74 = tpu.matmul %69, %71, %cst_24 {dimension_numbers = #tpu.dot_dimension_numbers<[1], [1], [0], [0], [0, 0, 1, 0], [], []>} : vector<8x32xbf16>, vector<8x32xbf16>, vector<8x8xf32> -> vector<8x8xf32>
    %cst_25 = arith.constant 0.176776692 : f32
    %75 = vector.broadcast %cst_25 : f32 to vector<8x8xf32>
    %76 = arith.mulf %74, %75 : vector<8x8xf32>
    %cst_26 = arith.constant dense<0xFF800000> : vector<8xf32>
    %77 = vector.multi_reduction <maximumf>, %76, %cst_26 [1] : vector<8x8xf32> to vector<8xf32>
    %78 = vector.shape_cast %77 : vector<8xf32> to vector<8x1xf32>
    %79 = vector.broadcast %78 : vector<8x1xf32> to vector<8x8xf32>
    %80 = arith.subf %76, %79 : vector<8x8xf32>
    %81 = math.exp %80 : vector<8x8xf32>
    %cst_27 = arith.constant dense<0.000000e+00> : vector<8xf32>
    %82 = vector.multi_reduction <add>, %81, %cst_27 [1] : vector<8x8xf32> to vector<8xf32>
    %83 = vector.shape_cast %82 : vector<8xf32> to vector<8x1xf32>
    %84 = tpu.reciprocal %83 {approx = true} : vector<8x1xf32> -> vector<8x1xf32>
    %85 = vector.broadcast %84 : vector<8x1xf32> to vector<8x8xf32>
    %86 = arith.mulf %81, %85 : vector<8x8xf32>
    %87 = arith.truncf %86 : vector<8x8xf32> to vector<8x8xbf16>
    %cst_28 = arith.constant dense<0.000000e+00> : vector<8x32xf32>
    %88 = tpu.matmul %87, %73, %cst_28 {dimension_numbers = #tpu.dot_dimension_numbers<[1], [0], [0], [1], [0, 0, 1, 1], [], []>} : vector<8x8xbf16>, vector<8x32xbf16>, vector<8x32xf32> -> vector<8x32xf32>
    %89 = arith.truncf %88 : vector<8x32xf32> to vector<8x32xbf16>
    %90 = vector.extract_strided_slice %41 {offsets = [32, 0], sizes = [32, 128], strides = [1, 1]} : vector<128x128xbf16> to vector<32x128xbf16>
    %cst_29 = arith.constant dense<0.000000e+00> : vector<8x128xf32>
    %91 = tpu.matmul %89, %90, %cst_29 {dimension_numbers = #tpu.dot_dimension_numbers<[1], [0], [0], [1], [0, 0, 1, 1], [], []>} : vector<8x32xbf16>, vector<32x128xbf16>, vector<8x128xf32> -> vector<8x128xf32>
    %92 = arith.addf %67, %91 : vector<8x128xf32>
    %93 = vector.extract_strided_slice %36 {offsets = [0, 64], sizes = [8, 32], strides = [1, 1]} : vector<8x128xf32> to vector<8x32xf32>
    %94 = arith.truncf %93 : vector<8x32xf32> to vector<8x32xbf16>
    %95 = vector.extract_strided_slice %37 {offsets = [0, 64], sizes = [8, 32], strides = [1, 1]} : vector<8x128xf32> to vector<8x32xf32>
    %96 = arith.truncf %95 : vector<8x32xf32> to vector<8x32xbf16>
    %97 = vector.extract_strided_slice %38 {offsets = [0, 64], sizes = [8, 32], strides = [1, 1]} : vector<8x128xf32> to vector<8x32xf32>
    %98 = arith.truncf %97 : vector<8x32xf32> to vector<8x32xbf16>
    %cst_30 = arith.constant dense<0.000000e+00> : vector<8x8xf32>
    %99 = tpu.matmul %94, %96, %cst_30 {dimension_numbers = #tpu.dot_dimension_numbers<[1], [1], [0], [0], [0, 0, 1, 0], [], []>} : vector<8x32xbf16>, vector<8x32xbf16>, vector<8x8xf32> -> vector<8x8xf32>
    %cst_31 = arith.constant 0.176776692 : f32
    %100 = vector.broadcast %cst_31 : f32 to vector<8x8xf32>
    %101 = arith.mulf %99, %100 : vector<8x8xf32>
    %cst_32 = arith.constant dense<0xFF800000> : vector<8xf32>
    %102 = vector.multi_reduction <maximumf>, %101, %cst_32 [1] : vector<8x8xf32> to vector<8xf32>
    %103 = vector.shape_cast %102 : vector<8xf32> to vector<8x1xf32>
    %104 = vector.broadcast %103 : vector<8x1xf32> to vector<8x8xf32>
    %105 = arith.subf %101, %104 : vector<8x8xf32>
    %106 = math.exp %105 : vector<8x8xf32>
    %cst_33 = arith.constant dense<0.000000e+00> : vector<8xf32>
    %107 = vector.multi_reduction <add>, %106, %cst_33 [1] : vector<8x8xf32> to vector<8xf32>
    %108 = vector.shape_cast %107 : vector<8xf32> to vector<8x1xf32>
    %109 = tpu.reciprocal %108 {approx = true} : vector<8x1xf32> -> vector<8x1xf32>
    %110 = vector.broadcast %109 : vector<8x1xf32> to vector<8x8xf32>
    %111 = arith.mulf %106, %110 : vector<8x8xf32>
    %112 = arith.truncf %111 : vector<8x8xf32> to vector<8x8xbf16>
    %cst_34 = arith.constant dense<0.000000e+00> : vector<8x32xf32>
    %113 = tpu.matmul %112, %98, %cst_34 {dimension_numbers = #tpu.dot_dimension_numbers<[1], [0], [0], [1], [0, 0, 1, 1], [], []>} : vector<8x8xbf16>, vector<8x32xbf16>, vector<8x32xf32> -> vector<8x32xf32>
    %114 = arith.truncf %113 : vector<8x32xf32> to vector<8x32xbf16>
    %115 = vector.extract_strided_slice %41 {offsets = [64, 0], sizes = [32, 128], strides = [1, 1]} : vector<128x128xbf16> to vector<32x128xbf16>
    %cst_35 = arith.constant dense<0.000000e+00> : vector<8x128xf32>
    %116 = tpu.matmul %114, %115, %cst_35 {dimension_numbers = #tpu.dot_dimension_numbers<[1], [0], [0], [1], [0, 0, 1, 1], [], []>} : vector<8x32xbf16>, vector<32x128xbf16>, vector<8x128xf32> -> vector<8x128xf32>
    %117 = arith.addf %92, %116 : vector<8x128xf32>
    %118 = vector.extract_strided_slice %36 {offsets = [0, 96], sizes = [8, 32], strides = [1, 1]} : vector<8x128xf32> to vector<8x32xf32>
    %119 = arith.truncf %118 : vector<8x32xf32> to vector<8x32xbf16>
    %120 = vector.extract_strided_slice %37 {offsets = [0, 96], sizes = [8, 32], strides = [1, 1]} : vector<8x128xf32> to vector<8x32xf32>
    %121 = arith.truncf %120 : vector<8x32xf32> to vector<8x32xbf16>
    %122 = vector.extract_strided_slice %38 {offsets = [0, 96], sizes = [8, 32], strides = [1, 1]} : vector<8x128xf32> to vector<8x32xf32>
    %123 = arith.truncf %122 : vector<8x32xf32> to vector<8x32xbf16>
    %cst_36 = arith.constant dense<0.000000e+00> : vector<8x8xf32>
    %124 = tpu.matmul %119, %121, %cst_36 {dimension_numbers = #tpu.dot_dimension_numbers<[1], [1], [0], [0], [0, 0, 1, 0], [], []>} : vector<8x32xbf16>, vector<8x32xbf16>, vector<8x8xf32> -> vector<8x8xf32>
    %cst_37 = arith.constant 0.176776692 : f32
    %125 = vector.broadcast %cst_37 : f32 to vector<8x8xf32>
    %126 = arith.mulf %124, %125 : vector<8x8xf32>
    %cst_38 = arith.constant dense<0xFF800000> : vector<8xf32>
    %127 = vector.multi_reduction <maximumf>, %126, %cst_38 [1] : vector<8x8xf32> to vector<8xf32>
    %128 = vector.shape_cast %127 : vector<8xf32> to vector<8x1xf32>
    %129 = vector.broadcast %128 : vector<8x1xf32> to vector<8x8xf32>
    %130 = arith.subf %126, %129 : vector<8x8xf32>
    %131 = math.exp %130 : vector<8x8xf32>
    %cst_39 = arith.constant dense<0.000000e+00> : vector<8xf32>
    %132 = vector.multi_reduction <add>, %131, %cst_39 [1] : vector<8x8xf32> to vector<8xf32>
    %133 = vector.shape_cast %132 : vector<8xf32> to vector<8x1xf32>
    %134 = tpu.reciprocal %133 {approx = true} : vector<8x1xf32> -> vector<8x1xf32>
    %135 = vector.broadcast %134 : vector<8x1xf32> to vector<8x8xf32>
    %136 = arith.mulf %131, %135 : vector<8x8xf32>
    %137 = arith.truncf %136 : vector<8x8xf32> to vector<8x8xbf16>
    %cst_40 = arith.constant dense<0.000000e+00> : vector<8x32xf32>
    %138 = tpu.matmul %137, %123, %cst_40 {dimension_numbers = #tpu.dot_dimension_numbers<[1], [0], [0], [1], [0, 0, 1, 1], [], []>} : vector<8x8xbf16>, vector<8x32xbf16>, vector<8x32xf32> -> vector<8x32xf32>
    %139 = arith.truncf %138 : vector<8x32xf32> to vector<8x32xbf16>
    %140 = vector.extract_strided_slice %41 {offsets = [96, 0], sizes = [32, 128], strides = [1, 1]} : vector<128x128xbf16> to vector<32x128xbf16>
    %cst_41 = arith.constant dense<0.000000e+00> : vector<8x128xf32>
    %141 = tpu.matmul %139, %140, %cst_41 {dimension_numbers = #tpu.dot_dimension_numbers<[1], [0], [0], [1], [0, 0, 1, 1], [], []>} : vector<8x32xbf16>, vector<32x128xbf16>, vector<8x128xf32> -> vector<8x128xf32>
    %142 = arith.addf %117, %141 : vector<8x128xf32>
    %143 = arith.index_cast %c0_i32 : i32 to index
    %c0_42 = arith.constant 0 : index
    %c0_43 = arith.constant 0 : index
    %144 = vector.load %arg7[%143, %c0_42, %c0_43] : memref<2x1x128xf32, #tpu.memory_space<vmem>>, vector<1x1x128xf32>
    %145 = vector.shape_cast %144 : vector<1x1x128xf32> to vector<1x128xf32>
    %146 = vector.broadcast %145 : vector<1x128xf32> to vector<8x128xf32>
    %147 = arith.addf %142, %146 : vector<8x128xf32>
    %148 = arith.addf %25, %147 : vector<8x128xf32>
    %149 = arith.index_cast %c0_i32 : i32 to index
    %c0_44 = arith.constant 0 : index
    %c0_45 = arith.constant 0 : index
    %150 = vector.load %arg8[%149, %c0_44, %c0_45] : memref<2x1x128xf32, #tpu.memory_space<vmem>>, vector<1x1x128xf32>
    %151 = vector.shape_cast %150 : vector<1x1x128xf32> to vector<1x128xf32>
    %152 = arith.index_cast %c0_i32 : i32 to index
    %c0_46 = arith.constant 0 : index
    %c0_47 = arith.constant 0 : index
    %153 = vector.load %arg9[%152, %c0_46, %c0_47] : memref<2x1x128xf32, #tpu.memory_space<vmem>>, vector<1x1x128xf32>
    %154 = vector.shape_cast %153 : vector<1x1x128xf32> to vector<1x128xf32>
    %cst_48 = arith.constant dense<0.000000e+00> : vector<8xf32>
    %155 = vector.multi_reduction <add>, %148, %cst_48 [1] : vector<8x128xf32> to vector<8xf32>
    %156 = vector.shape_cast %155 : vector<8xf32> to vector<8x1xf32>
    %cst_49 = arith.constant 1.280000e+02 : f32
    %157 = vector.broadcast %cst_49 : f32 to vector<8x1xf32>
    %158 = arith.divf %156, %157 : vector<8x1xf32>
    %159 = vector.broadcast %158 : vector<8x1xf32> to vector<8x128xf32>
    %160 = arith.subf %148, %159 : vector<8x128xf32>
    %161 = arith.mulf %160, %160 : vector<8x128xf32>
    %cst_50 = arith.constant dense<0.000000e+00> : vector<8xf32>
    %162 = vector.multi_reduction <add>, %161, %cst_50 [1] : vector<8x128xf32> to vector<8xf32>
    %163 = vector.shape_cast %162 : vector<8xf32> to vector<8x1xf32>
    %cst_51 = arith.constant 1.280000e+02 : f32
    %164 = vector.broadcast %cst_51 : f32 to vector<8x1xf32>
    %165 = arith.divf %163, %164 : vector<8x1xf32>
    %166 = vector.broadcast %158 : vector<8x1xf32> to vector<8x128xf32>
    %167 = arith.subf %148, %166 : vector<8x128xf32>
    %cst_52 = arith.constant 1.000000e-07 : f32
    %168 = vector.broadcast %cst_52 : f32 to vector<8x1xf32>
    %169 = arith.addf %165, %168 : vector<8x1xf32>
    %170 = math.rsqrt %169 : vector<8x1xf32>
    %171 = vector.broadcast %170 : vector<8x1xf32> to vector<8x128xf32>
    %172 = arith.mulf %167, %171 : vector<8x128xf32>
    %173 = vector.broadcast %151 : vector<1x128xf32> to vector<8x128xf32>
    %174 = arith.mulf %172, %173 : vector<8x128xf32>
    %175 = vector.broadcast %154 : vector<1x128xf32> to vector<8x128xf32>
    %176 = arith.addf %174, %175 : vector<8x128xf32>
    %177 = arith.truncf %176 : vector<8x128xf32> to vector<8x128xbf16>
    %178 = arith.index_cast %c0_i32 : i32 to index
    %c0_53 = arith.constant 0 : index
    %c0_54 = arith.constant 0 : index
    %179 = vector.load %arg10[%178, %c0_53, %c0_54] : memref<2x128x256xbf16, #tpu.memory_space<vmem>>, vector<1x128x256xbf16>
    %180 = vector.shape_cast %179 : vector<1x128x256xbf16> to vector<128x256xbf16>
    %cst_55 = arith.constant dense<0.000000e+00> : vector<8x256xf32>
    %181 = tpu.matmul %177, %180, %cst_55 {dimension_numbers = #tpu.dot_dimension_numbers<[1], [0], [0], [1], [0, 0, 1, 1], [], []>} : vector<8x128xbf16>, vector<128x256xbf16>, vector<8x256xf32> -> vector<8x256xf32>
    %182 = arith.index_cast %c0_i32 : i32 to index
    %c0_56 = arith.constant 0 : index
    %c0_57 = arith.constant 0 : index
    %183 = vector.load %arg11[%182, %c0_56, %c0_57] : memref<2x1x256xf32, #tpu.memory_space<vmem>>, vector<1x1x256xf32>
    %184 = vector.shape_cast %183 : vector<1x1x256xf32> to vector<1x256xf32>
    %185 = vector.broadcast %184 : vector<1x256xf32> to vector<8x256xf32>
    %186 = arith.addf %181, %185 : vector<8x256xf32>
    %187 = arith.mulf %186, %186 : vector<8x256xf32>
    %188 = arith.mulf %186, %187 : vector<8x256xf32>
    %cst_58 = arith.constant 4.471500e-02 : f32
    %189 = vector.broadcast %cst_58 : f32 to vector<8x256xf32>
    %190 = arith.mulf %189, %188 : vector<8x256xf32>
    %191 = arith.addf %186, %190 : vector<8x256xf32>
    %cst_59 = arith.constant 0.797884583 : f32
    %192 = vector.broadcast %cst_59 : f32 to vector<8x256xf32>
    %193 = arith.mulf %192, %191 : vector<8x256xf32>
    %194 = math.tanh %193 : vector<8x256xf32>
    %cst_60 = arith.constant 1.000000e+00 : f32
    %195 = vector.broadcast %cst_60 : f32 to vector<8x256xf32>
    %196 = arith.addf %195, %194 : vector<8x256xf32>
    %cst_61 = arith.constant 5.000000e-01 : f32
    %197 = vector.broadcast %cst_61 : f32 to vector<8x256xf32>
    %198 = arith.mulf %197, %196 : vector<8x256xf32>
    %199 = arith.mulf %186, %198 : vector<8x256xf32>
    %200 = arith.truncf %199 : vector<8x256xf32> to vector<8x256xbf16>
    %201 = arith.index_cast %c0_i32 : i32 to index
    %c0_62 = arith.constant 0 : index
    %c0_63 = arith.constant 0 : index
    %202 = vector.load %arg12[%201, %c0_62, %c0_63] : memref<2x256x128xbf16, #tpu.memory_space<vmem>>, vector<1x256x128xbf16>
    %203 = vector.shape_cast %202 : vector<1x256x128xbf16> to vector<256x128xbf16>
    %cst_64 = arith.constant dense<0.000000e+00> : vector<8x128xf32>
    %204 = tpu.matmul %200, %203, %cst_64 {dimension_numbers = #tpu.dot_dimension_numbers<[1], [0], [0], [1], [0, 0, 1, 1], [], []>} : vector<8x256xbf16>, vector<256x128xbf16>, vector<8x128xf32> -> vector<8x128xf32>
    %205 = arith.index_cast %c0_i32 : i32 to index
    %c0_65 = arith.constant 0 : index
    %c0_66 = arith.constant 0 : index
    %206 = vector.load %arg13[%205, %c0_65, %c0_66] : memref<2x1x128xf32, #tpu.memory_space<vmem>>, vector<1x1x128xf32>
    %207 = vector.shape_cast %206 : vector<1x1x128xf32> to vector<1x128xf32>
    %208 = vector.broadcast %207 : vector<1x128xf32> to vector<8x128xf32>
    %209 = arith.addf %204, %208 : vector<8x128xf32>
    %210 = arith.addf %176, %209 : vector<8x128xf32>
    %211 = arith.index_cast %c0_i32 : i32 to index
    %c0_67 = arith.constant 0 : index
    %c0_68 = arith.constant 0 : index
    %212 = vector.load %arg14[%211, %c0_67, %c0_68] : memref<2x1x128xf32, #tpu.memory_space<vmem>>, vector<1x1x128xf32>
    %213 = vector.shape_cast %212 : vector<1x1x128xf32> to vector<1x128xf32>
    %214 = arith.index_cast %c0_i32 : i32 to index
    %c0_69 = arith.constant 0 : index
    %c0_70 = arith.constant 0 : index
    %215 = vector.load %arg15[%214, %c0_69, %c0_70] : memref<2x1x128xf32, #tpu.memory_space<vmem>>, vector<1x1x128xf32>
    %216 = vector.shape_cast %215 : vector<1x1x128xf32> to vector<1x128xf32>
    %cst_71 = arith.constant dense<0.000000e+00> : vector<8xf32>
    %217 = vector.multi_reduction <add>, %210, %cst_71 [1] : vector<8x128xf32> to vector<8xf32>
    %218 = vector.shape_cast %217 : vector<8xf32> to vector<8x1xf32>
    %cst_72 = arith.constant 1.280000e+02 : f32
    %219 = vector.broadcast %cst_72 : f32 to vector<8x1xf32>
    %220 = arith.divf %218, %219 : vector<8x1xf32>
    %221 = vector.broadcast %220 : vector<8x1xf32> to vector<8x128xf32>
    %222 = arith.subf %210, %221 : vector<8x128xf32>
    %223 = arith.mulf %222, %222 : vector<8x128xf32>
    %cst_73 = arith.constant dense<0.000000e+00> : vector<8xf32>
    %224 = vector.multi_reduction <add>, %223, %cst_73 [1] : vector<8x128xf32> to vector<8xf32>
    %225 = vector.shape_cast %224 : vector<8xf32> to vector<8x1xf32>
    %cst_74 = arith.constant 1.280000e+02 : f32
    %226 = vector.broadcast %cst_74 : f32 to vector<8x1xf32>
    %227 = arith.divf %225, %226 : vector<8x1xf32>
    %228 = vector.broadcast %220 : vector<8x1xf32> to vector<8x128xf32>
    %229 = arith.subf %210, %228 : vector<8x128xf32>
    %cst_75 = arith.constant 1.000000e-07 : f32
    %230 = vector.broadcast %cst_75 : f32 to vector<8x1xf32>
    %231 = arith.addf %227, %230 : vector<8x1xf32>
    %232 = math.rsqrt %231 : vector<8x1xf32>
    %233 = vector.broadcast %232 : vector<8x1xf32> to vector<8x128xf32>
    %234 = arith.mulf %229, %233 : vector<8x128xf32>
    %235 = vector.broadcast %213 : vector<1x128xf32> to vector<8x128xf32>
    %236 = arith.mulf %234, %235 : vector<8x128xf32>
    %237 = vector.broadcast %216 : vector<1x128xf32> to vector<8x128xf32>
    %238 = arith.addf %236, %237 : vector<8x128xf32>
    %c1_i32 = arith.constant 1 : i32
    %239 = arith.truncf %238 : vector<8x128xf32> to vector<8x128xbf16>
    %240 = arith.index_cast %c1_i32 : i32 to index
    %c0_76 = arith.constant 0 : index
    %c0_77 = arith.constant 0 : index
    %241 = vector.load %arg4[%240, %c0_76, %c0_77] : memref<2x128x384xbf16, #tpu.memory_space<vmem>>, vector<1x128x384xbf16>
    %242 = vector.shape_cast %241 : vector<1x128x384xbf16> to vector<128x384xbf16>
    %cst_78 = arith.constant dense<0.000000e+00> : vector<8x384xf32>
    %243 = tpu.matmul %239, %242, %cst_78 {dimension_numbers = #tpu.dot_dimension_numbers<[1], [0], [0], [1], [0, 0, 1, 1], [], []>} : vector<8x128xbf16>, vector<128x384xbf16>, vector<8x384xf32> -> vector<8x384xf32>
    %244 = arith.index_cast %c1_i32 : i32 to index
    %c0_79 = arith.constant 0 : index
    %c0_80 = arith.constant 0 : index
    %245 = vector.load %arg5[%244, %c0_79, %c0_80] : memref<2x1x384xf32, #tpu.memory_space<vmem>>, vector<1x1x384xf32>
    %246 = vector.shape_cast %245 : vector<1x1x384xf32> to vector<1x384xf32>
    %247 = vector.broadcast %246 : vector<1x384xf32> to vector<8x384xf32>
    %248 = arith.addf %243, %247 : vector<8x384xf32>
    %249 = vector.extract_strided_slice %248 {offsets = [0, 0], sizes = [8, 128], strides = [1, 1]} : vector<8x384xf32> to vector<8x128xf32>
    %250 = vector.extract_strided_slice %248 {offsets = [0, 128], sizes = [8, 128], strides = [1, 1]} : vector<8x384xf32> to vector<8x128xf32>
    %251 = vector.extract_strided_slice %248 {offsets = [0, 256], sizes = [8, 128], strides = [1, 1]} : vector<8x384xf32> to vector<8x128xf32>
    %252 = arith.index_cast %c1_i32 : i32 to index
    %c0_81 = arith.constant 0 : index
    %c0_82 = arith.constant 0 : index
    %253 = vector.load %arg6[%252, %c0_81, %c0_82] : memref<2x128x128xbf16, #tpu.memory_space<vmem>>, vector<1x128x128xbf16>
    %254 = vector.shape_cast %253 : vector<1x128x128xbf16> to vector<128x128xbf16>
    %cst_83 = arith.constant 0.000000e+00 : f32
    %255 = vector.broadcast %cst_83 : f32 to vector<8x128xf32>
    %256 = vector.extract_strided_slice %249 {offsets = [0, 0], sizes = [8, 32], strides = [1, 1]} : vector<8x128xf32> to vector<8x32xf32>
    %257 = arith.truncf %256 : vector<8x32xf32> to vector<8x32xbf16>
    %258 = vector.extract_strided_slice %250 {offsets = [0, 0], sizes = [8, 32], strides = [1, 1]} : vector<8x128xf32> to vector<8x32xf32>
    %259 = arith.truncf %258 : vector<8x32xf32> to vector<8x32xbf16>
    %260 = vector.extract_strided_slice %251 {offsets = [0, 0], sizes = [8, 32], strides = [1, 1]} : vector<8x128xf32> to vector<8x32xf32>
    %261 = arith.truncf %260 : vector<8x32xf32> to vector<8x32xbf16>
    %cst_84 = arith.constant dense<0.000000e+00> : vector<8x8xf32>
    %262 = tpu.matmul %257, %259, %cst_84 {dimension_numbers = #tpu.dot_dimension_numbers<[1], [1], [0], [0], [0, 0, 1, 0], [], []>} : vector<8x32xbf16>, vector<8x32xbf16>, vector<8x8xf32> -> vector<8x8xf32>
    %cst_85 = arith.constant 0.176776692 : f32
    %263 = vector.broadcast %cst_85 : f32 to vector<8x8xf32>
    %264 = arith.mulf %262, %263 : vector<8x8xf32>
    %cst_86 = arith.constant dense<0xFF800000> : vector<8xf32>
    %265 = vector.multi_reduction <maximumf>, %264, %cst_86 [1] : vector<8x8xf32> to vector<8xf32>
    %266 = vector.shape_cast %265 : vector<8xf32> to vector<8x1xf32>
    %267 = vector.broadcast %266 : vector<8x1xf32> to vector<8x8xf32>
    %268 = arith.subf %264, %267 : vector<8x8xf32>
    %269 = math.exp %268 : vector<8x8xf32>
    %cst_87 = arith.constant dense<0.000000e+00> : vector<8xf32>
    %270 = vector.multi_reduction <add>, %269, %cst_87 [1] : vector<8x8xf32> to vector<8xf32>
    %271 = vector.shape_cast %270 : vector<8xf32> to vector<8x1xf32>
    %272 = tpu.reciprocal %271 {approx = true} : vector<8x1xf32> -> vector<8x1xf32>
    %273 = vector.broadcast %272 : vector<8x1xf32> to vector<8x8xf32>
    %274 = arith.mulf %269, %273 : vector<8x8xf32>
    %275 = arith.truncf %274 : vector<8x8xf32> to vector<8x8xbf16>
    %cst_88 = arith.constant dense<0.000000e+00> : vector<8x32xf32>
    %276 = tpu.matmul %275, %261, %cst_88 {dimension_numbers = #tpu.dot_dimension_numbers<[1], [0], [0], [1], [0, 0, 1, 1], [], []>} : vector<8x8xbf16>, vector<8x32xbf16>, vector<8x32xf32> -> vector<8x32xf32>
    %277 = arith.truncf %276 : vector<8x32xf32> to vector<8x32xbf16>
    %278 = vector.extract_strided_slice %254 {offsets = [0, 0], sizes = [32, 128], strides = [1, 1]} : vector<128x128xbf16> to vector<32x128xbf16>
    %cst_89 = arith.constant dense<0.000000e+00> : vector<8x128xf32>
    %279 = tpu.matmul %277, %278, %cst_89 {dimension_numbers = #tpu.dot_dimension_numbers<[1], [0], [0], [1], [0, 0, 1, 1], [], []>} : vector<8x32xbf16>, vector<32x128xbf16>, vector<8x128xf32> -> vector<8x128xf32>
    %280 = arith.addf %255, %279 : vector<8x128xf32>
    %281 = vector.extract_strided_slice %249 {offsets = [0, 32], sizes = [8, 32], strides = [1, 1]} : vector<8x128xf32> to vector<8x32xf32>
    %282 = arith.truncf %281 : vector<8x32xf32> to vector<8x32xbf16>
    %283 = vector.extract_strided_slice %250 {offsets = [0, 32], sizes = [8, 32], strides = [1, 1]} : vector<8x128xf32> to vector<8x32xf32>
    %284 = arith.truncf %283 : vector<8x32xf32> to vector<8x32xbf16>
    %285 = vector.extract_strided_slice %251 {offsets = [0, 32], sizes = [8, 32], strides = [1, 1]} : vector<8x128xf32> to vector<8x32xf32>
    %286 = arith.truncf %285 : vector<8x32xf32> to vector<8x32xbf16>
    %cst_90 = arith.constant dense<0.000000e+00> : vector<8x8xf32>
    %287 = tpu.matmul %282, %284, %cst_90 {dimension_numbers = #tpu.dot_dimension_numbers<[1], [1], [0], [0], [0, 0, 1, 0], [], []>} : vector<8x32xbf16>, vector<8x32xbf16>, vector<8x8xf32> -> vector<8x8xf32>
    %cst_91 = arith.constant 0.176776692 : f32
    %288 = vector.broadcast %cst_91 : f32 to vector<8x8xf32>
    %289 = arith.mulf %287, %288 : vector<8x8xf32>
    %cst_92 = arith.constant dense<0xFF800000> : vector<8xf32>
    %290 = vector.multi_reduction <maximumf>, %289, %cst_92 [1] : vector<8x8xf32> to vector<8xf32>
    %291 = vector.shape_cast %290 : vector<8xf32> to vector<8x1xf32>
    %292 = vector.broadcast %291 : vector<8x1xf32> to vector<8x8xf32>
    %293 = arith.subf %289, %292 : vector<8x8xf32>
    %294 = math.exp %293 : vector<8x8xf32>
    %cst_93 = arith.constant dense<0.000000e+00> : vector<8xf32>
    %295 = vector.multi_reduction <add>, %294, %cst_93 [1] : vector<8x8xf32> to vector<8xf32>
    %296 = vector.shape_cast %295 : vector<8xf32> to vector<8x1xf32>
    %297 = tpu.reciprocal %296 {approx = true} : vector<8x1xf32> -> vector<8x1xf32>
    %298 = vector.broadcast %297 : vector<8x1xf32> to vector<8x8xf32>
    %299 = arith.mulf %294, %298 : vector<8x8xf32>
    %300 = arith.truncf %299 : vector<8x8xf32> to vector<8x8xbf16>
    %cst_94 = arith.constant dense<0.000000e+00> : vector<8x32xf32>
    %301 = tpu.matmul %300, %286, %cst_94 {dimension_numbers = #tpu.dot_dimension_numbers<[1], [0], [0], [1], [0, 0, 1, 1], [], []>} : vector<8x8xbf16>, vector<8x32xbf16>, vector<8x32xf32> -> vector<8x32xf32>
    %302 = arith.truncf %301 : vector<8x32xf32> to vector<8x32xbf16>
    %303 = vector.extract_strided_slice %254 {offsets = [32, 0], sizes = [32, 128], strides = [1, 1]} : vector<128x128xbf16> to vector<32x128xbf16>
    %cst_95 = arith.constant dense<0.000000e+00> : vector<8x128xf32>
    %304 = tpu.matmul %302, %303, %cst_95 {dimension_numbers = #tpu.dot_dimension_numbers<[1], [0], [0], [1], [0, 0, 1, 1], [], []>} : vector<8x32xbf16>, vector<32x128xbf16>, vector<8x128xf32> -> vector<8x128xf32>
    %305 = arith.addf %280, %304 : vector<8x128xf32>
    %306 = vector.extract_strided_slice %249 {offsets = [0, 64], sizes = [8, 32], strides = [1, 1]} : vector<8x128xf32> to vector<8x32xf32>
    %307 = arith.truncf %306 : vector<8x32xf32> to vector<8x32xbf16>
    %308 = vector.extract_strided_slice %250 {offsets = [0, 64], sizes = [8, 32], strides = [1, 1]} : vector<8x128xf32> to vector<8x32xf32>
    %309 = arith.truncf %308 : vector<8x32xf32> to vector<8x32xbf16>
    %310 = vector.extract_strided_slice %251 {offsets = [0, 64], sizes = [8, 32], strides = [1, 1]} : vector<8x128xf32> to vector<8x32xf32>
    %311 = arith.truncf %310 : vector<8x32xf32> to vector<8x32xbf16>
    %cst_96 = arith.constant dense<0.000000e+00> : vector<8x8xf32>
    %312 = tpu.matmul %307, %309, %cst_96 {dimension_numbers = #tpu.dot_dimension_numbers<[1], [1], [0], [0], [0, 0, 1, 0], [], []>} : vector<8x32xbf16>, vector<8x32xbf16>, vector<8x8xf32> -> vector<8x8xf32>
    %cst_97 = arith.constant 0.176776692 : f32
    %313 = vector.broadcast %cst_97 : f32 to vector<8x8xf32>
    %314 = arith.mulf %312, %313 : vector<8x8xf32>
    %cst_98 = arith.constant dense<0xFF800000> : vector<8xf32>
    %315 = vector.multi_reduction <maximumf>, %314, %cst_98 [1] : vector<8x8xf32> to vector<8xf32>
    %316 = vector.shape_cast %315 : vector<8xf32> to vector<8x1xf32>
    %317 = vector.broadcast %316 : vector<8x1xf32> to vector<8x8xf32>
    %318 = arith.subf %314, %317 : vector<8x8xf32>
    %319 = math.exp %318 : vector<8x8xf32>
    %cst_99 = arith.constant dense<0.000000e+00> : vector<8xf32>
    %320 = vector.multi_reduction <add>, %319, %cst_99 [1] : vector<8x8xf32> to vector<8xf32>
    %321 = vector.shape_cast %320 : vector<8xf32> to vector<8x1xf32>
    %322 = tpu.reciprocal %321 {approx = true} : vector<8x1xf32> -> vector<8x1xf32>
    %323 = vector.broadcast %322 : vector<8x1xf32> to vector<8x8xf32>
    %324 = arith.mulf %319, %323 : vector<8x8xf32>
    %325 = arith.truncf %324 : vector<8x8xf32> to vector<8x8xbf16>
    %cst_100 = arith.constant dense<0.000000e+00> : vector<8x32xf32>
    %326 = tpu.matmul %325, %311, %cst_100 {dimension_numbers = #tpu.dot_dimension_numbers<[1], [0], [0], [1], [0, 0, 1, 1], [], []>} : vector<8x8xbf16>, vector<8x32xbf16>, vector<8x32xf32> -> vector<8x32xf32>
    %327 = arith.truncf %326 : vector<8x32xf32> to vector<8x32xbf16>
    %328 = vector.extract_strided_slice %254 {offsets = [64, 0], sizes = [32, 128], strides = [1, 1]} : vector<128x128xbf16> to vector<32x128xbf16>
    %cst_101 = arith.constant dense<0.000000e+00> : vector<8x128xf32>
    %329 = tpu.matmul %327, %328, %cst_101 {dimension_numbers = #tpu.dot_dimension_numbers<[1], [0], [0], [1], [0, 0, 1, 1], [], []>} : vector<8x32xbf16>, vector<32x128xbf16>, vector<8x128xf32> -> vector<8x128xf32>
    %330 = arith.addf %305, %329 : vector<8x128xf32>
    %331 = vector.extract_strided_slice %249 {offsets = [0, 96], sizes = [8, 32], strides = [1, 1]} : vector<8x128xf32> to vector<8x32xf32>
    %332 = arith.truncf %331 : vector<8x32xf32> to vector<8x32xbf16>
    %333 = vector.extract_strided_slice %250 {offsets = [0, 96], sizes = [8, 32], strides = [1, 1]} : vector<8x128xf32> to vector<8x32xf32>
    %334 = arith.truncf %333 : vector<8x32xf32> to vector<8x32xbf16>
    %335 = vector.extract_strided_slice %251 {offsets = [0, 96], sizes = [8, 32], strides = [1, 1]} : vector<8x128xf32> to vector<8x32xf32>
    %336 = arith.truncf %335 : vector<8x32xf32> to vector<8x32xbf16>
    %cst_102 = arith.constant dense<0.000000e+00> : vector<8x8xf32>
    %337 = tpu.matmul %332, %334, %cst_102 {dimension_numbers = #tpu.dot_dimension_numbers<[1], [1], [0], [0], [0, 0, 1, 0], [], []>} : vector<8x32xbf16>, vector<8x32xbf16>, vector<8x8xf32> -> vector<8x8xf32>
    %cst_103 = arith.constant 0.176776692 : f32
    %338 = vector.broadcast %cst_103 : f32 to vector<8x8xf32>
    %339 = arith.mulf %337, %338 : vector<8x8xf32>
    %cst_104 = arith.constant dense<0xFF800000> : vector<8xf32>
    %340 = vector.multi_reduction <maximumf>, %339, %cst_104 [1] : vector<8x8xf32> to vector<8xf32>
    %341 = vector.shape_cast %340 : vector<8xf32> to vector<8x1xf32>
    %342 = vector.broadcast %341 : vector<8x1xf32> to vector<8x8xf32>
    %343 = arith.subf %339, %342 : vector<8x8xf32>
    %344 = math.exp %343 : vector<8x8xf32>
    %cst_105 = arith.constant dense<0.000000e+00> : vector<8xf32>
    %345 = vector.multi_reduction <add>, %344, %cst_105 [1] : vector<8x8xf32> to vector<8xf32>
    %346 = vector.shape_cast %345 : vector<8xf32> to vector<8x1xf32>
    %347 = tpu.reciprocal %346 {approx = true} : vector<8x1xf32> -> vector<8x1xf32>
    %348 = vector.broadcast %347 : vector<8x1xf32> to vector<8x8xf32>
    %349 = arith.mulf %344, %348 : vector<8x8xf32>
    %350 = arith.truncf %349 : vector<8x8xf32> to vector<8x8xbf16>
    %cst_106 = arith.constant dense<0.000000e+00> : vector<8x32xf32>
    %351 = tpu.matmul %350, %336, %cst_106 {dimension_numbers = #tpu.dot_dimension_numbers<[1], [0], [0], [1], [0, 0, 1, 1], [], []>} : vector<8x8xbf16>, vector<8x32xbf16>, vector<8x32xf32> -> vector<8x32xf32>
    %352 = arith.truncf %351 : vector<8x32xf32> to vector<8x32xbf16>
    %353 = vector.extract_strided_slice %254 {offsets = [96, 0], sizes = [32, 128], strides = [1, 1]} : vector<128x128xbf16> to vector<32x128xbf16>
    %cst_107 = arith.constant dense<0.000000e+00> : vector<8x128xf32>
    %354 = tpu.matmul %352, %353, %cst_107 {dimension_numbers = #tpu.dot_dimension_numbers<[1], [0], [0], [1], [0, 0, 1, 1], [], []>} : vector<8x32xbf16>, vector<32x128xbf16>, vector<8x128xf32> -> vector<8x128xf32>
    %355 = arith.addf %330, %354 : vector<8x128xf32>
    %356 = arith.index_cast %c1_i32 : i32 to index
    %c0_108 = arith.constant 0 : index
    %c0_109 = arith.constant 0 : index
    %357 = vector.load %arg7[%356, %c0_108, %c0_109] : memref<2x1x128xf32, #tpu.memory_space<vmem>>, vector<1x1x128xf32>
    %358 = vector.shape_cast %357 : vector<1x1x128xf32> to vector<1x128xf32>
    %359 = vector.broadcast %358 : vector<1x128xf32> to vector<8x128xf32>
    %360 = arith.addf %355, %359 : vector<8x128xf32>
    %361 = arith.addf %238, %360 : vector<8x128xf32>
    %362 = arith.index_cast %c1_i32 : i32 to index
    %c0_110 = arith.constant 0 : index
    %c0_111 = arith.constant 0 : index
    %363 = vector.load %arg8[%362, %c0_110, %c0_111] : memref<2x1x128xf32, #tpu.memory_space<vmem>>, vector<1x1x128xf32>
    %364 = vector.shape_cast %363 : vector<1x1x128xf32> to vector<1x128xf32>
    %365 = arith.index_cast %c1_i32 : i32 to index
    %c0_112 = arith.constant 0 : index
    %c0_113 = arith.constant 0 : index
    %366 = vector.load %arg9[%365, %c0_112, %c0_113] : memref<2x1x128xf32, #tpu.memory_space<vmem>>, vector<1x1x128xf32>
    %367 = vector.shape_cast %366 : vector<1x1x128xf32> to vector<1x128xf32>
    %cst_114 = arith.constant dense<0.000000e+00> : vector<8xf32>
    %368 = vector.multi_reduction <add>, %361, %cst_114 [1] : vector<8x128xf32> to vector<8xf32>
    %369 = vector.shape_cast %368 : vector<8xf32> to vector<8x1xf32>
    %cst_115 = arith.constant 1.280000e+02 : f32
    %370 = vector.broadcast %cst_115 : f32 to vector<8x1xf32>
    %371 = arith.divf %369, %370 : vector<8x1xf32>
    %372 = vector.broadcast %371 : vector<8x1xf32> to vector<8x128xf32>
    %373 = arith.subf %361, %372 : vector<8x128xf32>
    %374 = arith.mulf %373, %373 : vector<8x128xf32>
    %cst_116 = arith.constant dense<0.000000e+00> : vector<8xf32>
    %375 = vector.multi_reduction <add>, %374, %cst_116 [1] : vector<8x128xf32> to vector<8xf32>
    %376 = vector.shape_cast %375 : vector<8xf32> to vector<8x1xf32>
    %cst_117 = arith.constant 1.280000e+02 : f32
    %377 = vector.broadcast %cst_117 : f32 to vector<8x1xf32>
    %378 = arith.divf %376, %377 : vector<8x1xf32>
    %379 = vector.broadcast %371 : vector<8x1xf32> to vector<8x128xf32>
    %380 = arith.subf %361, %379 : vector<8x128xf32>
    %cst_118 = arith.constant 1.000000e-07 : f32
    %381 = vector.broadcast %cst_118 : f32 to vector<8x1xf32>
    %382 = arith.addf %378, %381 : vector<8x1xf32>
    %383 = math.rsqrt %382 : vector<8x1xf32>
    %384 = vector.broadcast %383 : vector<8x1xf32> to vector<8x128xf32>
    %385 = arith.mulf %380, %384 : vector<8x128xf32>
    %386 = vector.broadcast %364 : vector<1x128xf32> to vector<8x128xf32>
    %387 = arith.mulf %385, %386 : vector<8x128xf32>
    %388 = vector.broadcast %367 : vector<1x128xf32> to vector<8x128xf32>
    %389 = arith.addf %387, %388 : vector<8x128xf32>
    %390 = arith.truncf %389 : vector<8x128xf32> to vector<8x128xbf16>
    %391 = arith.index_cast %c1_i32 : i32 to index
    %c0_119 = arith.constant 0 : index
    %c0_120 = arith.constant 0 : index
    %392 = vector.load %arg10[%391, %c0_119, %c0_120] : memref<2x128x256xbf16, #tpu.memory_space<vmem>>, vector<1x128x256xbf16>
    %393 = vector.shape_cast %392 : vector<1x128x256xbf16> to vector<128x256xbf16>
    %cst_121 = arith.constant dense<0.000000e+00> : vector<8x256xf32>
    %394 = tpu.matmul %390, %393, %cst_121 {dimension_numbers = #tpu.dot_dimension_numbers<[1], [0], [0], [1], [0, 0, 1, 1], [], []>} : vector<8x128xbf16>, vector<128x256xbf16>, vector<8x256xf32> -> vector<8x256xf32>
    %395 = arith.index_cast %c1_i32 : i32 to index
    %c0_122 = arith.constant 0 : index
    %c0_123 = arith.constant 0 : index
    %396 = vector.load %arg11[%395, %c0_122, %c0_123] : memref<2x1x256xf32, #tpu.memory_space<vmem>>, vector<1x1x256xf32>
    %397 = vector.shape_cast %396 : vector<1x1x256xf32> to vector<1x256xf32>
    %398 = vector.broadcast %397 : vector<1x256xf32> to vector<8x256xf32>
    %399 = arith.addf %394, %398 : vector<8x256xf32>
    %400 = arith.mulf %399, %399 : vector<8x256xf32>
    %401 = arith.mulf %399, %400 : vector<8x256xf32>
    %cst_124 = arith.constant 4.471500e-02 : f32
    %402 = vector.broadcast %cst_124 : f32 to vector<8x256xf32>
    %403 = arith.mulf %402, %401 : vector<8x256xf32>
    %404 = arith.addf %399, %403 : vector<8x256xf32>
    %cst_125 = arith.constant 0.797884583 : f32
    %405 = vector.broadcast %cst_125 : f32 to vector<8x256xf32>
    %406 = arith.mulf %405, %404 : vector<8x256xf32>
    %407 = math.tanh %406 : vector<8x256xf32>
    %cst_126 = arith.constant 1.000000e+00 : f32
    %408 = vector.broadcast %cst_126 : f32 to vector<8x256xf32>
    %409 = arith.addf %408, %407 : vector<8x256xf32>
    %cst_127 = arith.constant 5.000000e-01 : f32
    %410 = vector.broadcast %cst_127 : f32 to vector<8x256xf32>
    %411 = arith.mulf %410, %409 : vector<8x256xf32>
    %412 = arith.mulf %399, %411 : vector<8x256xf32>
    %413 = arith.truncf %412 : vector<8x256xf32> to vector<8x256xbf16>
    %414 = arith.index_cast %c1_i32 : i32 to index
    %c0_128 = arith.constant 0 : index
    %c0_129 = arith.constant 0 : index
    %415 = vector.load %arg12[%414, %c0_128, %c0_129] : memref<2x256x128xbf16, #tpu.memory_space<vmem>>, vector<1x256x128xbf16>
    %416 = vector.shape_cast %415 : vector<1x256x128xbf16> to vector<256x128xbf16>
    %cst_130 = arith.constant dense<0.000000e+00> : vector<8x128xf32>
    %417 = tpu.matmul %413, %416, %cst_130 {dimension_numbers = #tpu.dot_dimension_numbers<[1], [0], [0], [1], [0, 0, 1, 1], [], []>} : vector<8x256xbf16>, vector<256x128xbf16>, vector<8x128xf32> -> vector<8x128xf32>
    %418 = arith.index_cast %c1_i32 : i32 to index
    %c0_131 = arith.constant 0 : index
    %c0_132 = arith.constant 0 : index
    %419 = vector.load %arg13[%418, %c0_131, %c0_132] : memref<2x1x128xf32, #tpu.memory_space<vmem>>, vector<1x1x128xf32>
    %420 = vector.shape_cast %419 : vector<1x1x128xf32> to vector<1x128xf32>
    %421 = vector.broadcast %420 : vector<1x128xf32> to vector<8x128xf32>
    %422 = arith.addf %417, %421 : vector<8x128xf32>
    %423 = arith.addf %389, %422 : vector<8x128xf32>
    %424 = arith.index_cast %c1_i32 : i32 to index
    %c0_133 = arith.constant 0 : index
    %c0_134 = arith.constant 0 : index
    %425 = vector.load %arg14[%424, %c0_133, %c0_134] : memref<2x1x128xf32, #tpu.memory_space<vmem>>, vector<1x1x128xf32>
    %426 = vector.shape_cast %425 : vector<1x1x128xf32> to vector<1x128xf32>
    %427 = arith.index_cast %c1_i32 : i32 to index
    %c0_135 = arith.constant 0 : index
    %c0_136 = arith.constant 0 : index
    %428 = vector.load %arg15[%427, %c0_135, %c0_136] : memref<2x1x128xf32, #tpu.memory_space<vmem>>, vector<1x1x128xf32>
    %429 = vector.shape_cast %428 : vector<1x1x128xf32> to vector<1x128xf32>
    %cst_137 = arith.constant dense<0.000000e+00> : vector<8xf32>
    %430 = vector.multi_reduction <add>, %423, %cst_137 [1] : vector<8x128xf32> to vector<8xf32>
    %431 = vector.shape_cast %430 : vector<8xf32> to vector<8x1xf32>
    %cst_138 = arith.constant 1.280000e+02 : f32
    %432 = vector.broadcast %cst_138 : f32 to vector<8x1xf32>
    %433 = arith.divf %431, %432 : vector<8x1xf32>
    %434 = vector.broadcast %433 : vector<8x1xf32> to vector<8x128xf32>
    %435 = arith.subf %423, %434 : vector<8x128xf32>
    %436 = arith.mulf %435, %435 : vector<8x128xf32>
    %cst_139 = arith.constant dense<0.000000e+00> : vector<8xf32>
    %437 = vector.multi_reduction <add>, %436, %cst_139 [1] : vector<8x128xf32> to vector<8xf32>
    %438 = vector.shape_cast %437 : vector<8xf32> to vector<8x1xf32>
    %cst_140 = arith.constant 1.280000e+02 : f32
    %439 = vector.broadcast %cst_140 : f32 to vector<8x1xf32>
    %440 = arith.divf %438, %439 : vector<8x1xf32>
    %441 = vector.broadcast %433 : vector<8x1xf32> to vector<8x128xf32>
    %442 = arith.subf %423, %441 : vector<8x128xf32>
    %cst_141 = arith.constant 1.000000e-07 : f32
    %443 = vector.broadcast %cst_141 : f32 to vector<8x1xf32>
    %444 = arith.addf %440, %443 : vector<8x1xf32>
    %445 = math.rsqrt %444 : vector<8x1xf32>
    %446 = vector.broadcast %445 : vector<8x1xf32> to vector<8x128xf32>
    %447 = arith.mulf %442, %446 : vector<8x128xf32>
    %448 = vector.broadcast %426 : vector<1x128xf32> to vector<8x128xf32>
    %449 = arith.mulf %447, %448 : vector<8x128xf32>
    %450 = vector.broadcast %429 : vector<1x128xf32> to vector<8x128xf32>
    %451 = arith.addf %449, %450 : vector<8x128xf32>
    %c2_i32 = arith.constant 2 : i32
    %c0_142 = arith.constant 0 : index
    %c0_143 = arith.constant 0 : index
    %c0_144 = arith.constant 0 : index
    %452 = vector.load %arg18[%c0_142, %c0_143, %c0_144] : memref<1x8x128xf32, #tpu.memory_space<vmem>>, vector<1x8x128xf32>
    %453 = vector.shape_cast %452 : vector<1x8x128xf32> to vector<8x128xf32>
    %454 = vector.shape_cast %451 : vector<8x128xf32> to vector<1x8x128xf32>
    tpu.vector_store %arg18[%c0_142, %c0_143, %c0_144], %454 {strides = array<i32>} : memref<1x8x128xf32, #tpu.memory_space<vmem>>, vector<1x8x128xf32>,
    %455 = arith.truncf %451 : vector<8x128xf32> to vector<8x128xbf16>
    %c0_145 = arith.constant 0 : index
    %c0_146 = arith.constant 0 : index
    %456 = vector.load %arg16[%c0_145, %c0_146] : memref<128x128xbf16, #tpu.memory_space<vmem>>, vector<128x128xbf16>
    %cst_147 = arith.constant dense<0.000000e+00> : vector<8x128xf32>
    %457 = tpu.matmul %455, %456, %cst_147 {dimension_numbers = #tpu.dot_dimension_numbers<[1], [0], [0], [1], [0, 0, 1, 1], [], []>} : vector<8x128xbf16>, vector<128x128xbf16>, vector<8x128xf32> -> vector<8x128xf32>
    %c0_148 = arith.constant 0 : index
    %c0_149 = arith.constant 0 : index
    %458 = vector.load %arg17[%c0_148, %c0_149] : memref<1x128xf32, #tpu.memory_space<vmem>>, vector<1x128xf32>
    %459 = vector.broadcast %458 : vector<1x128xf32> to vector<8x128xf32>
    %460 = arith.addf %457, %459 : vector<8x128xf32>
    %c0_150 = arith.constant 0 : index
    %c0_151 = arith.constant 0 : index
    %c0_152 = arith.constant 0 : index
    %461 = vector.load %arg19[%c0_150, %c0_151, %c0_152] : memref<1x8x128xf32, #tpu.memory_space<vmem>>, vector<1x8x128xf32>
    %462 = vector.shape_cast %461 : vector<1x8x128xf32> to vector<8x128xf32>
    %463 = vector.shape_cast %460 : vector<8x128xf32> to vector<1x8x128xf32>
    tpu.vector_store %arg19[%c0_150, %c0_151, %c0_152], %463 {strides = array<i32>} : memref<1x8x128xf32, #tpu.memory_space<vmem>>, vector<1x8x128xf32>,
    return
  }
  func.func @transform_0(%arg0: i32) -> (i32, i32, i32) {
    %c0_i32 = arith.constant 0 : i32
    %c0_i32_0 = arith.constant 0 : i32
    %c0_i32_1 = arith.constant 0 : i32
    return %arg0, %c0_i32, %c0_i32_0 : i32, i32, i32
  }
  func.func @transform_1(%arg0: i32) -> (i32, i32) {
    %c0_i32 = arith.constant 0 : i32
    %c0_i32_0 = arith.constant 0 : i32
    %c0_i32_1 = arith.constant 0 : i32
    return %c0_i32, %c0_i32_0 : i32, i32
  }
  func.func @transform_2(%arg0: i32) -> (i32, i32) {
    %c0_i32 = arith.constant 0 : i32
    %c0_i32_0 = arith.constant 0 : i32
    %c0_i32_1 = arith.constant 0 : i32
    return %c0_i32, %c0_i32_0 : i32, i32
  }
  func.func @transform_3(%arg0: i32) -> (i32, i32, i32) {
    %c0_i32 = arith.constant 0 : i32
    %c0_i32_0 = arith.constant 0 : i32
    %c0_i32_1 = arith.constant 0 : i32
    %c0_i32_2 = arith.constant 0 : i32
    return %c0_i32, %c0_i32_0, %c0_i32_1 : i32, i32, i32
  }
  func.func @transform_4(%arg0: i32) -> (i32, i32, i32) {
    %c0_i32 = arith.constant 0 : i32
    %c0_i32_0 = arith.constant 0 : i32
    %c0_i32_1 = arith.constant 0 : i32
    %c0_i32_2 = arith.constant 0 : i32
    return %c0_i32, %c0_i32_0, %c0_i32_1 : i32, i32, i32
  }
  func.func @transform_5(%arg0: i32) -> (i32, i32, i32) {
    %c0_i32 = arith.constant 0 : i32
    %c0_i32_0 = arith.constant 0 : i32
    %c0_i32_1 = arith.constant 0 : i32
    %c0_i32_2 = arith.constant 0 : i32
    return %c0_i32, %c0_i32_0, %c0_i32_1 : i32, i32, i32
  }
  func.func @transform_6(%arg0: i32) -> (i32, i32, i32) {
    %c0_i32 = arith.constant 0 : i32
    %c0_i32_0 = arith.constant 0 : i32
    %c0_i32_1 = arith.constant 0 : i32
    %c0_i32_2 = arith.constant 0 : i32
    return %c0_i32, %c0_i32_0, %c0_i32_1 : i32, i32, i32
  }
  func.func @transform_7(%arg0: i32) -> (i32, i32, i32) {
    %c0_i32 = arith.constant 0 : i32
    %c0_i32_0 = arith.constant 0 : i32
    %c0_i32_1 = arith.constant 0 : i32
    %c0_i32_2 = arith.constant 0 : i32
    return %c0_i32, %c0_i32_0, %c0_i32_1 : i32, i32, i32
  }
  func.func @transform_8(%arg0: i32) -> (i32, i32, i32) {
    %c0_i32 = arith.constant 0 : i32
    %c0_i32_0 = arith.constant 0 : i32
    %c0_i32_1 = arith.constant 0 : i32
    %c0_i32_2 = arith.constant 0 : i32
    return %c0_i32, %c0_i32_0, %c0_i32_1 : i32, i32, i32
  }
  func.func @transform_9(%arg0: i32) -> (i32, i32, i32) {
    %c0_i32 = arith.constant 0 : i32
    %c0_i32_0 = arith.constant 0 : i32
    %c0_i32_1 = arith.constant 0 : i32
    %c0_i32_2 = arith.constant 0 : i32
    return %c0_i32, %c0_i32_0, %c0_i32_1 : i32, i32, i32
  }
  func.func @transform_10(%arg0: i32) -> (i32, i32, i32) {
    %c0_i32 = arith.constant 0 : i32
    %c0_i32_0 = arith.constant 0 : i32
    %c0_i32_1 = arith.constant 0 : i32
    %c0_i32_2 = arith.constant 0 : i32
    return %c0_i32, %c0_i32_0, %c0_i32_1 : i32, i32, i32
  }
  func.func @transform_11(%arg0: i32) -> (i32, i32, i32) {
    %c0_i32 = arith.constant 0 : i32
    %c0_i32_0 = arith.constant 0 : i32
    %c0_i32_1 = arith.constant 0 : i32
    %c0_i32_2 = arith.constant 0 : i32
    return %c0_i32, %c0_i32_0, %c0_i32_1 : i32, i32, i32
  }
  func.func @transform_12(%arg0: i32) -> (i32, i32, i32) {
    %c0_i32 = arith.constant 0 : i32
    %c0_i32_0 = arith.constant 0 : i32
    %c0_i32_1 = arith.constant 0 : i32
    %c0_i32_2 = arith.constant 0 : i32
    return %c0_i32, %c0_i32_0, %c0_i32_1 : i32, i32, i32
  }
  func.func @transform_13(%arg0: i32) -> (i32, i32, i32) {
    %c0_i32 = arith.constant 0 : i32
    %c0_i32_0 = arith.constant 0 : i32
    %c0_i32_1 = arith.constant 0 : i32
    %c0_i32_2 = arith.constant 0 : i32
    return %c0_i32, %c0_i32_0, %c0_i32_1 : i32, i32, i32
  }
  func.func @transform_14(%arg0: i32) -> (i32, i32, i32) {
    %c0_i32 = arith.constant 0 : i32
    %c0_i32_0 = arith.constant 0 : i32
    %c0_i32_1 = arith.constant 0 : i32
    %c0_i32_2 = arith.constant 0 : i32
    return %c0_i32, %c0_i32_0, %c0_i32_1 : i32, i32, i32
  }
  func.func @transform_15(%arg0: i32) -> (i32, i32) {
    %c0_i32 = arith.constant 0 : i32
    %c0_i32_0 = arith.constant 0 : i32
    %c0_i32_1 = arith.constant 0 : i32
    return %c0_i32, %c0_i32_0 : i32, i32
  }
  func.func @transform_16(%arg0: i32) -> (i32, i32) {
    %c0_i32 = arith.constant 0 : i32
    %c0_i32_0 = arith.constant 0 : i32
    %c0_i32_1 = arith.constant 0 : i32
    return %c0_i32, %c0_i32_0 : i32, i32
  }
  func.func @transform_17(%arg0: i32) -> (i32, i32, i32) {
    %c0_i32 = arith.constant 0 : i32
    %c0_i32_0 = arith.constant 0 : i32
    %c0_i32_1 = arith.constant 0 : i32
    return %arg0, %c0_i32, %c0_i32_0 : i32, i32, i32
  }
  func.func @transform_18(%arg0: i32) -> (i32, i32, i32) {
    %c0_i32 = arith.constant 0 : i32
    %c0_i32_0 = arith.constant 0 : i32
    %c0_i32_1 = arith.constant 0 : i32
    return %arg0, %c0_i32, %c0_i32_0 : i32, i32, i32
  }
}

</mosaic_0001>

<bundles_post_ra>
// kernel: tpu_custom_call.1
= control target key start
LH: loop header
LB: loop body
LE: loop exit
PB: predicated region body
PF: predicated region fallthrough
CT: control target
= control target key end

     0   :  { %s4990_s0 = inlined_call_operand.hbm [shape: f32[2,8,128], index: 0, kind: input, shape index: {}]   ;;  %s4991_s1 = inlined_call_operand.hbm [shape: f32[1,128], index: 1, kind: input, shape index: {}]   ;;  %s4992_s2 = inlined_call_operand.hbm [shape: f32[1,128], index: 2, kind: input, shape index: {}]   ;;  %s4993_s3 = inlined_call_operand.hbm [shape: bf16[2,128,384], index: 3, kind: input, shape index: {}]   ;;  %s4994_s4 = inlined_call_operand.hbm [shape: f32[2,1,384], index: 4, kind: input, shape index: {}]   ;;  %s4995_s5 = inlined_call_operand.hbm [shape: bf16[2,128,128], index: 5, kind: input, shape index: {}]   ;;  %s4996_s6 = inlined_call_operand.vmem [shape: f32[2,1,128], index: 6, kind: input, shape index: {}]   ;;  %s4997_s7 = inlined_call_operand.hbm [shape: f32[2,1,128], index: 7, kind: input, shape index: {}]   ;;  %s4998_s8 = inlined_call_operand.hbm [shape: f32[2,1,128], index: 8, kind: input, shape index: {}]   ;;  %s4999_s9 = inlined_call_operand.hbm [shape: bf16[2,128,256], index: 9, kind: input, shape index: {}]   ;;  %s5000_s10 = inlined_call_operand.vmem [shape: f32[2,1,256], index: 10, kind: input, shape index: {}]   ;;  %s5001_s11 = inlined_call_operand.hbm [shape: bf16[2,256,128], index: 11, kind: input, shape index: {}]   ;;  %s5002_s12 = inlined_call_operand.vmem [shape: f32[2,1,128], index: 12, kind: input, shape index: {}]   ;;  %s5003_s13 = inlined_call_operand.vmem [shape: f32[2,1,128], index: 13, kind: input, shape index: {}]   ;;  %s5004_s14 = inlined_call_operand.vmem [shape: f32[2,1,128], index: 14, kind: input, shape index: {}]   ;;  %s5005_s15 = inlined_call_operand.hbm [shape: bf16[128,128], index: 15, kind: input, shape index: {}]   ;;  %s5006_s16 = inlined_call_operand.vmem [shape: f32[1,128], index: 16, kind: input, shape index: {}]   ;;  %s5007_s17 = inlined_call_operand.hbm [shape: f32[2,8,128], index: 17, kind: output, shape index: {0}]   ;;  %s5008_s18 = inlined_call_operand.hbm [shape: f32[2,8,128], index: 18, kind: output, shape index: {1}]  }
   0x1   :  { %5018 = sst [smem:[#allocation31_spill]] %s4990_s0 }
   0x2   :  { %5019 = sst [smem:[#allocation32_spill]] %s4991_s1 }
   0x3   :  { %5020 = sst [smem:[#allocation33_spill]] %s4992_s2 }
   0x4   :  { %5021 = sst [smem:[#allocation34_spill]] %s4993_s3 }
   0x5   :  { %5022 = sst [smem:[#allocation35_spill]] %s4994_s4 }
   0x6   :  { %5023 = sst [smem:[#allocation36_spill]] %s4995_s5 }
   0x7   :  { %5024 = sst [smem:[#allocation37_spill]] %s4996_s6 }
   0x8   :  { %5025 = sst [smem:[#allocation38_spill]] %s4997_s7 }
   0x9   :  { %5026 = sst [smem:[#allocation39_spill]] %s4998_s8 }
   0xa   :  { %5027 = sst [smem:[#allocation40_spill]] %s4999_s9 }
   0xb   :  { %5028 = sst [smem:[#allocation41_spill]] %s5000_s10 }
   0xc   :  { %5029 = sst [smem:[#allocation42_spill]] %s5001_s11 }
   0xd   :  { %5030 = sst [smem:[#allocation43_spill]] %s5003_s13 }
   0xe   :  { %5031 = sst [smem:[#allocation44_spill]] %s5004_s14 }
   0xf   :  { %5032 = sst [smem:[#allocation45_spill]] %s5006_s16 }
  0x10   :  { %5033 = sst [smem:[#allocation46_spill]] %s5007_s17 }
  0x11   :  { %5034 = sst [smem:[#allocation47_spill]] %s5008_s18 }
  0x12   :  { %24 = vsyncpa [#allocation3], 0 }
  0x13   :  { %26 = vsyncpa [#allocation3 + $0x1], 0 }
  0x14   :  { %27 = vsyncpa [#allocation6], 0 }
  0x15   :  { %28 = vsyncpa [#allocation9], 0 }
  0x16   :  { %29 = vsyncpa [#allocation12], 0 }
  0x17   :  { %30 = vsyncpa [#allocation15], 0 }
  0x18   :  { %31 = vsyncpa [#allocation18], 0 }
  0x19   :  { %32 = vsyncpa [#allocation4], 0 }
  0x1a   :  { %34 = vsyncpa [#allocation4 + $0x1], 0 }
  0x1b   :  { %35 = vsyncpa [#allocation22], 0 }
  0x1c   :  { %37 = vsyncpa [#allocation22 + $0x1], 0  ;;  %s4570_s27 = smov 0   ;;  %s4572_s28 = smov 0  }
  0x1d   :  { %s4574_s29 = smov 0   ;;  %s4576_s30 = smov 0  }
  0x1e LB: > { %s5035_s1 = sld [smem:[#allocation32_spill]]  ;;  %s4594_s21 = sadd.s32 4294967295, %s4449_s30   ;;  %s4449_s30 = sphi %s4576_s30, %s5065_s30   ;;  %s4445_s29 = sphi %s4574_s29, %s5064_s29   ;;  %s4441_s28 = sphi %s4572_s28, %s5063_s28   ;;  %s4437_s27 = sphi %s4570_s27, %s5062_s27  }
  0x1f   : > { %p3025_p0 = scmp.ge.s32.totalorder %s4449_s30, 1  ;;  %p64_p1 = scmp.eq.s32.totalorder %s4594_s21, 0 }
  0x20   : > { %p462_p2 = scmp.lt.s32.totalorder %s4449_s30, 3  ;;  %s4451_s2 = smov [#allocation5]  }
  0x21   : > { %s476_s23 = sshll.u32 %s4451_s2, 4  ;;  %s5037_s3 = sld [smem:[#allocation34_spill]]  ;;  %s477_s23 = int_to_ptr.vmem [resolvable:$true] %s476_s23 }
  0x22   : > { %p4599_p3 = pnand %p3025_p0, %p462_p2  ;;  %s4452_s19 = smov [#allocation8]  }
  0x23   : > { %s4453_s2 = smov 192   ;;  %s4454_s16 = smov 12  }
  0x24   : > { %s474_s20 = sshll.u32 %s5035_s1, 4  ;;  %p3814_p5 = pneg %p4599_p3  ;;  %s475_s20 = int_to_ptr.hbm [resolvable:$true] %s474_s20 }
  0x25   : > { %s499_s1 = sshll.u32 %s4452_s19, 4  ;;  %s5039_s5 = sld [smem:[#allocation36_spill]]  ;;  %s500_s1 = int_to_ptr.vmem [resolvable:$true] %s499_s1 }
  0x26   : > { %p4611_p6 = pnand %p3814_p5, %p64_p1  ;;  %s4455_s18 = smov [#allocation11]  }
  0x27   : > { %s497_s26 = sshll.u32 %s5037_s3, 4  ;;  %s527_s17 = sshll.u32 %s4455_s18, 4  ;;  %s498_s26 = int_to_ptr.hbm [resolvable:$true] %s497_s26  ;;  %s528_s17 = int_to_ptr.vmem [resolvable:$true] %s527_s17 }
  0x28   : > { %3817 = dma.hbm_to_vmem [thread:$0]  (!%p4611_p6), %s475_s20, 16, %s477_s23, [#allocation6]  }
  0x29   : > { %3823 = dma.hbm_to_vmem [thread:$0]  (!%p4611_p6), %s498_s26, 6144, %s500_s1, [#allocation9], %s4453_s2, %s4453_s2, %s4454_s16  }
  0x2a   : > { %s5014_s14 = smov 64   ;;  %s4457_s13 = smov 4  }
  0x2b   : > { %s525_s3 = sshll.u32 %s5039_s5, 4  ;;  %s5040_s8 = sld [smem:[#allocation39_spill]]  ;;  %s526_s3 = int_to_ptr.hbm [resolvable:$true] %s525_s3 }
  0x2c   : > { %3829 = dma.hbm_to_vmem [thread:$0]  (!%p4611_p6), %s526_s3, 2048, %s528_s17, [#allocation12], %s5014_s14, %s5014_s14, %s4457_s13  }
  0x2d   : > { %s4458_s26 = smov [#allocation14]   ;;  %s5041_s11 = sld [smem:[#allocation42_spill]] }
  0x2e   : > { %s558_s19 = sshll.u32 %s4458_s26, 4  ;;  %s5016_s24 = smov 16   ;;  %s559_s19 = int_to_ptr.vmem [resolvable:$true] %s558_s19 }
  0x2f   : > { %s4460_s25 = smov 1   ;;  %s5042_s20 = sld [smem:[#allocation33_spill]] }
  0x30   : > { %s4461_s14 = smov [#allocation17]   ;;  %s5043_s1 = smov 64  }
  0x31   : > { %s556_s16 = sshll.u32 %s5040_s8, 4  ;;  %s589_s26 = sshll.u32 %s4461_s14, 4  ;;  %s557_s16 = int_to_ptr.hbm [resolvable:$true] %s556_s16  ;;  %s590_s26 = int_to_ptr.vmem [resolvable:$true] %s589_s26 }
  0x32   : > { %3835 = dma.hbm_to_vmem [thread:$0]  (!%p4611_p6), %s557_s16, 32, %s559_s19, [#allocation15], %s5016_s24, %s5016_s24, %s4460_s25  }
  0x33   : > { %s587_s18 = sshll.u32 %s5041_s11, 4  ;;  %s4462_s2 = smov [#allocation7]   ;;  %s588_s18 = int_to_ptr.hbm [resolvable:$true] %s587_s18 }
  0x34   : > { %3841 = dma.hbm_to_vmem [thread:$0]  (!%p4611_p6), %s588_s18, 4096, %s590_s26, [#allocation18], %s5043_s1, %s5043_s1, %s4457_s13  }
  0x35   : > { %s486_s23 = sshll.u32 %s5042_s20, 4  ;;  %s488_s5 = sshll.u32 %s4462_s2, 4  ;;  %s487_s23 = int_to_ptr.hbm [resolvable:$true] %s486_s23  ;;  %s489_s5 = int_to_ptr.vmem [resolvable:$true] %s488_s5 }
  0x36   : > { %s5044_s4 = sld [smem:[#allocation35_spill]]  ;;  %s4463_s14 = smov [#allocation10]  }
  0x37   : > { %3820 = dma.hbm_to_vmem [thread:$0]  (!%p4611_p6), %s487_s23, 16, %s489_s5, [#allocation6]  }
  0x38   : > { %s513_s19 = sshll.u32 %s4463_s14, 4  ;;  %s5045_s7 = sld [smem:[#allocation38_spill]]  ;;  %s514_s19 = int_to_ptr.vmem [resolvable:$true] %s513_s19 }
  0x39   : > { %s4464_s24 = smov 48   ;;  %s4465_s18 = smov 3  }
  0x3a   : > { %s4466_s8 = smov [#allocation13]   ;;  %s5046_s9 = sld [smem:[#allocation40_spill]] }
  0x3b   : > { %s544_s11 = sshll.u32 %s4466_s8, 4  ;;  %s5047_s23 = smov 16   ;;  %s545_s11 = int_to_ptr.vmem [resolvable:$true] %s544_s11 }
  0x3c   : > { %s511_s16 = sshll.u32 %s5044_s4, 4  ;;  %s610_s3 = sshll.u32 %s5005_s15, 4  ;;  %s512_s16 = int_to_ptr.hbm [resolvable:$true] %s511_s16  ;;  %s611_s3 = int_to_ptr.hbm [resolvable:$true] %s610_s3 }
  0x3d   : > { %3826 = dma.hbm_to_vmem [thread:$0]  (!%p4611_p6), %s512_s16, 96, %s514_s19, [#allocation9], %s4464_s24, %s4464_s24, %s4465_s18  }
  0x3e   : > { %s542_s20 = sshll.u32 %s5045_s7, 4  ;;  %s4467_s24 = smov [#allocation16]   ;;  %s543_s20 = int_to_ptr.hbm [resolvable:$true] %s542_s20 }
  0x3f   : > { %3832 = dma.hbm_to_vmem [thread:$0]  (!%p4611_p6), %s543_s20, 32, %s545_s11, [#allocation12], %s5047_s23, %s5047_s23, %s4460_s25  }
  0x40   : > { %s570_s5 = sshll.u32 %s5046_s9, 4  ;;  %s572_s16 = sshll.u32 %s4467_s24, 4  ;;  %s571_s5 = int_to_ptr.hbm [resolvable:$true] %s570_s5  ;;  %s573_s16 = int_to_ptr.vmem [resolvable:$true] %s572_s16 }
  0x41   : > { %s4468_s17 = smov 128   ;;  %s4469_s18 = smov 8  }
  0x42   : > { %3838 = dma.hbm_to_vmem [thread:$0]  (!%p4611_p6), %s571_s5, 4096, %s573_s16, [#allocation15], %s4468_s17, %s4468_s17, %s4469_s18  }
  0x43   : > { %s4470_s25 = smov [#allocation19]   ;;  %s3024_s8 = sadd.s32 4294967294, %s4449_s30  }
  0x44   : > { %s612_s20 = sshll.u32 %s4470_s25, 4  ;;  %s4676_s11 = sadd.s32 1, %s4449_s30   ;;  %s613_s20 = int_to_ptr.vmem [resolvable:$true] %s612_s20 }
  0x45   : > { %3844 = dma.hbm_to_vmem [thread:$0]  (!%p4611_p6), %s611_s3, 1024, %s613_s20, [#allocation18], %s5043_s1, %s5043_s1, %s4457_s13  }
  0x46   : > { %s47_s26 = ssub.s32 %s4449_s30, %s4676_s11  ;;  %s50_s2 = sadd.s32 1, %s4445_s29 }
  0x47   : > { %p48_p7 = scmp.eq.s32.totalorder %s47_s26, 0  ;;  %p57_p8 = scmp.ne.s32.totalorder %s4445_s29, %s4441_s28 }
  0x48   : > { %p58_p9 = scmp.eq.s32.totalorder %s4449_s30, 0  ;;  %p63_p10 = scmp.ne.s32.totalorder %s4441_s28, %s4437_s27 }
  0x49   : > { %s4687_s5 = scalar_select %p48_p7, %s4445_s29, %s50_s2  }
  0x4a   : > { %p4689_p11 = por %p58_p9, %p57_p8  ;;  %p4695_p12 = por %p64_p1, %p63_p10 }
  0x4b   : > { %p423_p13 = scmp.eq.s32.totalorder %s4594_s21, 1  ;;  %p429_p0 = scmp.eq.s32.totalorder %s3024_s8, 1 }
  0x4c   : > { %p3866_p2 = scmp.lt.s32.totalorder %s4449_s30, 2  ;;  %s629_s1 = sand.u32 1, %s4445_s29  }
  0x4d   : > { %p4702_p5 = por %p423_p13, %p57_p8  ;;  %p4706_p6 = por %p429_p0, %p63_p10 }
  0x4e   : > { %s3037_s16 = sshll.u32 %s629_s1, 3  ;;  %s3038_s14 = sshll.u32 %s4449_s30, 3 }
  0x4f   : > { %s5052_s17 = sld [smem:[#allocation31_spill]]  ;;  %s633_s25 = scalar_lea.vmem [#allocation2], %s3037_s16 }
  0x50   : > { %s641_s20 = sshll.u32 %s633_s25, 4  ;;  %p4716_p7 = pnand %p3866_p2, %p4689_p11  ;;  %s642_s20 = int_to_ptr.vmem [resolvable:$true] %s641_s20 }
  0x51   : > { %s630_s2 = scalar_lea.sflag [#allocation3], %s629_s1 }
  0x52   : > { %p4305_p9 = pneg %p4716_p7 }
  0x55   : > { %s637_s18 = scalar_lea.hbm %s5052_s17, %s3038_s14  ;;  %s4308_s19 = scalar_lea.hbm %s5052_s17, 16 }
  0x56   : > { %s639_s26 = sshll.u32 %s637_s18, 4  ;;  %s640_s26 = int_to_ptr.hbm [resolvable:$true] %s639_s26 }
  0x57   : > { %s4301_s4 = sshra.s32 %s640_s26, 4  ;;  %s4302_s4 = int_to_ptr.hbm [resolvable:$true] %s4301_s4 }
  0x58   : > { %s4303_s7 = scalar_lea.hbm %s4302_s4, 8  ;;  %p4309_p11 = scmp.lt.s32.totalorder %s4302_s4, %s5052_s17 }
  0x59   : > { %p4304_p8 = scmp.ne.s32.totalorder %s4302_s4, %s4303_s7  ;;  %p4310_p0 = scmp.lt.s32.totalorder %s4308_s19, %s4303_s7 }
  0x5b   : > { %p4306_p10 = pnand %p4305_p9, %p4304_p8  ;;  %p4311_p2 = por %p4310_p0, %p4309_p11 }
  0x5d   : > { %p4307_p13 = pneg %p4306_p10 }
  0x5f   : > { %p4312_p4 = pnand %p4311_p2, %p4307_p13 }
  0x61   : > { %4315 = shalt.err (!%p4312_p4)
}
  0x62   : > { %3848 = dma.hbm_to_vmem [thread:$0]  (!%p4716_p7), %s640_s26, 128, %s642_s20, %s630_s2  }
  0x63   : > { %650 = sbr.rel (%p4599_p3) target bundleno = 4842 (0x12ea), region = 88  ;;  %s4733_s1 = sand.u32 (!%p4599_p3), 1, %s4441_s28  }
  0x64   : > { %s4736_s18 = sshll.u32 (!%p4599_p3), %s4733_s1, 3  ;;  %s653_s4 = scalar_lea.sflag (!%p4599_p3), [#allocation3], %s4733_s1 }
  0x65   : > { %s656_s7 = scalar_lea.vmem (!%p4599_p3), [#allocation2], %s4736_s18 }
  0x68   : > { %4404 = dma.done.wait (%p4695_p12), %s653_s4, 128  }
  0x69   : > { %4406 = vsyncadd (%p4695_p12), %s653_s4, 4294967168 }
  0x6a   : > { %4408 = dma.done.wait (%p64_p1), [#allocation6], 32  }
  0x6b   : > { %4410 = vsyncadd (%p64_p1), [#allocation6], 4294967264 }
  0x6c   : > { %4412 = dma.done.wait (%p64_p1), [#allocation9], 6240  }
  0x6d   : > { %4414 = vsyncadd (%p64_p1), [#allocation9], 4294961056 }
  0x6e   : > { %4416 = dma.done.wait (%p64_p1), [#allocation12], 2080  }
  0x6f   : > { %4418 = vsyncadd (%p64_p1), [#allocation12], 4294965216 }
  0x70   : > { %4420 = dma.done.wait (%p64_p1), [#allocation15], 4128  }
  0x71   : > { %4422 = vsyncadd (%p64_p1), [#allocation15], 4294963168 }
  0x72   : > { %4424 = dma.done.wait (%p64_p1), [#allocation18], 5120  }
  0x73   : > { %4426 = vsyncadd (%p64_p1), [#allocation18], 4294962176  ;;  %v766_v0 = vld [vmem:[%s656_s7] sm:$0xff]  ;;  %v4471_v1 = vmov 128.0   ;;  %v3139_v2 = vld [vmem:[#allocation8 + $0xa8] sm:$0xf] }
  0x74   : > { %769 = vadd.xlane.f32.xlu0 %v766_v0  ;;  %3949 = vrcp.f32 %v4471_v1  ;;  %v3654_v3 = vld [vmem:[#allocation8 + $0xb0] sm:$0xf0]  ;;  %v3653_v4 = vld [vmem:[#allocation8 + $0xac] sm:$0xf]  ;;  %v3141_v6 = vld [vmem:[#allocation8 + $0xb4] sm:$0xf0] }
  0x75   : > { %v3140_v5 = vor.u32 %v3654_v3, %v3139_v2  ;;  %v3147_v7 = vld [vmem:[#allocation8 + $0xb0] sm:$0xf]  ;;  %v3655_v8 = vld [vmem:[#allocation8 + $0xb8] sm:$0xf0]  ;;  %v3144_v9 = vor.u32 %v3653_v4, %v3141_v6  ;;  %v3650_v23 = vld [vmem:[#allocation8 + $0x94] sm:$0xf] }
  0x76   : > { %v3148_v10 = vor.u32 %v3655_v8, %v3147_v7  ;;  %v3127_v21 = vld [vmem:[#allocation8 + $0x90] sm:$0xf]  ;;  %v3651_v22 = vld [vmem:[#allocation8 + $0x98] sm:$0xf0]  ;;  %v3129_v25 = vld [vmem:[#allocation8 + $0x9c] sm:$0xf0] }
  0x77   : > { %973 = vmatpush.bf16.msra.mxu0 %v3140_v5  ;;  %986 = vmatpush.bf16.msra.mxu1 %v3144_v9  ;;  %v3128_v24 = vor.u32 %v3651_v22, %v3127_v21  ;;  %v3135_v26 = vld [vmem:[#allocation8 + $0x98] sm:$0xf]  ;;  %v3652_v27 = vld [vmem:[#allocation8 + $0xa0] sm:$0xf0]  ;;  %v3132_v28 = vor.u32 %v3650_v23, %v3129_v25  ;;  %v3647_v32 = vld [vmem:[#allocation8 + $0x7c] sm:$0xf] }
  0x78   : > { %999 = vmatpush.bf16.msra.mxu2 %v3148_v10  ;;  %v3136_v29 = vor.u32 %v3652_v27, %v3135_v26  ;;  %v3115_v30 = vld [vmem:[#allocation8 + $0x78] sm:$0xf]  ;;  %v3648_v31 = vld [vmem:[#allocation8 + $0x80] sm:$0xf0]  ;;  %v3117_v34 = vld [vmem:[#allocation8 + $0x84] sm:$0xf0] }
  0x79   : > { %v3116_v33 = vor.u32 %v3648_v31, %v3115_v30  ;;  %v3123_v35 = vld [vmem:[#allocation8 + $0x80] sm:$0xf]  ;;  %v3649_v36 = vld [vmem:[#allocation8 + $0x88] sm:$0xf0]  ;;  %v3120_v37 = vor.u32 %v3647_v32, %v3117_v34  ;;  %v3644_v41 = vld [vmem:[#allocation8 + $0x64] sm:$0xf] }
  0x7a   : > { %v3950_v11 = vpop.eup %3949  ;;  %v3124_v38 = vor.u32 %v3649_v36, %v3123_v35  ;;  %v3103_v39 = vld [vmem:[#allocation8 + $0x60] sm:$0xf]  ;;  %v3645_v40 = vld [vmem:[#allocation8 + $0x68] sm:$0xf0]  ;;  %v3105_v43 = vld [vmem:[#allocation8 + $0x6c] sm:$0xf0] }
  0x7b   : > { %v772_v12 = vmul.f32 128.0, %v3950_v11  ;;  %vm776_vm0 = vweird.f32 %v3950_v11  ;;  %974 = vmatpush.bf16.msra.mxu0 %v3128_v24  ;;  %987 = vmatpush.bf16.msra.mxu1 %v3132_v28  ;;  %v3104_v42 = vor.u32 %v3645_v40, %v3103_v39  ;;  %v3111_v44 = vld [vmem:[#allocation8 + $0x68] sm:$0xf]  ;;  %v3646_v45 = vld [vmem:[#allocation8 + $0x70] sm:$0xf0]  ;;  %v3108_v46 = vor.u32 %v3644_v41, %v3105_v43  ;;  %s4472_s22 = smov 32  }
  0x7c   : > { %1000 = vmatpush.bf16.msra.mxu2 %v3136_v29  ;;  %v3112_v47 = vor.u32 %v3646_v45, %v3111_v44  ;;  %v3091_v48 = vld [vmem:[#allocation8 + $0x48] sm:$0xf]  ;;  %v3642_v49 = vld [vmem:[#allocation8 + $0x50] sm:$0xf0]  ;;  %v3641_v50 = vld [vmem:[#allocation8 + $0x4c] sm:$0xf] }
  0x7d   : > { %v773_v13 = vsub.f32 1.0, %v772_v12  ;;  %v3092_v51 = vor.u32 %v3642_v49, %v3091_v48  ;;  %v3093_v52 = vld [vmem:[#allocation8 + $0x54] sm:$0xf0]  ;;  %v3099_v53 = vld [vmem:[#allocation8 + $0x50] sm:$0xf]  ;;  %vm1031_vm4 = vcmask 261120  }
  0x7e   : > { %v3643_v54 = vld [vmem:[#allocation8 + $0x58] sm:$0xf0]  ;;  %v3096_v55 = vor.u32 %v3641_v50, %v3093_v52  ;;  %v3079_v57 = vld [vmem:[#allocation8 + $0x30] sm:$0xf]  ;;  %v3638_v59 = vld [vmem:[#allocation8 + $0x34] sm:$0xf] }
  0x7f   : > { %v774_v14 = vmul.f32 %v3950_v11, %v773_v13  ;;  %975 = vmatpush.bf16.msra.mxu0 %v3116_v33  ;;  %988 = vmatpush.bf16.msra.mxu1 %v3120_v37  ;;  %v3100_v56 = vor.u32 %v3643_v54, %v3099_v53  ;;  %v3639_v58 = vld [vmem:[#allocation8 + $0x38] sm:$0xf0]  ;;  %v3081_v61 = vld [vmem:[#allocation8 + $0x3c] sm:$0xf0]  ;;  %v3087_v62 = vld [vmem:[#allocation8 + $0x38] sm:$0xf] }
  0x80   : > { %1001 = vmatpush.bf16.msra.mxu2 %v3124_v38  ;;  %v3080_v60 = vor.u32 %v3639_v58, %v3079_v57  ;;  %v3640_v63 = vld [vmem:[#allocation8 + $0x40] sm:$0xf0]  ;;  %v3067_v2 = vld [vmem:[#allocation8 + $0x18] sm:$0xf]  ;;  %v3635_v4 = vld [vmem:[#allocation8 + $0x1c] sm:$0xf] }
  0x81   : > { %v775_v15 = vadd.f32 %v3950_v11, %v774_v14  ;;  %v3088_v1 = vor.u32 %v3640_v63, %v3087_v62  ;;  %v3636_v3 = vld [vmem:[#allocation8 + $0x20] sm:$0xf0]  ;;  %v3069_v6 = vld [vmem:[#allocation8 + $0x24] sm:$0xf0]  ;;  %v3075_v7 = vld [vmem:[#allocation8 + $0x20] sm:$0xf] }
  0x82   : > { %v3068_v5 = vor.u32 %v3636_v3, %v3067_v2  ;;  %v3637_v8 = vld [vmem:[#allocation8 + $0x28] sm:$0xf0]  ;;  %v3072_v9 = vor.u32 %v3635_v4, %v3069_v6  ;;  %v3632_v13 = vld [vmem:[#allocation8 + $0x4] sm:$0xf]  ;;  %v3934_v31 = vld [vmem:[#allocation5] ss:$0 sm:$0xff] }
  0x83   : > { %v4764_v16 = vsel %vm776_vm0, %v3950_v11, %v775_v15  ;;  %976 = vmatpush.bf16.msra.mxu0 %v3104_v42  ;;  %989 = vmatpush.bf16.msra.mxu1 %v3108_v46  ;;  %v3076_v10 = vor.u32 %v3637_v8, %v3075_v7  ;;  %v3055_v11 = vld [vmem:[#allocation8] sm:$0xf]  ;;  %v3633_v12 = vld [vmem:[#allocation8 + $0x8] sm:$0xf0]  ;;  %v3057_v15 = vld [vmem:[#allocation8 + $0xc] sm:$0xf0] }
  0x84   : > { %1002 = vmatpush.bf16.msra.mxu2 %v3112_v47  ;;  %v3056_v14 = vor.u32 %v3633_v12, %v3055_v11  ;;  %v3935_v34 = vld [vmem:[#allocation7] ss:$0 sm:$0xff]  ;;  %v837_v38 = vld [vmem:[#allocation10] sm:$0x7]  ;;  %s4473_s13 = smov 96   ;;  %vm1068_vm5 = vcmask 1043456  }
  0x85   : > { %v840_v39 = vperm.slane %v837_v38, 1  ;;  %v839_v43 = vperm.slane %v837_v38, 0  ;;  %v841_v45 = vperm.slane %v837_v38, 2  ;;  %s4474_s25 = smov 64   ;;  %vm1052_vm6 = vcmask 64512   ;;  %s5054_s6 = sld [smem:[#allocation37_spill]] }
  0x86   : > { %s5055_s10 = sld [smem:[#allocation41_spill]]  ;;  %s757_s4 = scalar_lea.vmem [#allocation20], %s4736_s18 }
  0x87   : > { %977 = vmatpush.bf16.msra.mxu0 %v3092_v51  ;;  %990 = vmatpush.bf16.msra.mxu1 %v3096_v55  ;;  %v3657_v55 = vld [vmem:[#allocation11 + $0x8] sm:$0xff]  ;;  %s5056_s0 = sld [smem:[#allocation43_spill]]  ;;  %s3628_s7 = sshll.u32 %s4594_s21, 3 }
  0x88   : > { %1003 = vmatpush.bf16.msra.mxu2 %v3100_v56  ;;  %v3656_v56 = vld [vmem:[#allocation11] sm:$0xff]  ;;  %s5057_s20 = sld [smem:[#allocation44_spill]]  ;;  %s2809_s8 = sshll.u32 %s757_s4, 4  ;;  %s2810_s8 = int_to_ptr.vmem [resolvable:$true] %s2809_s8 }
  0x89   : > { %s2792_s16 = scalar_lea.sflag [#allocation4], %s4733_s1 }
  0x8b   : > { %978 = vmatpush.bf16.msra.mxu0 %v3080_v60 }
  0x8c   : > { %1004 = vmatpush.bf16.msra.mxu2 %v3088_v1 }
  0x8f   : > { %979 = vmatpush.bf16.msra.mxu0 %v3068_v5 }
  0x90   : > { %1005 = vmatpush.bf16.msra.mxu2 %v3076_v10 }
  0x93   : > { %980 = vmatpush.bf16.msra.mxu0 %v3056_v14 }
  0xe7   : > { %v770_v17 = vpop.xlane.xlu0 %769 }
  0xe8   : > { %v778_v18 = vmul.f32 %v4764_v16, %v770_v17  ;;  %v3063_v17 = vld [vmem:[#allocation8 + $0x8] sm:$0xf] }
  0xea   : > { %v4767_v19 = vsub.f32 %v766_v0, %v778_v18  ;;  %v3084_v0 = vor.u32 %v3638_v59, %v3081_v61  ;;  %v3634_v18 = vld [vmem:[#allocation8 + $0x10] sm:$0xf0] }
  0xeb   : > { %v3064_v21 = vor.u32 %v3634_v18, %v3063_v17 }
  0xec   : > { %v780_v20 = vmul.f32 %v4767_v19, %v4767_v19  ;;  %991 = vmatpush.bf16.msra.mxu1 %v3084_v0 }
  0xed   : > { %1006 = vmatpush.bf16.msra.mxu2 %v3064_v21 }
  0xee   : > { %781 = vadd.xlane.f32.xlu0 %v780_v20  ;;  %v3060_v20 = vor.u32 %v3632_v13, %v3057_v15 }
  0xf0   : > { %992 = vmatpush.bf16.msra.mxu1 %v3072_v9 }
  0xf1   : > { %1196 = vmatpush.bf16.msrb.mxu2 %v3657_v55 }
  0xf4   : > { %993 = vmatpush.bf16.msra.mxu1 %v3060_v20 }
  0xf5   : > { %1197 = vmatpush.bf16.msrb.mxu2 %v3656_v56 }
 0x161   : > { %v782_v22 = vpop.xlane.xlu0 %781 }
 0x162   : > { %v783_v23 = vmul.f32 %v782_v22, %v4764_v16 }
 0x164   : > { %v784_v24 = vadd.f32 1e-07, %v783_v23 }
 0x166   : > { %3951 = vrsqrt.f32 %v784_v24  ;;  %vm791_vm2 = vweird.f32 %v784_v24 }
 0x16c   : > { %v3952_v25 = vpop.eup %3951 }
 0x16d   : > { %v786_v26 = vmul.f32 %v3952_v25, %v784_v24  ;;  %vm792_vm1 = vweird.f32 %v3952_v25 }
 0x16e   : > { %vm793_vm3 = vmor %vm791_vm2, %vm792_vm1 }
 0x16f   : > { %v787_v27 = vmul.f32 %v3952_v25, %v786_v26 }
 0x171   : > { %v788_v28 = vmul.f32 0.5, %v787_v27 }
 0x173   : > { %v789_v29 = vsub.f32 1.5, %v788_v28 }
 0x175   : > { %v790_v30 = vmul.f32 %v3952_v25, %v789_v29 }
 0x177   : > { %v794_v32 = vsel %vm793_vm3, %v3952_v25, %v790_v30 }
 0x178   : > { %v795_v33 = vmul.f32 %v794_v32, %v4767_v19 }
 0x17a   : > { %v799_v35 = vmul.f32 %v3934_v31, %v795_v33 }
 0x17c   : > { %v4773_v36 = vadd.f32 %v3935_v34, %v799_v35 }
 0x17e   : > { %v804_v37 = vpack.c.bf16 %v4773_v36, %v4773_v36 }
 0x180   : > { %981 = vmatmul.bf16.vlgmr.msra.gmra.mxu0 %v804_v37  ;;  %994 = vmatmul.bf16.vlgmr.msra.gmra.mxu1 %v804_v37 }
 0x181   : > { %1007 = vmatmul.bf16.vlgmr.msra.gmra.mxu2 %v804_v37 }
 0x1fd   : > { %v982_v40 = vpop.f32.mrf.mxu0  ;;  %v995_v41 = vpop.f32.mrf.mxu1 }
 0x1fe   : > { %v996_v42 = vadd.f32 %v995_v41, %v840_v39  ;;  %v983_v46 = vadd.f32 %v982_v40, %v839_v43 }
 0x200   : > { %v1029_v44 = vpack.c.bf16 %v996_v42, %v996_v42  ;;  %v1028_v52 = vpack.c.bf16 %v983_v46, %v983_v46 }
 0x202   : > { %1292 = vrot.lane.b32.xlu0 %v1029_v44, %s4472_s22  ;;  %1090 = vrot.lane.b32.xlu2 %v1029_v44, %s4473_s13  ;;  %v1036_v19 = vsel %vm1031_vm4, %v1029_v44, 0 }
 0x203   : > { %1045 = vmatpush.bf16.xpose.msrb.mxu0 %v1036_v19 }
 0x204   : > { %v1008_v47 = vpop.f32.mrf.mxu2 }
 0x205   : > { %v1009_v48 = vadd.f32 %v1008_v47, %v841_v45  ;;  %v984_v49 = vpop.f32.mrf.mxu0  ;;  %v997_v50 = vpop.f32.mrf.mxu1 }
 0x207   : > { %v4780_v51 = vpack.c.bf16 %v1009_v48, %v1009_v48 }
 0x209   : > { %v1070_v53 = vsel %vm1068_vm5, %v4780_v51, 0 }
 0x20a   : > { %1079 = vmatpush.bf16.msra.mxu3 %v1070_v53  ;;  %1087 = vrot.lane.b32.xlu2 %v1028_v52, %s4473_s13 }
 0x20b   : > { %3149 = vmatmul.msk.bf16.vlgmr.msrb.gmra.mxu0 %vm1031_vm4, %v1028_v52 }
 0x20c   : > { %v1010_v54 = vpop.f32.mrf.mxu2 }
 0x212   : > { %1290 = vrot.lane.b32.xlu2 %v1028_v52, %s4472_s22 }
 0x21a   : > { %1203 = vrot.lane.b32.xlu2 %v1028_v52, %s4474_s25 }
 0x25c   : > { %v1091_v57 = vpop.permute.xlu2 %1090 }
 0x25d   : > { %v1096_v58 = vsel %vm1031_vm4, %v1091_v57, 0 }
 0x25e   : > { %1105 = vmatpush.bf16.xpose.msrb.mxu3 %v1096_v58 }
 0x264   : > { %v1088_v10 = vpop.permute.xlu2 %1087 }
 0x26c   : > { %v1291_v13 = vpop.permute.xlu2 %1290 }
 0x274   : > { %v1293_v59 = vpop.permute.xlu0 %1292  ;;  %v1204_v14 = vpop.permute.xlu2 %1203 }
 0x275   : > { %v1298_v60 = vsel %vm1031_vm4, %v1293_v59, 0 }
 0x276   : > { %1307 = vmatpush.bf16.xpose.msra.mxu2 %v1298_v60 }
 0x288   : > { %v1047_v61 = vpop.f32.mrf.mxu0 }
 0x289   : > { %v1051_v62 = vmul.f32 0.17677669, %v1047_v61 }
 0x28b   : > { %v1053_v63 = vsel %vm1052_vm6, %v1051_v62, -inf }
 0x28c   : > { %1054 = vmax.xlane.f32.xlu1 %v1053_v63  ;;  %v3658_v63 = vld [vmem:[#allocation11 + $0x10] sm:$0xff] }
 0x290   : > { %v1049_v0 = vpop.f32.mrf.mxu0 }
 0x291   : > { %v3661_v0 = vld [vmem:[#allocation11 + $0x28] sm:$0xff] }
 0x2ff   : > { %v1055_v1 = vpop.xlane.xlu1 %1054 }
 0x300   : > { %v1056_v2 = vsub.f32 %v1051_v62, %v1055_v1  ;;  %v3659_v62 = vld [vmem:[#allocation11 + $0x18] sm:$0xff] }
 0x301   : > { %1168 = vmatpush.bf16.msrb.mxu1 %v3659_v62  ;;  %v3670_v62 = vld [vmem:[#allocation16 + $0x34] sm:$0xf] }
 0x302   : > { %v1057_v3 = vmul.f32 1.442695, %v1056_v2  ;;  %v3660_v2 = vld [vmem:[#allocation11 + $0x20] sm:$0xff] }
 0x304   : > { %3953 = vpow2.f32 %v1057_v3 }
 0x305   : > { %1169 = vmatpush.bf16.msrb.mxu1 %v3658_v63 }
 0x309   : > { %1282 = vmatpush.bf16.msra.mxu1 %v3661_v0  ;;  %v3221_v0 = vld [vmem:[#allocation16 + $0x38] sm:$0xf0] }
 0x30a   : > { %v3954_v4 = vpop.eup %3953 }
 0x30b   : > { %v1059_v5 = vsel %vm1052_vm6, %v3954_v4, 0.0 }
 0x30c   : > { %1060 = vadd.xlane.f32.xlu1 %v1059_v5 }
 0x30d   : > { %1283 = vmatpush.bf16.msra.mxu1 %v3660_v2  ;;  %v3211_v2 = vld [vmem:[#allocation16 + $0x20] sm:$0xf] }
 0x325   : > { %1205 = vrot.lane.b32.xlu1 %v1029_v44, %s4474_s25 }
 0x37f   : > { %v1061_v6 = vpop.xlane.xlu1 %1060 }
 0x380   : > { %3955 = vrcp.f32 %v1061_v6 }
 0x386   : > { %v3956_v7 = vpop.eup %3955 }
 0x387   : > { %v1063_v8 = vmul.f32 %v3956_v7, %v3954_v4 }
 0x389   : > { %v1064_v9 = vpack.c.bf16 %v1063_v8, %v1063_v8 }
 0x38b   : > { %3150 = vmatmul.msk.bf16.vlgmr.msra.gmra.mxu3 %vm1052_vm6, %v1064_v9 }
 0x397   : > { %v1206_v11 = vpop.permute.xlu1 %1205 }
 0x398   : > { %v1211_v12 = vsel %vm1031_vm4, %v1206_v11, 0 }
 0x399   : > { %1220 = vmatpush.bf16.xpose.msra.mxu3 %v1211_v12 }
 0x39b   : > { %3151 = vmatmul.msk.bf16.vlgmr.msrb.gmra.mxu3 %vm1031_vm4, %v1088_v10 }
 0x3ab   : > { %3171 = vmatmul.msk.bf16.vlgmr.msra.gmra.mxu3 %vm1031_vm4, %v1204_v14  ;;  %v3662_v14 = vld [vmem:[#allocation11 + $0x30] sm:$0xff] }
 0x40e   : > { %v1081_v15 = vpop.f32.mrf.mxu3 }
 0x40f   : > { %v1085_v17 = vpack.c.bf16 %v1081_v15, %v1081_v15 }
 0x411   : > { %3170 = vmatmul.msk.bf16.vlgmr.msrb.gmra.mxu2 %vm1031_vm4, %v1085_v17 }
 0x416   : > { %v1083_v18 = vpop.f32.mrf.mxu3 }
 0x41e   : > { %v1107_v20 = vpop.f32.mrf.mxu3 }
 0x41f   : > { %v1111_v21 = vmul.f32 0.17677669, %v1107_v20 }
 0x421   : > { %3182 = vmatmul.msk.bf16.vlgmr.msra.gmra.mxu2 %vm1031_vm4, %v1291_v13  ;;  %v1112_v22 = vsel %vm1052_vm6, %v1111_v21, -inf }
 0x422   : > { %1113 = vmax.xlane.f32.xlu2 %v1112_v22 }
 0x426   : > { %v1109_v23 = vpop.f32.mrf.mxu3 }
 0x42e   : > { %v1222_v24 = vpop.f32.mrf.mxu3 }
 0x42f   : > { %v1226_v25 = vmul.f32 0.17677669, %v1222_v24 }
 0x431   : > { %v1227_v26 = vsel %vm1052_vm6, %v1226_v25, -inf }
 0x432   : > { %1228 = vmax.xlane.f32.xlu1 %v1227_v26  ;;  %v3936_v26 = vld [vmem:[%s5054_s6] ss:$0 sm:$0xff] }
 0x436   : > { %v1224_v27 = vpop.f32.mrf.mxu3 }
 0x494   : > { %v4801_v28 = vpop.f32.mrf.mxu2 }
 0x495   : > { %v1114_v29 = vpop.xlane.xlu2 %1113 }
 0x496   : > { %v1115_v30 = vsub.f32 %v1111_v21, %v1114_v29 }
 0x498   : > { %v1116_v31 = vmul.f32 1.442695, %v1115_v30 }
 0x49a   : > { %3957 = vpow2.f32 %v1116_v31 }
 0x49c   : > { %v1201_v32 = vpop.f32.mrf.mxu2 }
 0x4a0   : > { %v3958_v33 = vpop.eup %3957 }
 0x4a1   : > { %v1118_v34 = vsel %vm1052_vm6, %v3958_v33, 0.0 }
 0x4a2   : > { %1119 = vadd.xlane.f32.xlu2 %v1118_v34  ;;  %v3679_v34 = vld [vmem:[#allocation16 + $0x74] sm:$0xf0] }
 0x4a4   : > { %v1309_v35 = vpop.f32.mrf.mxu2 }
 0x4a5   : > { %v1313_v37 = vmul.f32 0.17677669, %v1309_v35  ;;  %v1229_v38 = vpop.xlane.xlu1 %1228  ;;  %v3678_v35 = vld [vmem:[#allocation16 + $0x74] sm:$0xf] }
 0x4a6   : > { %v1230_v39 = vsub.f32 %v1226_v25, %v1229_v38  ;;  %v3253_v38 = vld [vmem:[#allocation16 + $0x78] sm:$0xf0] }
 0x4a7   : > { %v1314_v40 = vsel %vm1052_vm6, %v1313_v37, -inf }
 0x4a8   : > { %v1231_v41 = vmul.f32 1.442695, %v1230_v39  ;;  %1315 = vmax.xlane.f32.xlu0 %v1314_v40 }
 0x4aa   : > { %3959 = vpow2.f32 %v1231_v41 }
 0x4ac   : > { %v1311_v42 = vpop.f32.mrf.mxu2 }
 0x4b0   : > { %v3960_v43 = vpop.eup %3959 }
 0x4b1   : > { %v1233_v44 = vsel %vm1052_vm6, %v3960_v43, 0.0 }
 0x4b2   : > { %1234 = vadd.xlane.f32.xlu1 %v1233_v44  ;;  %v3676_v44 = vld [vmem:[#allocation16 + $0x64] sm:$0xf] }
 0x4bc   : > { %1125 = vrot.lane.b32.xlu0 %v4780_v51, %s4473_s13 }
 0x4cb   : > { %1239 = vrot.lane.b32.xlu1 %v4780_v51, %s4474_s25 }
 0x515   : > { %v1120_v47 = vpop.xlane.xlu2 %1119 }
 0x51b   : > { %v1316_v45 = vpop.xlane.xlu0 %1315 }
 0x51c   : > { %v1317_v19 = vsub.f32 %v1313_v37, %v1316_v45 }
 0x51e   : > { %v1318_v46 = vmul.f32 1.442695, %v1317_v19  ;;  %v3245_v19 = vld [vmem:[#allocation16 + $0x68] sm:$0xf0] }
 0x520   : > { %3961 = vpow2.f32 %v1318_v46  ;;  %v3248_v46 = vor.u32 %v3676_v44, %v3245_v19  ;;  %v3683_v44 = vld [vmem:[#allocation17 + $0x18] sm:$0xff]  ;;  %v3682_v19 = vld [vmem:[#allocation17 + $0x10] sm:$0xff] }
 0x521   : > { %3963 = vrcp.f32 %v1120_v47  ;;  %v3235_v47 = vld [vmem:[#allocation16 + $0x50] sm:$0xf] }
 0x525   : > { %v1235_v56 = vpop.xlane.xlu1 %1234 }
 0x526   : > { %v3962_v48 = vpop.eup %3961  ;;  %3965 = vrcp.f32 %v1235_v56  ;;  %v3672_v56 = vld [vmem:[#allocation16 + $0x44] sm:$0xf] }
 0x527   : > { %v1320_v49 = vsel %vm1052_vm6, %v3962_v48, 0.0  ;;  %v3964_v50 = vpop.eup %3963 }
 0x528   : > { %1321 = vadd.xlane.f32.xlu2 %v1320_v49  ;;  %v1122_v52 = vmul.f32 %v3964_v50, %v3958_v33  ;;  %v3251_v33 = vld [vmem:[#allocation16 + $0x70] sm:$0xf]  ;;  %v3674_v49 = vld [vmem:[#allocation16 + $0x54] sm:$0xf] }
 0x529   : > { %v3252_v37 = vor.u32 %v3679_v34, %v3251_v33 }
 0x52a   : > { %v1123_v55 = vpack.c.bf16 %v1122_v52, %v1122_v52  ;;  %v3237_v52 = vld [vmem:[#allocation16 + $0x58] sm:$0xf0] }
 0x52c   : > { %v3966_v57 = vpop.eup %3965 }
 0x52d   : > { %v1237_v58 = vmul.f32 %v3966_v57, %v3960_v43  ;;  %v3677_v43 = vld [vmem:[#allocation16 + $0x64] sm:$0xf0] }
 0x52e   : > { %v1126_v53 = vpop.permute.xlu0 %1125 }
 0x52f   : > { %v1131_v54 = vsel %vm1068_vm5, %v1126_v53, 0  ;;  %v1238_v61 = vpack.c.bf16 %v1237_v58, %v1237_v58  ;;  %v3240_v53 = vor.u32 %v3674_v49, %v3237_v52  ;;  %v3229_v58 = vld [vmem:[#allocation16 + $0x48] sm:$0xf0]  ;;  %v3680_v49 = vld [vmem:[#allocation17] sm:$0xff] }
 0x530   : > { %1140 = vmatpush.bf16.msra.mxu0 %v1131_v54  ;;  %v3227_v54 = vld [vmem:[#allocation16 + $0x40] sm:$0xf] }
 0x531   : > { %v1430_v52 = vld [vmem:[%s5055_s10] sm:$0x3] }
 0x533   : > { %3152 = vmatmul.msk.bf16.vlgmr.msra.gmra.mxu0 %vm1052_vm6, %v1123_v55  ;;  %v3673_v55 = vld [vmem:[#allocation16 + $0x44] sm:$0xf0] }
 0x534   : > { %v3228_v57 = vor.u32 %v3673_v55, %v3227_v54  ;;  %v1432_v54 = vperm.slane %v1430_v52, 0 }
 0x53d   : > { %v1240_v59 = vpop.permute.xlu1 %1239 }
 0x53e   : > { %v1245_v60 = vsel %vm1068_vm5, %v1240_v59, 0  ;;  %v3232_v59 = vor.u32 %v3672_v56, %v3229_v58  ;;  %v1433_v58 = vperm.slane %v1430_v52, 1 }
 0x53f   : > { %1254 = vmatpush.bf16.msrb.mxu0 %v1245_v60  ;;  %v3219_v60 = vld [vmem:[#allocation16 + $0x30] sm:$0xf] }
 0x540   : > { %1326 = vrot.lane.b32.xlu2 %v4780_v51, %s4472_s22  ;;  %v3663_v51 = vld [vmem:[#allocation11 + $0x38] sm:$0xff] }
 0x543   : > { %3172 = vmatmul.msk.bf16.vlgmr.msrb.gmra.mxu0 %vm1052_vm6, %v1238_v61  ;;  %v3671_v61 = vld [vmem:[#allocation16 + $0x34] sm:$0xf0] }
 0x544   : > { %1369 = vmatpush.bf16.msra.mxu0 %v3663_v51  ;;  %v3220_v63 = vor.u32 %v3671_v61, %v3219_v60  ;;  %v3203_v51 = vld [vmem:[#allocation16 + $0x10] sm:$0xf] }
 0x548   : > { %1370 = vmatpush.bf16.msra.mxu0 %v3662_v14  ;;  %v3665_v14 = vld [vmem:[#allocation16 + $0x4] sm:$0xf0] }
 0x59b   : > { %v1322_v1 = vpop.xlane.xlu2 %1321 }
 0x59c   : > { %3967 = vrcp.f32 %v1322_v1  ;;  %v3224_v1 = vor.u32 %v3670_v62, %v3221_v0 }
 0x5a2   : > { %v3968_v3 = vpop.eup %3967 }
 0x5a3   : > { %v1324_v4 = vmul.f32 %v3968_v3, %v3962_v48  ;;  %v1327_v5 = vpop.permute.xlu2 %1326  ;;  %v3675_v48 = vld [vmem:[#allocation16 + $0x54] sm:$0xf0]  ;;  %v3669_v3 = vld [vmem:[#allocation16 + $0x24] sm:$0xf0] }
 0x5a4   : > { %v1332_v6 = vsel %vm1068_vm5, %v1327_v5, 0  ;;  %v3236_v50 = vor.u32 %v3675_v48, %v3235_v47  ;;  %v3212_v5 = vor.u32 %v3669_v3, %v3211_v2  ;;  %v3681_v47 = vld [vmem:[#allocation17 + $0x8] sm:$0xff]  ;;  %v3690_v48 = vld [vmem:[#allocation17 + $0x50] sm:$0xff] }
 0x5a5   : > { %v1325_v7 = vpack.c.bf16 %v1324_v4, %v1324_v4  ;;  %1341 = vmatpush.bf16.msrb.mxu3 %v1332_v6  ;;  %v3668_v4 = vld [vmem:[#allocation16 + $0x24] sm:$0xf]  ;;  %v3213_v6 = vld [vmem:[#allocation16 + $0x28] sm:$0xf0] }
 0x5a8   : > { %3183 = vmatmul.msk.bf16.vlgmr.msrb.gmra.mxu3 %vm1052_vm6, %v1325_v7  ;;  %v3216_v7 = vor.u32 %v3668_v4, %v3213_v6 }
 0x5b0   : > { %v1142_v8 = vpop.f32.mrf.mxu0 }
 0x5b1   : > { %v1146_v9 = vpack.c.bf16 %v1142_v8, %v1142_v8  ;;  %v3667_v8 = vld [vmem:[#allocation16 + $0x14] sm:$0xf0] }
 0x5b3   : > { %3161 = vmatmul.msk.bf16.vlgmr.msrb.gmra.mxu1 %vm1031_vm4, %v1146_v9  ;;  %v3666_v9 = vld [vmem:[#allocation16 + $0x14] sm:$0xf] }
 0x5b4   : > { %1516 = vmatpush.bf16.msrb.mxu1 %v3252_v37 }
 0x5b8   : > { %v1144_v10 = vpop.f32.mrf.mxu0 }
 0x5b9   : > { %v3204_v10 = vor.u32 %v3667_v8, %v3203_v51 }
 0x5c0   : > { %v1256_v11 = vpop.f32.mrf.mxu0 }
 0x5c1   : > { %v1260_v12 = vpack.c.bf16 %v1256_v11, %v1256_v11  ;;  %v3205_v11 = vld [vmem:[#allocation16 + $0x18] sm:$0xf0] }
 0x5c3   : > { %3181 = vmatmul.msk.bf16.vlgmr.msra.gmra.mxu1 %vm1031_vm4, %v1260_v12  ;;  %v3208_v12 = vor.u32 %v3666_v9, %v3205_v11 }
 0x5c8   : > { %v1258_v13 = vpop.f32.mrf.mxu0 }
 0x5c9   : > { %v3195_v13 = vld [vmem:[#allocation16] sm:$0xf] }
 0x62b   : > { %v1343_v15 = vpop.f32.mrf.mxu3 }
 0x62c   : > { %v1347_v17 = vpack.c.bf16 %v1343_v15, %v1343_v15  ;;  %v3664_v15 = vld [vmem:[#allocation16 + $0x4] sm:$0xf] }
 0x62e   : > { %3192 = vmatmul.msk.bf16.vlgmr.msra.gmra.mxu0 %vm1031_vm4, %v1347_v17  ;;  %v3196_v17 = vor.u32 %v3665_v14, %v3195_v13 }
 0x630   : > { %v1171_v18 = vpop.f32.mrf.mxu1 }
 0x631   : > { %v1200_v22 = vadd.f32 %v4801_v28, %v1171_v18  ;;  %v3256_v28 = vor.u32 %v3678_v35, %v3253_v38  ;;  %v3197_v18 = vld [vmem:[#allocation16 + $0x8] sm:$0xf0]  ;;  %v3938_v35 = vld [vmem:[#allocation14] ss:$0 sm:$0xff] }
 0x633   : > { %v1345_v20 = vpop.f32.mrf.mxu3  ;;  %1529 = vmatpush.bf16.msrb.mxu2 %v3256_v28 }
 0x634   : > { %v3200_v20 = vor.u32 %v3664_v15, %v3197_v18  ;;  %v3939_v18 = vld [vmem:[%s5002_s12] ss:$0 sm:$0xff] }
 0x637   : > { %1530 = vmatpush.bf16.msrb.mxu2 %v3248_v46  ;;  %v3691_v46 = vld [vmem:[#allocation17 + $0x58] sm:$0xff] }
 0x638   : > { %v1173_v21 = vpop.f32.mrf.mxu1 }
 0x639   : > { %v3687_v21 = vld [vmem:[#allocation17 + $0x38] sm:$0xff] }
 0x63a   : > { %1694 = vmatpush.bf16.msra.mxu3 %v3687_v21 }
 0x63b   : > { %1531 = vmatpush.bf16.msrb.mxu2 %v3240_v53  ;;  %v3688_v53 = vld [vmem:[#allocation17 + $0x40] sm:$0xff] }
 0x63f   : > { %1532 = vmatpush.bf16.msrb.mxu2 %v3232_v59 }
 0x640   : > { %v1285_v23 = vpop.f32.mrf.mxu1 }
 0x641   : > { %v1289_v24 = vadd.f32 %v1285_v23, %v1200_v22 }
 0x643   : > { %1533 = vmatpush.bf16.msrb.mxu2 %v3224_v1 }
 0x647   : > { %1534 = vmatpush.bf16.msrb.mxu2 %v3216_v7 }
 0x648   : > { %v1287_v25 = vpop.f32.mrf.mxu1 }
 0x64b   : > { %1535 = vmatpush.bf16.msrb.mxu2 %v3208_v12 }
 0x64f   : > { %1536 = vmatpush.bf16.msrb.mxu2 %v3200_v20 }
 0x6ab   : > { %v1372_v27 = vpop.f32.mrf.mxu0 }
 0x6ac   : > { %v1376_v29 = vadd.f32 %v1372_v27, %v1289_v24 }
 0x6ae   : > { %v1381_v30 = vadd.f32 %v3936_v26, %v1376_v29 }
 0x6b0   : > { %v1382_v31 = vadd.f32 %v1381_v30, %v4773_v36  ;;  %v3243_v36 = vld [vmem:[#allocation16 + $0x60] sm:$0xf] }
 0x6b1   : > { %v3244_v45 = vor.u32 %v3677_v43, %v3243_v36  ;;  %v3694_v36 = vld [vmem:[#allocation17 + $0x70] sm:$0xff]  ;;  %v3684_v43 = vld [vmem:[#allocation17 + $0x20] sm:$0xff] }
 0x6b2   : > { %1385 = vadd.xlane.f32.xlu0 %v1382_v31 }
 0x6b3   : > { %v1374_v32 = vpop.f32.mrf.mxu0  ;;  %1517 = vmatpush.bf16.msrb.mxu1 %v3244_v45  ;;  %v3692_v45 = vld [vmem:[#allocation17 + $0x60] sm:$0xff] }
 0x6b4   : > { %v3937_v32 = vld [vmem:[#allocation13] ss:$0 sm:$0xff] }
 0x6b7   : > { %1518 = vmatpush.bf16.msrb.mxu1 %v3236_v50  ;;  %v3689_v50 = vld [vmem:[#allocation17 + $0x48] sm:$0xff] }
 0x6bb   : > { %1519 = vmatpush.bf16.msrb.mxu1 %v3228_v57 }
 0x6bf   : > { %1520 = vmatpush.bf16.msrb.mxu1 %v3220_v63 }
 0x6c3   : > { %1521 = vmatpush.bf16.msrb.mxu1 %v3212_v5 }
 0x6c7   : > { %1522 = vmatpush.bf16.msrb.mxu1 %v3204_v10 }
 0x6cb   : > { %1523 = vmatpush.bf16.msrb.mxu1 %v3196_v17 }
 0x725   : > { %v1386_v39 = vpop.xlane.xlu0 %1385 }
 0x726   : > { %v1387_v40 = vmul.f32 %v1386_v39, %v4764_v16  ;;  %v3686_v39 = vld [vmem:[#allocation17 + $0x30] sm:$0xff] }
 0x727   : > { %1695 = vmatpush.bf16.msra.mxu3 %v3686_v39 }
 0x728   : > { %v4828_v41 = vsub.f32 %v1382_v31, %v1387_v40  ;;  %v3695_v40 = vld [vmem:[#allocation17 + $0x78] sm:$0xff] }
 0x729   : > { %1707 = vmatpush.bf16.msrb.mxu0 %v3695_v40 }
 0x72a   : > { %v1389_v42 = vmul.f32 %v4828_v41, %v4828_v41 }
 0x72c   : > { %1390 = vadd.xlane.f32.xlu2 %v1389_v42  ;;  %v3685_v42 = vld [vmem:[#allocation17 + $0x28] sm:$0xff] }
 0x72d   : > { %1696 = vmatpush.bf16.msra.mxu3 %v3685_v42  ;;  %1708 = vmatpush.bf16.msrb.mxu0 %v3694_v36  ;;  %v3395_v42 = vld [vmem:[#allocation8 + $0x150] sm:$0xf]  ;;  %v3715_v36 = vld [vmem:[#allocation8 + $0x158] sm:$0xf0] }
 0x731   : > { %1697 = vmatpush.bf16.msra.mxu3 %v3684_v43  ;;  %v3714_v43 = vld [vmem:[#allocation8 + $0x154] sm:$0xf] }
 0x735   : > { %1698 = vmatpush.bf16.msra.mxu3 %v3683_v44  ;;  %v3397_v44 = vld [vmem:[#allocation8 + $0x15c] sm:$0xf0] }
 0x739   : > { %1699 = vmatpush.bf16.msra.mxu3 %v3682_v19  ;;  %v3716_v19 = vld [vmem:[#allocation8 + $0x160] sm:$0xf0] }
 0x73d   : > { %1700 = vmatpush.bf16.msra.mxu3 %v3681_v47 }
 0x741   : > { %1701 = vmatpush.bf16.msra.mxu3 %v3680_v49  ;;  %v3712_v49 = vld [vmem:[#allocation8 + $0x140] sm:$0xf0] }
 0x79f   : > { %v1391_v22 = vpop.xlane.xlu2 %1390 }
 0x7a0   : > { %v1392_v23 = vmul.f32 %v1391_v22, %v4764_v16 }
 0x7a2   : > { %v1393_v24 = vadd.f32 1e-07, %v1392_v23 }
 0x7a4   : > { %3969 = vrsqrt.f32 %v1393_v24  ;;  %vm1400_vm8 = vweird.f32 %v1393_v24 }
 0x7aa   : > { %v3970_v25 = vpop.eup %3969 }
 0x7ab   : > { %v1395_v26 = vmul.f32 %v3970_v25, %v1393_v24  ;;  %vm1401_vm7 = vweird.f32 %v3970_v25 }
 0x7ac   : > { %vm1402_vm9 = vmor %vm1400_vm8, %vm1401_vm7 }
 0x7ad   : > { %v1396_v27 = vmul.f32 %v3970_v25, %v1395_v26 }
 0x7af   : > { %v1397_v29 = vmul.f32 0.5, %v1396_v27  ;;  %v3407_v27 = vld [vmem:[#allocation8 + $0x168] sm:$0xf] }
 0x7b1   : > { %v1398_v30 = vsub.f32 1.5, %v1397_v29  ;;  %v3718_v29 = vld [vmem:[#allocation8 + $0x170] sm:$0xf0] }
 0x7b3   : > { %v1399_v31 = vmul.f32 %v3970_v25, %v1398_v30  ;;  %v3717_v30 = vld [vmem:[#allocation8 + $0x16c] sm:$0xf] }
 0x7b5   : > { %v1403_v33 = vsel %vm1402_vm9, %v3970_v25, %v1399_v31  ;;  %v3408_v31 = vor.u32 %v3718_v29, %v3407_v27  ;;  %v3343_v27 = vld [vmem:[#allocation8 + $0xe0] sm:$0xf]  ;;  %v3701_v29 = vld [vmem:[#allocation8 + $0xe8] sm:$0xf0] }
 0x7b6   : > { %v1404_v34 = vmul.f32 %v1403_v33, %v4828_v41  ;;  %v3693_v41 = vld [vmem:[#allocation17 + $0x68] sm:$0xff] }
 0x7b7   : > { %1709 = vmatpush.bf16.msrb.mxu0 %v3693_v41  ;;  %v3415_v33 = vld [vmem:[#allocation8 + $0x170] sm:$0xf]  ;;  %1922 = vmatpush.bf16.msra.mxu1 %v3408_v31  ;;  %v3396_v41 = vor.u32 %v3715_v36, %v3395_v42  ;;  %v3344_v31 = vor.u32 %v3701_v29, %v3343_v27 }
 0x7b8   : > { %v1408_v37 = vmul.f32 %v3937_v32, %v1404_v34  ;;  %v3409_v32 = vld [vmem:[#allocation8 + $0x174] sm:$0xf0]  ;;  %v3719_v34 = vld [vmem:[#allocation8 + $0x178] sm:$0xf0] }
 0x7ba   : > { %v4834_v38 = vadd.f32 %v3938_v35, %v1408_v37  ;;  %v3412_v35 = vor.u32 %v3717_v30, %v3409_v32  ;;  %v3416_v37 = vor.u32 %v3719_v34, %v3415_v33  ;;  %v3323_v32 = vld [vmem:[#allocation8 + $0xc0] sm:$0xf]  ;;  %v3697_v33 = vld [vmem:[#allocation8 + $0xc8] sm:$0xf0]  ;;  %v3696_v34 = vld [vmem:[#allocation8 + $0xc4] sm:$0xf] }
 0x7bb   : > { %1710 = vmatpush.bf16.msrb.mxu0 %v3692_v45  ;;  %v3403_v45 = vld [vmem:[#allocation8 + $0x158] sm:$0xf]  ;;  %1923 = vmatpush.bf16.msra.mxu1 %v3396_v41 }
 0x7bc   : > { %v1413_v28 = vpack.c.bf16 %v4834_v38, %v4834_v38  ;;  %1935 = vmatpush.bf16.msra.mxu2 %v3412_v35  ;;  %1948 = vmatpush.bf16.msrb.mxu3 %v3416_v37  ;;  %v3404_v47 = vor.u32 %v3716_v19, %v3403_v45  ;;  %v3324_v35 = vor.u32 %v3697_v33, %v3323_v32  ;;  %v3325_v37 = vld [vmem:[#allocation8 + $0xcc] sm:$0xf0] }
 0x7be   : > { %1524 = vmatmul.bf16.vlgmr.msrb.gmra.mxu1 %v1413_v28  ;;  %1537 = vmatmul.bf16.vlgmr.msrb.gmra.mxu2 %v1413_v28 }
 0x7bf   : > { %1711 = vmatpush.bf16.msrb.mxu0 %v3691_v46  ;;  %v3400_v46 = vor.u32 %v3714_v43, %v3397_v44 }
 0x7c0   : > { %1949 = vmatpush.bf16.msrb.mxu3 %v3404_v47 }
 0x7c1   : > { %1936 = vmatpush.bf16.msra.mxu2 %v3400_v46 }
 0x7c3   : > { %1712 = vmatpush.bf16.msrb.mxu0 %v3690_v48  ;;  %v3383_v48 = vld [vmem:[#allocation8 + $0x138] sm:$0xf] }
 0x7c4   : > { %v3384_v52 = vor.u32 %v3712_v49, %v3383_v48  ;;  %v3940_v49 = vld [vmem:[%s5056_s0] ss:$0 sm:$0xff] }
 0x7c6   : > { %1924 = vmatpush.bf16.msra.mxu1 %v3384_v52 }
 0x7c7   : > { %1713 = vmatpush.bf16.msrb.mxu0 %v3689_v50  ;;  %v3711_v50 = vld [vmem:[#allocation8 + $0x13c] sm:$0xf] }
 0x7cb   : > { %1714 = vmatpush.bf16.msrb.mxu0 %v3688_v53  ;;  %v3385_v53 = vld [vmem:[#allocation8 + $0x144] sm:$0xf0] }
 0x83b   : > { %v1525_v55 = vpop.f32.mrf.mxu1 }
 0x83c   : > { %v1526_v56 = vadd.f32 %v1525_v55, %v1432_v54  ;;  %v3391_v54 = vld [vmem:[#allocation8 + $0x140] sm:$0xf]  ;;  %v3713_v55 = vld [vmem:[#allocation8 + $0x148] sm:$0xf0] }
 0x83e   : > { %v1542_v57 = vmul.f32 %v1526_v56, %v1526_v56 }
 0x840   : > { %v1544_v59 = vmul.f32 %v1542_v57, %v1526_v56  ;;  %v3392_v57 = vor.u32 %v3713_v55, %v3391_v54 }
 0x841   : > { %v1538_v60 = vpop.f32.mrf.mxu2 }
 0x842   : > { %v1546_v61 = vmul.f32 0.044715, %v1544_v59  ;;  %v1539_v62 = vadd.f32 %v1538_v60, %v1433_v58  ;;  %1950 = vmatpush.bf16.msrb.mxu3 %v3392_v57  ;;  %v3371_v58 = vld [vmem:[#allocation8 + $0x120] sm:$0xf]  ;;  %v3709_v59 = vld [vmem:[#allocation8 + $0x128] sm:$0xf0] }
 0x843   : > { %v1527_v63 = vpop.f32.mrf.mxu1  ;;  %v3708_v60 = vld [vmem:[#allocation8 + $0x124] sm:$0xf] }
 0x844   : > { %v1548_v0 = vadd.f32 %v1546_v61, %v1526_v56  ;;  %v1543_v1 = vmul.f32 %v1539_v62, %v1539_v62  ;;  %v3372_v61 = vor.u32 %v3709_v59, %v3371_v58  ;;  %v3379_v63 = vld [vmem:[#allocation8 + $0x128] sm:$0xf]  ;;  %v1786_v57 = vld [vmem:[#allocation10 + $0x3] sm:$0x7] }
 0x845   : > { %v1788_v58 = vperm.slane %v1786_v57, 0 }
 0x846   : > { %v1550_v2 = vmul.f32 0.7978846, %v1548_v0  ;;  %v1545_v3 = vmul.f32 %v1543_v1, %v1539_v62  ;;  %v3710_v0 = vld [vmem:[#allocation8 + $0x130] sm:$0xf0]  ;;  %1925 = vmatpush.bf16.msra.mxu1 %v3372_v61 }
 0x848   : > { %3971 = vtanh.f32 %v1550_v2  ;;  %v1547_v4 = vmul.f32 0.044715, %v1545_v3  ;;  %v3380_v2 = vor.u32 %v3710_v0, %v3379_v63  ;;  %v3359_v3 = vld [vmem:[#allocation8 + $0x108] sm:$0xf] }
 0x849   : > { %v1540_v5 = vpop.f32.mrf.mxu2 }
 0x84a   : > { %v1549_v6 = vadd.f32 %v1547_v4, %v1539_v62  ;;  %1951 = vmatpush.bf16.msrb.mxu3 %v3380_v2  ;;  %v3706_v4 = vld [vmem:[#allocation8 + $0x110] sm:$0xf0]  ;;  %v3705_v5 = vld [vmem:[#allocation8 + $0x10c] sm:$0xf] }
 0x84c   : > { %v1551_v7 = vmul.f32 0.7978846, %v1549_v6  ;;  %v3360_v6 = vor.u32 %v3706_v4, %v3359_v3 }
 0x84e   : > { %v3972_v51 = vpop.eup %3971  ;;  %3973 = vtanh.f32 %v1551_v7  ;;  %v3361_v7 = vld [vmem:[#allocation8 + $0x114] sm:$0xf0]  ;;  %1926 = vmatpush.bf16.msra.mxu1 %v3360_v6 }
 0x84f   : > { %v1554_v8 = vadd.f32 1.0, %v3972_v51  ;;  %v3367_v51 = vld [vmem:[#allocation8 + $0x110] sm:$0xf] }
 0x851   : > { %v1556_v9 = vmul.f32 0.5, %v1554_v8  ;;  %v3707_v8 = vld [vmem:[#allocation8 + $0x118] sm:$0xf0] }
 0x853   : > { %v1558_v10 = vmul.f32 %v1556_v9, %v1526_v56  ;;  %v3388_v56 = vor.u32 %v3711_v50, %v3385_v53  ;;  %v3364_v9 = vor.u32 %v3705_v5, %v3361_v7  ;;  %v3941_v53 = vld [vmem:[%s5057_s20] ss:$0 sm:$0xff] }
 0x854   : > { %v3974_v11 = vpop.eup %3973 }
 0x855   : > { %v1560_v12 = vpack.c.bf16 %v1558_v10, %v1558_v10  ;;  %v1555_v13 = vadd.f32 1.0, %v3974_v11  ;;  %1937 = vmatpush.bf16.msra.mxu2 %v3388_v56  ;;  %v3368_v10 = vor.u32 %v3707_v8, %v3367_v51  ;;  %v3347_v11 = vld [vmem:[#allocation8 + $0xf0] sm:$0xf] }
 0x857   : > { %1702 = vmatmul.bf16.vlgmr.msra.gmra.mxu3 %v1560_v12  ;;  %v1557_v14 = vmul.f32 0.5, %v1555_v13  ;;  %v3703_v12 = vld [vmem:[#allocation8 + $0xf8] sm:$0xf0]  ;;  %v3702_v13 = vld [vmem:[#allocation8 + $0xf4] sm:$0xf] }
 0x858   : > { %1952 = vmatpush.bf16.msrb.mxu3 %v3368_v10 }
 0x859   : > { %v1559_v15 = vmul.f32 %v1557_v14, %v1539_v62  ;;  %v3373_v62 = vld [vmem:[#allocation8 + $0x12c] sm:$0xf0]  ;;  %v3348_v14 = vor.u32 %v3703_v12, %v3347_v11 }
 0x85a   : > { %v3376_v1 = vor.u32 %v3708_v60, %v3373_v62  ;;  %v1789_v62 = vperm.slane %v1786_v57, 1 }
 0x85b   : > { %v1561_v17 = vpack.c.bf16 %v1559_v15, %v1559_v15  ;;  %v3349_v15 = vld [vmem:[#allocation8 + $0xfc] sm:$0xf0]  ;;  %1927 = vmatpush.bf16.msra.mxu1 %v3348_v14 }
 0x85c   : > { %1938 = vmatpush.bf16.msra.mxu2 %v3376_v1 }
 0x85d   : > { %1715 = vmatmul.bf16.vlgmr.msrb.gmra.mxu0 %v1561_v17  ;;  %v3355_v17 = vld [vmem:[#allocation8 + $0xf8] sm:$0xf] }
 0x860   : > { %1939 = vmatpush.bf16.msra.mxu2 %v3364_v9 }
 0x8da   : > { %v1703_v20 = vpop.f32.mrf.mxu3  ;;  %v1716_v21 = vpop.f32.mrf.mxu0 }
 0x8db   : > { %v1704_v22 = vadd.f32 %v3939_v18, %v1703_v20  ;;  %v3704_v18 = vld [vmem:[#allocation8 + $0x100] sm:$0xf0]  ;;  %v3352_v20 = vor.u32 %v3702_v13, %v3349_v15 }
 0x8dd   : > { %v1717_v23 = vadd.f32 %v1716_v21, %v1704_v22  ;;  %v3356_v21 = vor.u32 %v3704_v18, %v3355_v17  ;;  %1940 = vmatpush.bf16.msra.mxu2 %v3352_v20  ;;  %v3335_v22 = vld [vmem:[#allocation8 + $0xd8] sm:$0xf] }
 0x8df   : > { %v1720_v24 = vadd.f32 %v1717_v23, %v4834_v38  ;;  %1953 = vmatpush.bf16.msrb.mxu3 %v3356_v21  ;;  %v3700_v23 = vld [vmem:[#allocation8 + $0xe0] sm:$0xf0] }
 0x8e1   : > { %1723 = vadd.xlane.f32.xlu1 %v1720_v24 }
 0x8e2   : > { %v1705_v25 = vpop.f32.mrf.mxu3  ;;  %v1718_v26 = vpop.f32.mrf.mxu0 }
 0x8e3   : > { %v3336_v25 = vor.u32 %v3700_v23, %v3335_v22  ;;  %v3337_v26 = vld [vmem:[#allocation8 + $0xe4] sm:$0xf0]  ;;  %1954 = vmatpush.bf16.msrb.mxu3 %v3344_v31  ;;  %v3721_v23 = vld [vmem:[#allocation11 + $0x48] sm:$0xff] }
 0x8e5   : > { %1928 = vmatpush.bf16.msra.mxu1 %v3336_v25 }
 0x8e9   : > { %1929 = vmatpush.bf16.msra.mxu1 %v3324_v35 }
 0x954   : > { %v1724_v28 = vpop.xlane.xlu1 %1723 }
 0x955   : > { %v1725_v39 = vmul.f32 %v1724_v28, %v4764_v16  ;;  %v3331_v28 = vld [vmem:[#allocation8 + $0xc8] sm:$0xf] }
 0x957   : > { %v4846_v40 = vsub.f32 %v1720_v24, %v1725_v39  ;;  %v3699_v24 = vld [vmem:[#allocation8 + $0xdc] sm:$0xf]  ;;  %v3698_v39 = vld [vmem:[#allocation8 + $0xd0] sm:$0xf0] }
 0x958   : > { %v3340_v30 = vor.u32 %v3699_v24, %v3337_v26  ;;  %v3332_v42 = vor.u32 %v3698_v39, %v3331_v28  ;;  %v3720_v24 = vld [vmem:[#allocation11 + $0x40] sm:$0xff] }
 0x959   : > { %v1727_v38 = vmul.f32 %v4846_v40, %v4846_v40 }
 0x95a   : > { %1941 = vmatpush.bf16.msra.mxu2 %v3340_v30  ;;  %1955 = vmatpush.bf16.msrb.mxu3 %v3332_v42 }
 0x95b   : > { %1728 = vadd.xlane.f32.xlu0 %v1727_v38  ;;  %v3328_v38 = vor.u32 %v3696_v34, %v3325_v37 }
 0x95e   : > { %1942 = vmatpush.bf16.msra.mxu2 %v3328_v38 }
 0x9ce   : > { %v1729_v36 = vpop.xlane.xlu0 %1728 }
 0x9cf   : > { %v1730_v43 = vmul.f32 %v1729_v36, %v4764_v16 }
 0x9d1   : > { %v1731_v41 = vadd.f32 1e-07, %v1730_v43 }
 0x9d3   : > { %3975 = vrsqrt.f32 %v1731_v41  ;;  %vm1738_vm11 = vweird.f32 %v1731_v41 }
 0x9d9   : > { %v3976_v44 = vpop.eup %3975 }
 0x9da   : > { %v1733_v45 = vmul.f32 %v3976_v44, %v1731_v41  ;;  %vm1739_vm10 = vweird.f32 %v3976_v44 }
 0x9db   : > { %vm1740_vm12 = vmor %vm1738_vm11, %vm1739_vm10 }
 0x9dc   : > { %v1734_v19 = vmul.f32 %v3976_v44, %v1733_v45 }
 0x9de   : > { %v1735_v46 = vmul.f32 0.5, %v1734_v19 }
 0x9e0   : > { %v1736_v47 = vsub.f32 1.5, %v1735_v46 }
 0x9e2   : > { %v1737_v48 = vmul.f32 %v3976_v44, %v1736_v47 }
 0x9e4   : > { %v1741_v50 = vsel %vm1740_vm12, %v3976_v44, %v1737_v48 }
 0x9e5   : > { %v1742_v52 = vmul.f32 %v1741_v50, %v4846_v40  ;;  %v1790_v40 = vperm.slane %v1786_v57, 2 }
 0x9e7   : > { %v1746_v54 = vmul.f32 %v3940_v49, %v1742_v52 }
 0x9e9   : > { %v4858_v55 = vadd.f32 %v3941_v53, %v1746_v54 }
 0x9eb   : > { %v1751_v56 = vpack.c.bf16 %v4858_v55, %v4858_v55 }
 0x9ed   : > { %1930 = vmatmul.bf16.vlgmr.msra.gmra.mxu1 %v1751_v56  ;;  %1943 = vmatmul.bf16.vlgmr.msra.gmra.mxu2 %v1751_v56 }
 0x9ee   : > { %1956 = vmatmul.bf16.vlgmr.msrb.gmra.mxu3 %v1751_v56 }
 0xa6a   : > { %v1931_v59 = vpop.f32.mrf.mxu1 }
 0xa6b   : > { %v1932_v60 = vadd.f32 %v1931_v59, %v1788_v58 }
 0xa6d   : > { %v1978_v61 = vpack.c.bf16 %v1932_v60, %v1932_v60 }
 0xa6f   : > { %2034 = vrot.lane.b32.xlu1 %v1978_v61, %s4473_s13 }
 0xa70   : > { %v1944_v63 = vpop.f32.mrf.mxu2 }
 0xa71   : > { %v1945_v0 = vadd.f32 %v1944_v63, %v1789_v62  ;;  %v1957_v1 = vpop.f32.mrf.mxu3 }
 0xa72   : > { %v1958_v2 = vadd.f32 %v1957_v1, %v1790_v40  ;;  %v1933_v3 = vpop.f32.mrf.mxu1 }
 0xa73   : > { %v1979_v4 = vpack.c.bf16 %v1945_v0, %v1945_v0 }
 0xa74   : > { %v4863_v5 = vpack.c.bf16 %v1958_v2, %v1958_v2 }
 0xa75   : > { %v1985_v6 = vsel %vm1031_vm4, %v1979_v4, 0 }
 0xa76   : > { %1994 = vmatpush.bf16.xpose.msra.mxu0 %v1985_v6  ;;  %v2017_v7 = vsel %vm1068_vm5, %v4863_v5, 0 }
 0xa77   : > { %2239 = vrot.lane.b32.xlu1 %v1979_v4, %s4472_s22 }
 0xa78   : > { %v1946_v51 = vpop.f32.mrf.mxu2 }
 0xa79   : > { %v1959_v8 = vpop.f32.mrf.mxu3  ;;  %v3723_v51 = vld [vmem:[#allocation11 + $0x58] sm:$0xff] }
 0xa7a   : > { %2115 = vmatpush.bf16.msra.mxu3 %v3723_v51  ;;  %v3722_v8 = vld [vmem:[#allocation11 + $0x50] sm:$0xff] }
 0xa7d   : > { %3417 = vmatmul.msk.bf16.vlgmr.msra.gmra.mxu0 %vm1031_vm4, %v1978_v61 }
 0xa7e   : > { %2026 = vmatpush.bf16.msrb.mxu0 %v2017_v7  ;;  %2116 = vmatpush.bf16.msra.mxu3 %v3722_v8  ;;  %v3497_v8 = vld [vmem:[#allocation16 + $0xc0] sm:$0xf] }
 0xa82   : > { %2143 = vmatpush.bf16.msra.mxu0 %v3721_v23  ;;  %v3725_v23 = vld [vmem:[#allocation11 + $0x68] sm:$0xff] }
 0xa83   : > { %2229 = vmatpush.bf16.msrb.mxu3 %v3725_v23  ;;  %v3733_v23 = vld [vmem:[#allocation16 + $0xa4] sm:$0xf0] }
 0xa86   : > { %2144 = vmatpush.bf16.msra.mxu0 %v3720_v24  ;;  %v3724_v24 = vld [vmem:[#allocation11 + $0x60] sm:$0xff] }
 0xa87   : > { %2230 = vmatpush.bf16.msrb.mxu3 %v3724_v24  ;;  %v3732_v24 = vld [vmem:[#allocation16 + $0xa4] sm:$0xf] }
 0xae1   : > { %v2035_v22 = vpop.permute.xlu1 %2034 }
 0xae9   : > { %v2240_v30 = vpop.permute.xlu1 %2239 }
 0xaea   : > { %v2245_v33 = vsel %vm1031_vm4, %v2240_v30, 0 }
 0xafa   : > { %v1996_v9 = vpop.f32.mrf.mxu0 }
 0xafb   : > { %v2000_v10 = vmul.f32 0.17677669, %v1996_v9 }
 0xafd   : > { %v2001_v11 = vsel %vm1052_vm6, %v2000_v10, -inf }
 0xafe   : > { %2002 = vmax.xlane.f32.xlu0 %v2001_v11 }
 0xb02   : > { %v1998_v12 = vpop.f32.mrf.mxu0 }
 0xb12   : > { %2037 = vrot.lane.b32.xlu0 %v1979_v4, %s4473_s13 }
 0xb1a   : > { %2150 = vrot.lane.b32.xlu0 %v1978_v61, %s4474_s25 }
 0xb22   : > { %2237 = vrot.lane.b32.xlu0 %v1978_v61, %s4472_s22 }
 0xb71   : > { %v2003_v13 = vpop.xlane.xlu0 %2002 }
 0xb72   : > { %v2004_v14 = vsub.f32 %v2000_v10, %v2003_v13 }
 0xb74   : > { %v2005_v15 = vmul.f32 1.442695, %v2004_v14 }
 0xb76   : > { %3977 = vpow2.f32 %v2005_v15 }
 0xb7c   : > { %v3978_v17 = vpop.eup %3977 }
 0xb7d   : > { %v2007_v18 = vsel %vm1052_vm6, %v3978_v17, 0.0 }
 0xb7e   : > { %2008 = vadd.xlane.f32.xlu2 %v2007_v18 }
 0xb84   : > { %v2038_v20 = vpop.permute.xlu0 %2037 }
 0xb85   : > { %v2043_v21 = vsel %vm1031_vm4, %v2038_v20, 0 }
 0xb86   : > { %2052 = vmatpush.bf16.xpose.msrb.mxu1 %v2043_v21 }
 0xb8c   : > { %v2151_v34 = vpop.permute.xlu0 %2150 }
 0xb8d   : > { %3419 = vmatmul.msk.bf16.vlgmr.msrb.gmra.mxu1 %vm1031_vm4, %v2035_v22 }
 0xb94   : > { %v2238_v49 = vpop.permute.xlu0 %2237 }
 0xb96   : > { %2152 = vrot.lane.b32.xlu2 %v1979_v4, %s4474_s25 }
 0xbf1   : > { %v2009_v25 = vpop.xlane.xlu2 %2008 }
 0xbf2   : > { %3979 = vrcp.f32 %v2009_v25  ;;  %v3727_v25 = vld [vmem:[#allocation11 + $0x78] sm:$0xff] }
 0xbf8   : > { %v3980_v26 = vpop.eup %3979 }
 0xbf9   : > { %v2011_v27 = vmul.f32 %v3980_v26, %v3978_v17  ;;  %v2153_v29 = vpop.permute.xlu2 %2152 }
 0xbfa   : > { %v2158_v31 = vsel %vm1031_vm4, %v2153_v29, 0 }
 0xbfb   : > { %v2012_v32 = vpack.c.bf16 %v2011_v27, %v2011_v27  ;;  %2167 = vmatpush.bf16.xpose.msra.mxu1 %v2158_v31 }
 0xbfd   : > { %3418 = vmatmul.msk.bf16.vlgmr.msrb.gmra.mxu0 %vm1052_vm6, %v2012_v32 }
 0xbfe   : > { %2254 = vmatpush.bf16.xpose.msrb.mxu0 %v2245_v33 }
 0xc02   : > { %3439 = vmatmul.msk.bf16.vlgmr.msra.gmra.mxu1 %vm1031_vm4, %v2151_v34 }
 0xc0a   : > { %v2054_v35 = vpop.f32.mrf.mxu1 }
 0xc0b   : > { %v2058_v37 = vmul.f32 0.17677669, %v2054_v35 }
 0xc0d   : > { %v2059_v28 = vsel %vm1052_vm6, %v2058_v37, -inf }
 0xc0e   : > { %2060 = vmax.xlane.f32.xlu2 %v2059_v28  ;;  %v3726_v28 = vld [vmem:[#allocation11 + $0x70] sm:$0xff] }
 0xc12   : > { %v2056_v39 = vpop.f32.mrf.mxu1 }
 0xc7a   : > { %v2028_v38 = vpop.f32.mrf.mxu0 }
 0xc7b   : > { %v2032_v42 = vpack.c.bf16 %v2028_v38, %v2028_v38 }
 0xc7d   : > { %3438 = vmatmul.msk.bf16.vlgmr.msra.gmra.mxu0 %vm1031_vm4, %v2032_v42 }
 0xc7f   : > { %v2169_v36 = vpop.f32.mrf.mxu1 }
 0xc80   : > { %v2173_v43 = vmul.f32 0.17677669, %v2169_v36 }
 0xc81   : > { %v2061_v41 = vpop.xlane.xlu2 %2060 }
 0xc82   : > { %v2062_v44 = vsub.f32 %v2058_v37, %v2061_v41  ;;  %v2030_v45 = vpop.f32.mrf.mxu0  ;;  %v2174_v19 = vsel %vm1052_vm6, %v2173_v43, -inf }
 0xc83   : > { %2175 = vmax.xlane.f32.xlu1 %v2174_v19  ;;  %v3942_v45 = vld [vmem:[%s5054_s6 + $0x1] ss:$0 sm:$0xff] }
 0xc84   : > { %v2063_v46 = vmul.f32 1.442695, %v2062_v44 }
 0xc86   : > { %3981 = vpow2.f32 %v2063_v46 }
 0xc87   : > { %v2171_v47 = vpop.f32.mrf.mxu1 }
 0xc8c   : > { %v3982_v48 = vpop.eup %3981 }
 0xc8d   : > { %3450 = vmatmul.msk.bf16.vlgmr.msrb.gmra.mxu0 %vm1031_vm4, %v2238_v49  ;;  %v2065_v50 = vsel %vm1052_vm6, %v3982_v48, 0.0 }
 0xc8e   : > { %2066 = vadd.xlane.f32.xlu2 %v2065_v50  ;;  %v3521_v50 = vld [vmem:[#allocation16 + $0xf0] sm:$0xf] }
 0xc9c   : > { %2072 = vrot.lane.b32.xlu1 %v4863_v5, %s4473_s13 }
 0xca6   : > { %2186 = vrot.lane.b32.xlu2 %v4863_v5, %s4474_s25  ;;  %s5058_s25 = sld [smem:[#allocation46_spill]] }
 0xcac   : > { %s2807_s26 = scalar_lea.hbm %s5058_s25, %s3628_s7  ;;  %s4351_s21 = scalar_lea.hbm %s5058_s25, 16 }
 0xcad   : > { %s2811_s2 = sshll.u32 %s2807_s26, 4  ;;  %s2812_s2 = int_to_ptr.hbm [resolvable:$true] %s2811_s2 }
 0xcae   : > { %s4345_s14 = sshra.s32 %s2812_s2, 4  ;;  %s4346_s14 = int_to_ptr.hbm [resolvable:$true] %s4345_s14 }
 0xcaf   : > { %s4347_s19 = scalar_lea.hbm %s4346_s14, 8  ;;  %p4352_p12 = scmp.lt.s32.totalorder %s4346_s14, %s5058_s25 }
 0xcb0   : > { %p4348_p1 = scmp.ne.s32.totalorder %s4346_s14, %s4347_s19  ;;  %p4353_p7 = scmp.lt.s32.totalorder %s4351_s21, %s4347_s19 }
 0xcb2   : > { %p4349_p3 = pnand %p4348_p1, %p4702_p5  ;;  %p4354_p8 = por %p4353_p7, %p4352_p12 }
 0xcb4   : > { %p4350_p4 = pneg %p4349_p3 }
 0xcb6   : > { %p4355_p9 = pnand %p4354_p8, %p4350_p4 }
 0xcf6   : > { %v2176_v53 = vpop.xlane.xlu1 %2175 }
 0xcf7   : > { %v2177_v57 = vsub.f32 %v2173_v43, %v2176_v53  ;;  %v3743_v53 = vld [vmem:[#allocation16 + $0xf4] sm:$0xf0] }
 0xcf9   : > { %v2178_v58 = vmul.f32 1.442695, %v2177_v57 }
 0xcfa   : > { %v4891_v52 = vpop.f32.mrf.mxu0 }
 0xd01   : > { %v2067_v54 = vpop.xlane.xlu2 %2066 }
 0xd02   : > { %v2148_v56 = vpop.f32.mrf.mxu0  ;;  %3983 = vrcp.f32 %v2067_v54  ;;  %v3742_v54 = vld [vmem:[#allocation16 + $0xf4] sm:$0xf] }
 0xd03   : > { %3985 = vpow2.f32 %v2178_v58  ;;  %v3522_v56 = vor.u32 %v3743_v53, %v3521_v50 }
 0xd08   : > { %v3984_v59 = vpop.eup %3983 }
 0xd09   : > { %v2069_v62 = vmul.f32 %v3984_v59, %v3982_v48  ;;  %v2187_v40 = vpop.permute.xlu2 %2186  ;;  %v3986_v4 = vpop.eup %3985 }
 0xd0a   : > { %v2256_v60 = vpop.f32.mrf.mxu0  ;;  %v2192_v2 = vsel %vm1068_vm5, %v2187_v40, 0  ;;  %v2180_v7 = vsel %vm1052_vm6, %v3986_v4, 0.0  ;;  %v3740_v40 = vld [vmem:[#allocation16 + $0xe4] sm:$0xf] }
 0xd0b   : > { %v2260_v61 = vmul.f32 0.17677669, %v2256_v60  ;;  %v2070_v3 = vpack.c.bf16 %v2069_v62, %v2069_v62  ;;  %v3741_v62 = vld [vmem:[#allocation16 + $0xe4] sm:$0xf0] }
 0xd0d   : > { %v2261_v63 = vsel %vm1052_vm6, %v2260_v61, -inf }
 0xd0e   : > { %v2073_v0 = vpop.permute.xlu1 %2072  ;;  %2262 = vmax.xlane.f32.xlu0 %v2261_v63 }
 0xd0f   : > { %v2078_v1 = vsel %vm1068_vm5, %v2073_v0, 0  ;;  %v3515_v0 = vld [vmem:[#allocation16 + $0xe8] sm:$0xf0] }
 0xd10   : > { %2087 = vmatpush.bf16.msrb.mxu2 %v2078_v1  ;;  %v3518_v1 = vor.u32 %v3740_v40, %v3515_v0  ;;  %v3755_v40 = vld [vmem:[#allocation17 + $0xd8] sm:$0xff]  ;;  %v3754_v0 = vld [vmem:[#allocation17 + $0xd0] sm:$0xff] }
 0xd12   : > { %v2258_v6 = vpop.f32.mrf.mxu0 }
 0xd13   : > { %3420 = vmatmul.msk.bf16.vlgmr.msrb.gmra.mxu2 %vm1052_vm6, %v2070_v3  ;;  %v3739_v3 = vld [vmem:[#allocation16 + $0xd4] sm:$0xf0] }
 0xd14   : > { %2201 = vmatpush.bf16.msra.mxu2 %v2192_v2  ;;  %v3505_v2 = vld [vmem:[#allocation16 + $0xd0] sm:$0xf] }
 0xd15   : > { %v3506_v6 = vor.u32 %v3739_v3, %v3505_v2  ;;  %v3753_v2 = vld [vmem:[#allocation17 + $0xc8] sm:$0xff]  ;;  %v3746_v3 = vld [vmem:[#allocation17 + $0x90] sm:$0xff] }
 0xd16   : > { %2181 = vadd.xlane.f32.xlu0 %v2180_v7  ;;  %v3507_v7 = vld [vmem:[#allocation16 + $0xd8] sm:$0xf0] }
 0xd18   : > { %2316 = vmatpush.bf16.msrb.mxu2 %v3727_v25 }
 0xd1c   : > { %2317 = vmatpush.bf16.msrb.mxu2 %v3726_v28  ;;  %v3467_v28 = vld [vmem:[#allocation16 + $0x88] sm:$0xf0] }
 0xd81   : > { %v2263_v9 = vpop.xlane.xlu0 %2262 }
 0xd82   : > { %v2264_v10 = vsub.f32 %v2260_v61, %v2263_v9  ;;  %v3737_v9 = vld [vmem:[#allocation16 + $0xc4] sm:$0xf0] }
 0xd84   : > { %v2265_v11 = vmul.f32 1.442695, %v2264_v10  ;;  %v3736_v10 = vld [vmem:[#allocation16 + $0xc4] sm:$0xf] }
 0xd86   : > { %3987 = vpow2.f32 %v2265_v11  ;;  %v3498_v11 = vor.u32 %v3737_v9, %v3497_v8 }
 0xd89   : > { %v2182_v12 = vpop.xlane.xlu0 %2181 }
 0xd8a   : > { %3989 = vrcp.f32 %v2182_v12  ;;  %v3499_v12 = vld [vmem:[#allocation16 + $0xc8] sm:$0xf0] }
 0xd8c   : > { %v3988_v13 = vpop.eup %3987 }
 0xd8d   : > { %v2267_v14 = vsel %vm1052_vm6, %v3988_v13, 0.0 }
 0xd8e   : > { %2268 = vadd.xlane.f32.xlu0 %v2267_v14  ;;  %v3489_v14 = vld [vmem:[#allocation16 + $0xb0] sm:$0xf] }
 0xd90   : > { %v3990_v15 = vpop.eup %3989 }
 0xd91   : > { %v2184_v17 = vmul.f32 %v3990_v15, %v3986_v4  ;;  %v3738_v4 = vld [vmem:[#allocation16 + $0xd4] sm:$0xf]  ;;  %v3735_v15 = vld [vmem:[#allocation16 + $0xb4] sm:$0xf0] }
 0xd92   : > { %v3510_v51 = vor.u32 %v3738_v4, %v3507_v7  ;;  %v3752_v4 = vld [vmem:[#allocation17 + $0xc0] sm:$0xff] }
 0xd93   : > { %v2185_v18 = vpack.c.bf16 %v2184_v17, %v2184_v17  ;;  %v3734_v17 = vld [vmem:[#allocation16 + $0xb4] sm:$0xf]  ;;  %v3462_v7 = vld [vmem:[%s5055_s10 + $0x2] sm:$0x3] }
 0xd94   : > { %v2385_v8 = vperm.slane %v3462_v7, 1 }
 0xd95   : > { %3440 = vmatmul.msk.bf16.vlgmr.msra.gmra.mxu2 %vm1052_vm6, %v2185_v18  ;;  %v3490_v18 = vor.u32 %v3735_v15, %v3489_v14 }
 0xd96   : > { %v2089_v20 = vpop.f32.mrf.mxu2 }
 0xd97   : > { %v2093_v21 = vpack.c.bf16 %v2089_v20, %v2089_v20  ;;  %v3491_v20 = vld [vmem:[#allocation16 + $0xb8] sm:$0xf0] }
 0xd99   : > { %3429 = vmatmul.msk.bf16.vlgmr.msra.gmra.mxu3 %vm1031_vm4, %v2093_v21  ;;  %v3494_v21 = vor.u32 %v3734_v17, %v3491_v20 }
 0xd9a   : > { %2468 = vmatpush.bf16.msra.mxu3 %v3522_v56 }
 0xd9e   : > { %v2091_v22 = vpop.f32.mrf.mxu2 }
 0xd9f   : > { %v3481_v22 = vld [vmem:[#allocation16 + $0xa0] sm:$0xf] }
 0xda0   : > { %v3482_v25 = vor.u32 %v3733_v23, %v3481_v22 }
 0xda2   : > { %2273 = vrot.lane.b32.xlu0 %v4863_v5, %s4472_s22 }
 0xe01   : > { %v2269_v26 = vpop.xlane.xlu0 %2268 }
 0xe02   : > { %3991 = vrcp.f32 %v2269_v26  ;;  %v3483_v26 = vld [vmem:[#allocation16 + $0xa8] sm:$0xf0] }
 0xe08   : > { %v3992_v27 = vpop.eup %3991 }
 0xe09   : > { %v2271_v29 = vmul.f32 %v3992_v27, %v3988_v13  ;;  %v3502_v13 = vor.u32 %v3736_v10, %v3499_v12  ;;  %v3486_v27 = vor.u32 %v3732_v24, %v3483_v26  ;;  %v2384_v12 = vperm.slane %v3462_v7, 0 }
 0xe0b   : > { %v2272_v32 = vpack.c.bf16 %v2271_v29, %v2271_v29  ;;  %v3473_v29 = vld [vmem:[#allocation16 + $0x90] sm:$0xf] }
 0xe14   : > { %v2274_v30 = vpop.permute.xlu0 %2273 }
 0xe15   : > { %v2279_v31 = vsel %vm1068_vm5, %v2274_v30, 0  ;;  %v3731_v30 = vld [vmem:[#allocation16 + $0x94] sm:$0xf0] }
 0xe16   : > { %2288 = vmatpush.bf16.msrb.mxu1 %v2279_v31  ;;  %v3730_v31 = vld [vmem:[#allocation16 + $0x94] sm:$0xf] }
 0xe18   : > { %v2203_v33 = vpop.f32.mrf.mxu2 }
 0xe19   : > { %v2207_v34 = vpack.c.bf16 %v2203_v33, %v2203_v33  ;;  %3451 = vmatmul.msk.bf16.vlgmr.msrb.gmra.mxu1 %vm1052_vm6, %v2272_v32  ;;  %v3474_v32 = vor.u32 %v3731_v30, %v3473_v29  ;;  %v3475_v33 = vld [vmem:[#allocation16 + $0x98] sm:$0xf0] }
 0xe1b   : > { %3449 = vmatmul.msk.bf16.vlgmr.msrb.gmra.mxu3 %vm1031_vm4, %v2207_v34  ;;  %v3465_v34 = vld [vmem:[#allocation16 + $0x80] sm:$0xf] }
 0xe1c   : > { %v2118_v5 = vpop.f32.mrf.mxu3 }
 0xe1d   : > { %v2147_v42 = vadd.f32 %v4891_v52, %v2118_v5  ;;  %v3523_v52 = vld [vmem:[#allocation16 + $0xf8] sm:$0xf0]  ;;  %v3729_v5 = vld [vmem:[#allocation16 + $0x84] sm:$0xf0] }
 0xe1e   : > { %v3526_v57 = vor.u32 %v3742_v54, %v3523_v52  ;;  %v3944_v54 = vld [vmem:[#allocation14 + $0x1] ss:$0 sm:$0xff] }
 0xe20   : > { %v2205_v35 = vpop.f32.mrf.mxu2  ;;  %2481 = vmatpush.bf16.msra.mxu0 %v3526_v57 }
 0xe21   : > { %v3478_v35 = vor.u32 %v3730_v31, %v3475_v33 }
 0xe24   : > { %v2120_v37 = vpop.f32.mrf.mxu3  ;;  %2482 = vmatpush.bf16.msra.mxu0 %v3518_v1  ;;  %v3747_v1 = vld [vmem:[#allocation17 + $0x98] sm:$0xff] }
 0xe25   : > { %v3728_v37 = vld [vmem:[#allocation16 + $0x84] sm:$0xf] }
 0xe28   : > { %2483 = vmatpush.bf16.msra.mxu0 %v3510_v51  ;;  %v3744_v51 = vld [vmem:[#allocation17 + $0x80] sm:$0xff] }
 0xe2c   : > { %2484 = vmatpush.bf16.msra.mxu0 %v3502_v13 }
 0xe30   : > { %2485 = vmatpush.bf16.msra.mxu0 %v3494_v21 }
 0xe34   : > { %2486 = vmatpush.bf16.msra.mxu0 %v3486_v27 }
 0xe38   : > { %2487 = vmatpush.bf16.msra.mxu0 %v3478_v35 }
 0xe96   : > { %v2290_v39 = vpop.f32.mrf.mxu1 }
 0xe97   : > { %v2294_v38 = vpack.c.bf16 %v2290_v39, %v2290_v39  ;;  %v3466_v39 = vor.u32 %v3729_v5, %v3465_v34 }
 0xe99   : > { %3460 = vmatmul.msk.bf16.vlgmr.msrb.gmra.mxu2 %vm1031_vm4, %v2294_v38  ;;  %v3470_v38 = vor.u32 %v3728_v37, %v3467_v28 }
 0xe9b   : > { %2488 = vmatpush.bf16.msra.mxu0 %v3470_v38 }
 0xe9e   : > { %v2232_v36 = vpop.f32.mrf.mxu3  ;;  %v2292_v43 = vpop.f32.mrf.mxu1 }
 0xe9f   : > { %v2236_v41 = vadd.f32 %v2232_v36, %v2147_v42  ;;  %v3759_v42 = vld [vmem:[#allocation17 + $0xf8] sm:$0xff] }
 0xea0   : > { %2661 = vmatpush.bf16.msra.mxu2 %v3759_v42 }
 0xea6   : > { %v2234_v44 = vpop.f32.mrf.mxu3 }
 0xf1c   : > { %v2319_v19 = vpop.f32.mrf.mxu2 }
 0xf1d   : > { %v2323_v46 = vadd.f32 %v2319_v19, %v2236_v41 }
 0xf1f   : > { %v2329_v47 = vadd.f32 %v3942_v45, %v2323_v46 }
 0xf21   : > { %v2330_v48 = vadd.f32 %v2329_v47, %v4858_v55  ;;  %v3513_v55 = vld [vmem:[#allocation16 + $0xe0] sm:$0xf] }
 0xf22   : > { %v3514_v63 = vor.u32 %v3741_v62, %v3513_v55  ;;  %v3750_v55 = vld [vmem:[#allocation17 + $0xb0] sm:$0xff]  ;;  %v3756_v62 = vld [vmem:[#allocation17 + $0xe0] sm:$0xff] }
 0xf23   : > { %2335 = vadd.xlane.f32.xlu1 %v2330_v48 }
 0xf24   : > { %v2321_v49 = vpop.f32.mrf.mxu2  ;;  %2469 = vmatpush.bf16.msra.mxu3 %v3514_v63  ;;  %v3748_v63 = vld [vmem:[#allocation17 + $0xa0] sm:$0xff] }
 0xf25   : > { %v3943_v49 = vld [vmem:[#allocation13 + $0x1] ss:$0 sm:$0xff] }
 0xf28   : > { %2470 = vmatpush.bf16.msra.mxu3 %v3506_v6  ;;  %v3745_v6 = vld [vmem:[#allocation17 + $0x88] sm:$0xff] }
 0xf2c   : > { %2471 = vmatpush.bf16.msra.mxu3 %v3498_v11 }
 0xf30   : > { %2472 = vmatpush.bf16.msra.mxu3 %v3490_v18 }
 0xf34   : > { %2473 = vmatpush.bf16.msra.mxu3 %v3482_v25 }
 0xf38   : > { %2474 = vmatpush.bf16.msra.mxu3 %v3474_v32 }
 0xf3c   : > { %2475 = vmatpush.bf16.msra.mxu3 %v3466_v39  ;;  %v3945_v39 = vld [vmem:[%s5002_s12 + $0x1] ss:$0 sm:$0xff] }
 0xf96   : > { %v2336_v58 = vpop.xlane.xlu1 %2335 }
 0xf97   : > { %v2337_v59 = vmul.f32 %v2336_v58, %v4764_v16  ;;  %v3758_v58 = vld [vmem:[#allocation17 + $0xf0] sm:$0xff] }
 0xf98   : > { %2662 = vmatpush.bf16.msra.mxu2 %v3758_v58  ;;  %v3760_v58 = vld [vmem:[#allocation19] sm:$0xff] }
 0xf99   : > { %v4913_v60 = vsub.f32 %v2330_v48, %v2337_v59  ;;  %v3751_v59 = vld [vmem:[#allocation17 + $0xb8] sm:$0xff] }
 0xf9a   : > { %2648 = vmatpush.bf16.msra.mxu1 %v3751_v59 }
 0xf9b   : > { %v2339_v61 = vmul.f32 %v4913_v60, %v4913_v60 }
 0xf9d   : > { %2340 = vadd.xlane.f32.xlu2 %v2339_v61  ;;  %v3757_v61 = vld [vmem:[#allocation17 + $0xe8] sm:$0xff] }
 0xf9e   : > { %2663 = vmatpush.bf16.msra.mxu2 %v3757_v61  ;;  %2649 = vmatpush.bf16.msra.mxu1 %v3750_v55 }
 0xfa2   : > { %2664 = vmatpush.bf16.msra.mxu2 %v3756_v62 }
 0xfa6   : > { %2665 = vmatpush.bf16.msra.mxu2 %v3755_v40 }
 0xfaa   : > { %2666 = vmatpush.bf16.msra.mxu2 %v3754_v0 }
 0xfae   : > { %2667 = vmatpush.bf16.msra.mxu2 %v3753_v2  ;;  %v3946_v2 = vld [vmem:[%s5056_s0 + $0x1] ss:$0 sm:$0xff] }
 0xfb2   : > { %2668 = vmatpush.bf16.msra.mxu2 %v3752_v4  ;;  %v3947_v4 = vld [vmem:[%s5057_s20 + $0x1] ss:$0 sm:$0xff] }
0x1010   : > { %v2341_v36 = vpop.xlane.xlu2 %2340 }
0x1011   : > { %v2342_v43 = vmul.f32 %v2341_v36, %v4764_v16 }
0x1013   : > { %v2343_v41 = vadd.f32 1e-07, %v2342_v43 }
0x1015   : > { %3993 = vrsqrt.f32 %v2343_v41  ;;  %vm2350_vm14 = vweird.f32 %v2343_v41 }
0x101b   : > { %v3994_v44 = vpop.eup %3993 }
0x101c   : > { %v2345_v45 = vmul.f32 %v3994_v44, %v2343_v41  ;;  %vm2351_vm13 = vweird.f32 %v3994_v44 }
0x101d   : > { %vm2352_vm15 = vmor %vm2350_vm14, %vm2351_vm13 }
0x101e   : > { %v2346_v19 = vmul.f32 %v3994_v44, %v2345_v45 }
0x1020   : > { %v2347_v46 = vmul.f32 0.5, %v2346_v19  ;;  %v3767_v19 = vld [vmem:[#allocation19 + $0x38] sm:$0xff] }
0x1021   : > { %2777 = vmatpush.bf16.msrb.mxu3 %v3767_v19 }
0x1022   : > { %v2348_v47 = vsub.f32 1.5, %v2347_v46 }
0x1024   : > { %v2349_v48 = vmul.f32 %v3994_v44, %v2348_v47 }
0x1026   : > { %v2353_v50 = vsel %vm2352_vm15, %v3994_v44, %v2349_v48 }
0x1027   : > { %v2354_v53 = vmul.f32 %v2353_v50, %v4913_v60  ;;  %v3749_v60 = vld [vmem:[#allocation17 + $0xa8] sm:$0xff]  ;;  %v3766_v50 = vld [vmem:[#allocation19 + $0x30] sm:$0xff] }
0x1028   : > { %2650 = vmatpush.bf16.msra.mxu1 %v3749_v60  ;;  %2778 = vmatpush.bf16.msrb.mxu3 %v3766_v50 }
0x1029   : > { %v2358_v56 = vmul.f32 %v3943_v49, %v2354_v53  ;;  %v3765_v53 = vld [vmem:[#allocation19 + $0x28] sm:$0xff] }
0x102b   : > { %v4919_v52 = vadd.f32 %v3944_v54, %v2358_v56  ;;  %v3764_v54 = vld [vmem:[#allocation19 + $0x20] sm:$0xff]  ;;  %v3763_v56 = vld [vmem:[#allocation19 + $0x18] sm:$0xff] }
0x102c   : > { %2651 = vmatpush.bf16.msra.mxu1 %v3748_v63  ;;  %2779 = vmatpush.bf16.msrb.mxu3 %v3765_v53 }
0x102d   : > { %v2363_v57 = vpack.c.bf16 %v4919_v52, %v4919_v52 }
0x102f   : > { %2476 = vmatmul.bf16.vlgmr.msra.gmra.mxu3 %v2363_v57  ;;  %2489 = vmatmul.bf16.vlgmr.msra.gmra.mxu0 %v2363_v57  ;;  %v3761_v57 = vld [vmem:[#allocation19 + $0x8] sm:$0xff] }
0x1030   : > { %2652 = vmatpush.bf16.msra.mxu1 %v3747_v1  ;;  %2780 = vmatpush.bf16.msrb.mxu3 %v3764_v54 }
0x1034   : > { %2653 = vmatpush.bf16.msra.mxu1 %v3746_v3  ;;  %2781 = vmatpush.bf16.msrb.mxu3 %v3763_v56 }
0x1038   : > { %2654 = vmatpush.bf16.msra.mxu1 %v3745_v6 }
0x103c   : > { %2655 = vmatpush.bf16.msra.mxu1 %v3744_v51 }
0x10ac   : > { %v2490_v9 = vpop.f32.mrf.mxu0 }
0x10ad   : > { %v2491_v10 = vadd.f32 %v2490_v9, %v2385_v8 }
0x10af   : > { %v2495_v11 = vmul.f32 %v2491_v10, %v2491_v10 }
0x10b1   : > { %v2497_v13 = vmul.f32 %v2495_v11, %v2491_v10 }
0x10b2   : > { %v2477_v14 = vpop.f32.mrf.mxu3 }
0x10b3   : > { %v2499_v15 = vmul.f32 0.044715, %v2497_v13  ;;  %v2478_v17 = vadd.f32 %v2477_v14, %v2384_v12 }
0x10b4   : > { %v2492_v18 = vpop.f32.mrf.mxu0 }
0x10b5   : > { %v2501_v20 = vadd.f32 %v2499_v15, %v2491_v10  ;;  %v2494_v21 = vmul.f32 %v2478_v17, %v2478_v17 }
0x10b7   : > { %v2503_v22 = vmul.f32 0.7978846, %v2501_v20  ;;  %v2496_v23 = vmul.f32 %v2494_v21, %v2478_v17 }
0x10b9   : > { %3995 = vtanh.f32 %v2503_v22  ;;  %v2498_v24 = vmul.f32 0.044715, %v2496_v23 }
0x10ba   : > { %v2479_v25 = vpop.f32.mrf.mxu3 }
0x10bb   : > { %v2500_v26 = vadd.f32 %v2498_v24, %v2478_v17 }
0x10bd   : > { %v2502_v27 = vmul.f32 0.7978846, %v2500_v26 }
0x10bf   : > { %v3996_v29 = vpop.eup %3995  ;;  %3997 = vtanh.f32 %v2502_v27 }
0x10c0   : > { %v2507_v30 = vadd.f32 1.0, %v3996_v29 }
0x10c2   : > { %v2509_v31 = vmul.f32 0.5, %v2507_v30 }
0x10c4   : > { %v2511_v32 = vmul.f32 %v2509_v31, %v2491_v10 }
0x10c5   : > { %v3998_v33 = vpop.eup %3997 }
0x10c6   : > { %v2513_v34 = vpack.c.bf16 %v2511_v32, %v2511_v32  ;;  %v2506_v5 = vadd.f32 1.0, %v3998_v33 }
0x10c8   : > { %2669 = vmatmul.bf16.vlgmr.msra.gmra.mxu2 %v2513_v34  ;;  %v2508_v35 = vmul.f32 0.5, %v2506_v5 }
0x10ca   : > { %v2510_v37 = vmul.f32 %v2508_v35, %v2478_v17 }
0x10cc   : > { %v2512_v28 = vpack.c.bf16 %v2510_v37, %v2510_v37 }
0x10ce   : > { %2656 = vmatmul.bf16.vlgmr.msra.gmra.mxu1 %v2512_v28 }
0x114b   : > { %v2657_v38 = vpop.f32.mrf.mxu1  ;;  %v2670_v42 = vpop.f32.mrf.mxu2 }
0x114c   : > { %v2658_v36 = vadd.f32 %v3945_v39, %v2657_v38 }
0x114e   : > { %v2671_v43 = vadd.f32 %v2670_v42, %v2658_v36 }
0x1150   : > { %v2674_v41 = vadd.f32 %v2671_v43, %v4919_v52  ;;  %v3762_v52 = vld [vmem:[#allocation19 + $0x10] sm:$0xff] }
0x1151   : > { %2782 = vmatpush.bf16.msrb.mxu3 %v3762_v52 }
0x1152   : > { %2679 = vadd.xlane.f32.xlu0 %v2674_v41 }
0x1153   : > { %v2659_v44 = vpop.f32.mrf.mxu1  ;;  %v2672_v45 = vpop.f32.mrf.mxu2 }
0x1155   : > { %2783 = vmatpush.bf16.msrb.mxu3 %v3761_v57 }
0x1159   : > { %2784 = vmatpush.bf16.msrb.mxu3 %v3760_v58 }
0x11c5   : > { %v2680_v46 = vpop.xlane.xlu0 %2679 }
0x11c6   : > { %v2681_v47 = vmul.f32 %v2680_v46, %v4764_v16 }
0x11c8   : > { %v2682_v48 = vsub.f32 %v2674_v41, %v2681_v47 }
0x11ca   : > { %v2683_v49 = vmul.f32 %v2682_v48, %v2682_v48 }
0x11cc   : > { %2684 = vadd.xlane.f32.xlu1 %v2683_v49 }
0x123f   : > { %v2685_v59 = vpop.xlane.xlu1 %2684 }
0x1240   : > { %v2686_v61 = vmul.f32 %v2685_v59, %v4764_v16 }
0x1242   : > { %v2687_v55 = vadd.f32 1e-07, %v2686_v61 }
0x1244   : > { %3999 = vrsqrt.f32 %v2687_v55  ;;  %vm2694_vm1 = vweird.f32 %v2687_v55 }
0x124a   : > { %v4000_v62 = vpop.eup %3999 }
0x124b   : > { %v2689_v60 = vmul.f32 %v4000_v62, %v2687_v55  ;;  %vm2695_vm0 = vweird.f32 %v4000_v62 }
0x124c   : > { %vm2696_vm2 = vmor %vm2694_vm1, %vm2695_vm0 }
0x124d   : > { %v2690_v40 = vmul.f32 %v4000_v62, %v2689_v60 }
0x124f   : > { %v2691_v63 = vmul.f32 0.5, %v2690_v40 }
0x1251   : > { %v2692_v0 = vsub.f32 1.5, %v2691_v63 }
0x1253   : > { %v2693_v1 = vmul.f32 %v4000_v62, %v2692_v0 }
0x1255   : > { %v2697_v3 = vsel %vm2696_vm2, %v4000_v62, %v2693_v1 }
0x1256   : > { %v2698_v16 = vmul.f32 %v2697_v3, %v2682_v48 }
0x1258   : > { %v2702_v6 = vmul.f32 %v3946_v2, %v2698_v16 }
0x125a   : > { %v2706_v7 = vadd.f32 %v3947_v4, %v2702_v6 }
0x125c   : > { %v2708_v51 = vpack.c.bf16 %v2706_v7, %v2706_v7  ;;  %2707 = vst [vmem:[%s757_s4] sm:$0xff] %v2706_v7 }
0x125e   : > { %2785 = vmatmul.bf16.vlgmr.msrb.gmra.mxu3 %v2708_v51 }
0x125f   : > { %4358 = shalt.err (!%p4355_p9)
}
0x1260   : > { %3810 = dma.vmem_to_hbm [thread:$0]  (%p4702_p5), %s2810_s8, 128, %s2812_s2, %s2792_s16  }
0x1261   : > { %s5059_s13 = sld [smem:[#allocation47_spill]]  ;;  %s764_s6 = scalar_lea.vmem [#allocation21], %s4736_s18 }
0x1262   : > { %s5060_s10 = sld [smem:[#allocation45_spill]]  ;;  %s2823_s9 = sshll.u32 %s764_s6, 4  ;;  %s2824_s9 = int_to_ptr.vmem [resolvable:$true] %s2823_s9 }
0x1263   : > { %s2797_s19 = scalar_lea.sflag [#allocation22], %s4733_s1 }
0x1267   : > { %s2821_s26 = scalar_lea.hbm %s5059_s13, %s3628_s7 }
0x1268   : > { %v3948_v8 = vld [vmem:[%s5060_s10] ss:$0 sm:$0xff]  ;;  %s2825_s14 = sshll.u32 %s2821_s26, 4  ;;  %s4379_s10 = scalar_lea.hbm %s5059_s13, 16  ;;  %s2826_s14 = int_to_ptr.hbm [resolvable:$true] %s2825_s14 }
0x1269   : > { %s4373_s21 = sshra.s32 %s2826_s14, 4  ;;  %s4374_s21 = int_to_ptr.hbm [resolvable:$true] %s4373_s21 }
0x126a   : > { %s4375_s8 = scalar_lea.hbm %s4374_s21, 8  ;;  %p4380_p0 = scmp.lt.s32.totalorder %s4374_s21, %s5059_s13 }
0x126b   : > { %p4376_p10 = scmp.ne.s32.totalorder %s4374_s21, %s4375_s8  ;;  %p4381_p2 = scmp.lt.s32.totalorder %s4379_s10, %s4375_s8 }
0x126d   : > { %p4377_p13 = pnand %p4376_p10, %p4702_p5  ;;  %p4382_p1 = por %p4381_p2, %p4380_p0 }
0x126f   : > { %p4378_p11 = pneg %p4377_p13 }
0x1271   : > { %p4383_p3 = pnand %p4382_p1, %p4378_p11 }
0x12e1   : > { %v2786_v9 = vpop.f32.mrf.mxu3 }
0x12e2   : > { %v2787_v10 = vadd.f32 %v3948_v8, %v2786_v9 }
0x12e4   : > { %2790 = vst [vmem:[%s764_s6] sm:$0xff] %v2787_v10 }
0x12e5   : > { %4386 = shalt.err (!%p4383_p3)
}
0x12e6   : > { %3811 = dma.vmem_to_hbm [thread:$0]  (%p4702_p5), %s2824_s9, 128, %s2826_s14, %s2797_s19  }
0x12e9   : > { %v2788_v11 = vpop.f32.mrf.mxu3 }
0x12ea PF: > { %s2837_s1 = sand.u32 1, %s4437_s27   ;;  %p5061_p4 = scmp.ge.s32.totalorder %s4449_s30, 2 }
0x12eb   : > { %s2838_s4 = scalar_lea.sflag [#allocation4], %s2837_s1 }
0x12ec   : > { %p3850_p12 = pnand %p5061_p4, %p4706_p6 }
0x12ee   : > { %p3851_p7 = pneg %p3850_p12 }
0x12f0   : > { %4428 = dma.done.wait (%p3851_p7), %s2838_s4, 128  }
0x12f1   : > { %4430 = vsyncadd (%p3851_p7), %s2838_s4, 4294967168  ;;  %s2848_s22 = scalar_lea.sflag [#allocation22], %s2837_s1 }
0x12f2   : > { %4432 = dma.done.wait (%p3851_p7), %s2848_s22, 128  }
0x12f3   : > { %4434 = vsyncadd (%p3851_p7), %s2848_s22, 4294967168  ;;  %p40_p5 = scmp.ge.s32.totalorder %s4676_s11, 4   ;;  %s5062_s27 = smov %s4441_s28 }
0x12f4   : > { %s5063_s28 = smov %s4445_s29  ;;  %s5064_s29 = smov %s4687_s5 }
0x12f5   : > { %s5065_s30 = smov %s4676_s11  ;;  %42 = sbr.rel (!%p40_p5) target bundleno = 30 (0x1e), region = 202 }
0x12fa   :  { %2854 = vsyncpa [#allocation3], 1 }
0x12fb   :  { %2856 = vsyncpa [#allocation3 + $0x1], 1 }
0x12fc   :  { %2857 = vsyncpa [#allocation6], 1 }
0x12fd   :  { %2858 = vsyncpa [#allocation9], 1 }
0x12fe   :  { %2859 = vsyncpa [#allocation12], 1 }
0x12ff   :  { %2860 = vsyncpa [#allocation15], 1 }
0x1300   :  { %2861 = vsyncpa [#allocation18], 1 }
0x1301   :  { %2862 = vsyncpa [#allocation4], 1 }
0x1302   :  { %2864 = vsyncpa [#allocation4 + $0x1], 1 }
0x1303   :  { %2865 = vsyncpa [#allocation22], 1 }
0x1304   :  { %2867 = vsyncpa [#allocation22 + $0x1], 1 }

</bundles_post_ra>
